<compile_context>
chip_gen: v7x
topology: tpu7x:2x2x1
jax: 0.10.0
libtpu: 0.0.40
codegen_flags: <defaults>
</compile_context>

<pallas_src>
import functools

import jax
import jax.numpy as jnp
from jax import lax
from jax.experimental import pallas as pl
from jax.experimental.pallas import tpu as pltpu

_BN_EPS = 1e-5  # PyTorch BatchNorm2d default


def _apply_act(y, act):
    if act is None:
        return y
    if act == "relu":
        return jnp.maximum(y, 0.0)
    if act == "silu":
        return y * jax.nn.sigmoid(y)
    if act == "gelu":
        return jax.nn.gelu(y)
    raise ValueError(f"unsupported activation: {act!r}")


# ----------------------------- Pallas kernel -----------------------------

def _repvgg_kernel(x_ref, w_ref, b_ref, o_ref, *, W, rows_tile, act):
    """Fused, re-parameterized RepVggBlock row tile.

    x_ref: (1, (H+2)*W, Cin)   row-padded, flattened NHWC activation (VMEM-resident per batch)
    w_ref: (3, 3*Cin, Cout)    folded 3x3 weight; per kernel-row kh the K axis is (kw, ci)
    b_ref: (1, Cout)           folded bias (f32)
    o_ref: (1, rows_tile*W, Cout)
    """
    S = rows_tile * W              # output spatial positions in this row tile
    win_rows = S + 2 * W           # plus one halo row above and one below
    dt = w_ref.dtype

    r = pl.program_id(1)
    start = pl.multiple_of(r * S, S)                      # padded row r*rows_tile
    win = x_ref[0, pl.ds(start, win_rows), :]             # (win_rows, Cin), compute dtype

    # Rolls / masks run in f32: a single up-cast + single down-cast replaces the old 9
    # per-tap casts, and +-1 sublane shifts on packed bf16 (2 rows / sublane) are expensive.
    win_f = win.astype(jnp.float32)
    w_left = pltpu.roll(win_f, shift=1, axis=0)               # w_left[i]  = win[i-1] (kw=0)
    w_right = pltpu.roll(win_f, shift=win_rows - 1, axis=0)   # w_right[i] = win[i+1] (kw=2)

    # Column-boundary masks, applied ONCE per rolled window: the kh*W slice offsets below are
    # multiples of W, so the i % W pattern is identical for every tap.  NOTE: the roll
    # wrap-around rows (i == 0 for w_left, i == win_rows-1 for w_right) land exactly on
    # masked columns; do not change win_rows or the roll shifts without re-checking this.
    col = lax.broadcasted_iota(jnp.int32, (win_rows, 1), 0) % W
    w_left = jnp.where(col != 0, w_left, 0.0)
    w_right = jnp.where(col != (W - 1), w_right, 0.0)

    # Lane-concatenate the three windows once -> (win_rows, 3*Cin).  Each kernel row kh needs
    # only a static (sublane-aligned, W % 8 == 0) row slice, and the conv becomes 3
    # accumulating MXU matmuls with K = 3*Cin instead of one (S, 9*Cin) im2col slab.
    win3 = jnp.concatenate(
        [w_left.astype(dt), win.astype(dt), w_right.astype(dt)], axis=-1)

    y = jnp.dot(win3[0:S], w_ref[0], preferred_element_type=jnp.float32)
    for kh in (1, 2):
        y += jnp.dot(win3[kh * W:kh * W + S], w_ref[kh],
                     preferred_element_type=jnp.float32)

    y = y + b_ref[...]
    o_ref[0] = _apply_act(y, act).astype(o_ref.dtype)


# ----------------------------- Host-side weight prep (plain JAX) -----------------------------

def fuse_conv_bn(p):
    """Fold eval-mode BN into the conv.  p['w'] is OIHW (like nn.Conv2d)."""
    scale = p["gamma"] / jnp.sqrt(p["var"] + _BN_EPS)
    return p["w"] * scale[:, None, None, None], p["beta"] - p["mean"] * scale


def repvgg_equivalent_kernel_bias(params):
    """RepVGG re-parameterization (== RepVggBlock.get_equivalent_kernel_bias), done in f32.

    Returns (w, bias): w has shape (3, 3*Cin, Cout); for each kernel row kh the K axis is
    ordered (kw, ci), matching the kernel's [left, center, right] lane concat.
    """
    w3, b3 = fuse_conv_bn(params["conv1"])      # (Cout, Cin, 3, 3)
    w1, b1 = fuse_conv_bn(params["conv2"])      # (Cout, Cin, 1, 1)
    w3 = w3.at[:, :, 1, 1].add(w1[:, :, 0, 0])  # 1x1 branch -> center tap of the 3x3
    bias = b3 + b1
    w_hwio = jnp.transpose(w3, (2, 3, 1, 0))    # (3, 3, Cin, Cout)
    _, _, cin, cout = w_hwio.shape
    return w_hwio.reshape(3, 3 * cin, cout), bias


def _pick_rows_tile(H, W, B, target_s=512):
    """Largest row tile with S = rows_tile*W <= target_s (sublane-aligned, divides H)."""
    cands = [rt for rt in range(1, H + 1) if H % rt == 0 and rt * W <= target_s]
    if not cands:
        return 1
    aligned = [rt for rt in cands if (rt * W) % 8 == 0] or cands
    rt = max(aligned)
    # v7x has 2 TensorCores; keep >= 2 "parallel" grid steps when the batch alone can't.
    if B * (H // rt) < 2:
        smaller = [c for c in aligned if H // c >= 2]
        if smaller:
            rt = max(smaller)
    return rt


def _vmem_limit_bytes(H, W, Cin, Cout, S, compute_dtype, out_dtype):
    cb = jnp.dtype(compute_dtype).itemsize
    ob = jnp.dtype(out_dtype).itemsize
    win_rows = S + 2 * W
    x_blk = (H + 2) * W * Cin * cb          # whole row-padded image, resident per batch
    w_blk = 9 * Cin * Cout * cb
    b_blk = Cout * 4
    o_blk = S * Cout * ob
    # f32 window + 2 rolled/masked copies, (win_rows, 3*Cin) concat, f32 accumulator (x2).
    temps = 3 * win_rows * Cin * 4 + win_rows * 3 * Cin * cb + 2 * S * Cout * 4
    total = 2 * (x_blk + w_blk + b_blk + o_blk) + temps   # in/out blocks are double-buffered
    # 2x headroom for compiler scratch; floor at the 32 MiB default, cap below v7x's 64 MiB
    # physical VMEM.  TODO(synk): for images too large for a resident per-batch block on v7x,
    # switch in_specs[0] to row-tiled blocks (or pl.ANY + manual halo DMA) and single-buffer
    # the constant weight/bias specs with pipeline_mode=pl.Buffered(1).
    return int(min(max(2 * total, 32 * 1024 * 1024), 56 * 1024 * 1024))


def repvgg_block_forward(params, x_nchw, *, act="relu",
                         compute_dtype=jnp.bfloat16, rows_tile=None):
    """Pallas-backed RepVggBlock forward.  Input/output are NCHW like the PyTorch module."""
    B, Cin, H, W = x_nchw.shape
    w_k, bias = repvgg_equivalent_kernel_bias(params)
    Cout = w_k.shape[-1]

    if rows_tile is None:
        rows_tile = _pick_rows_tile(H, W, B)
    assert H % rows_tile == 0, (H, rows_tile)
    S = rows_tile * W

    # NCHW -> flattened NHWC (channels on the lane axis) with one zero image-row above and
    # below (row halo).  The transpose + reshape + pad fuse into a single XLA copy.
    # TODO(synk): accept/emit NHWC directly to drop this layout pass when the surrounding
    # graph is already channels-last.
    x = jnp.transpose(x_nchw, (0, 2, 3, 1)).reshape(B, H * W, Cin).astype(compute_dtype)
    xp = jnp.pad(x, ((0, 0), (W, W), (0, 0)))
    w = w_k.astype(compute_dtype)
    b2 = bias.reshape(1, Cout).astype(jnp.float32)

    kernel = functools.partial(_repvgg_kernel, W=W, rows_tile=rows_tile, act=act)
    out = pl.pallas_call(
        kernel,
        out_shape=jax.ShapeDtypeStruct((B, H * W, Cout), x_nchw.dtype),
        grid_spec=pltpu.PrefetchScalarGridSpec(
            num_scalar_prefetch=0,
            grid=(B, H // rows_tile),
            in_specs=[
                # Whole (row-padded) image per batch element; the block index is constant
                # along the row axis so it is DMA'd once per batch and stays VMEM-resident.
                pl.BlockSpec((1, (H + 2) * W, Cin), lambda b, r: (b, 0, 0)),
                pl.BlockSpec((3, 3 * Cin, Cout), lambda b, r: (0, 0, 0)),
                pl.BlockSpec((1, Cout), lambda b, r: (0, 0)),
            ],
            out_specs=pl.BlockSpec((1, S, Cout), lambda b, r: (b, r, 0)),
        ),
        compiler_params=pltpu.CompilerParams(
            dimension_semantics=("parallel", "parallel"),
            vmem_limit_bytes=_vmem_limit_bytes(H, W, Cin, Cout, S,
                                               compute_dtype, x_nchw.dtype),
        ),
    )(xp, w, b2)
    return jnp.transpose(out.reshape(B, H, W, Cout), (0, 3, 1, 2))


# ----------------------------- Params & pure-JAX reference -----------------------------

def _init_conv_norm(key, cin, cout, k):
    ks = jax.random.split(key, 5)
    return dict(
        w=0.1 * jax.random.normal(ks[0], (cout, cin, k, k), jnp.float32),  # OIHW
        gamma=1.0 + 0.1 * jax.random.normal(ks[1], (cout,), jnp.float32),
        beta=0.1 * jax.random.normal(ks[2], (cout,), jnp.float32),
        mean=0.1 * jax.random.normal(ks[3], (cout,), jnp.float32),
        var=0.5 + jnp.abs(jax.random.normal(ks[4], (cout,), jnp.float32)),
    )


def init_repvgg_block(key, ch_in, ch_out):
    k1, k2 = jax.random.split(key)
    return dict(conv1=_init_conv_norm(k1, ch_in, ch_out, 3),
                conv2=_init_conv_norm(k2, ch_in, ch_out, 1))


def _ref_conv_bn(x_nhwc, p, k):
    pad = (k - 1) // 2
    w_hwio = jnp.transpose(p["w"], (2, 3, 1, 0))
    y = lax.conv_general_dilated(
        x_nhwc, w_hwio, (1, 1), [(pad, pad), (pad, pad)],
        dimension_numbers=("NHWC", "HWIO", "NHWC"))
    scale = p["gamma"] / jnp.sqrt(p["var"] + _BN_EPS)
    return y * scale + (p["beta"] - p["mean"] * scale)


def repvgg_block_reference(params, x_nchw, act="relu"):
    x = jnp.transpose(x_nchw, (0, 2, 3, 1))
    y = _ref_conv_bn(x, params["conv1"], 3) + _ref_conv_bn(x, params["conv2"], 1)
    return jnp.transpose(_apply_act(y, act), (0, 3, 1, 2))


# ----------------------------- main -----------------------------

if __name__ == "__main__":
    key = jax.random.PRNGKey(0)
    k_x, k_p = jax.random.split(key)

    # Cout a multiple of 128 keeps output stores lane-dense (matches production widths).
    B, C, H, W = 2, 128, 16, 16
    x = jax.random.normal(k_x, (B, C, H, W), jnp.float32)
    params = init_repvgg_block(k_p, C, C)

    ref = repvgg_block_reference(params, x)            # act='relu' (RepVggBlock default)

    # f32 path: differences come from MXU input truncation / accumulation order.
    out_f32 = jax.block_until_ready(
        repvgg_block_forward(params, x, compute_dtype=jnp.float32))
    assert out_f32.shape == (B, C, H, W), out_f32.shape
    assert jnp.allclose(out_f32, ref, atol=7e-2, rtol=5e-2), \
        float(jnp.max(jnp.abs(out_f32 - ref)))

    # bf16 activations/weights with f32 accumulation: quantization-level error expected.
    out_bf16 = jax.block_until_ready(
        repvgg_block_forward(params, x, compute_dtype=jnp.bfloat16))
    assert out_bf16.shape == (B, C, H, W), out_bf16.shape
    assert jnp.allclose(out_bf16, ref, atol=2e-1, rtol=1e-1), \
        float(jnp.max(jnp.abs(out_bf16 - ref)))

    print("KERNEL_OK")
</pallas_src>

<mosaic_0001>
module attributes {stable_mosaic.version = 11 : i64} {
  func.func @_repvgg_kernel(%arg0: i32, %arg1: i32, %arg2: memref<1x288x128xf32, #tpu.memory_space<vmem>>, %arg3: memref<3x384x128xf32, #tpu.memory_space<vmem>>, %arg4: memref<1x128xf32, #tpu.memory_space<vmem>>, %arg5: memref<1x256x128xf32, #tpu.memory_space<vmem>>) attributes {dimension_semantics = [#tpu.dimension_semantics<parallel>, #tpu.dimension_semantics<parallel>], iteration_bounds = array<i64: 2, 1>, scalar_prefetch = 0 : i64, scratch_operands = 0 : i64, tpu.core_type = #tpu.core_type<tc>, window_params = [{transform_indices = @transform_0, window_bounds = array<i64: 1, 288, 128>}, {pipeline_mode = #tpu.pipeline_mode<synchronous>, transform_indices = @transform_1, window_bounds = array<i64: 3, 384, 128>}, {pipeline_mode = #tpu.pipeline_mode<synchronous>, transform_indices = @transform_2, window_bounds = array<i64: 1, 128>}, {transform_indices = @transform_3, window_bounds = array<i64: 1, 256, 128>}]} {
    %c256_i32 = arith.constant 256 : i32
    %0 = arith.muli %arg1, %c256_i32 : i32
    %1 = tpu.assume_multiple %0, 256 : i32
    %c0 = arith.constant 0 : index
    %2 = arith.index_cast %1 : i32 to index
    %c0_0 = arith.constant 0 : index
    %3 = vector.load %arg2[%c0, %2, %c0_0] : memref<1x288x128xf32, #tpu.memory_space<vmem>>, vector<1x288x128xf32>
    %4 = vector.shape_cast %3 : vector<1x288x128xf32> to vector<288x128xf32>
    %c1_i32 = arith.constant 1 : i32
    %5 = tpu.dynamic_rotate %4 by %c1_i32 dim 0 : vector<288x128xf32>, i32 -> vector<288x128xf32>
    %c287_i32 = arith.constant 287 : i32
    %6 = tpu.dynamic_rotate %4 by %c287_i32 dim 0 : vector<288x128xf32>, i32 -> vector<288x128xf32>
    %7 = tpu.iota {dimensions = array<i32: 0>} : vector<288x1xi32>
    %c16_i32 = arith.constant 16 : i32
    %c0_i32 = arith.constant 0 : i32
    %8 = arith.cmpi eq, %c16_i32, %c0_i32 : i32
    %c1_i32_1 = arith.constant 1 : i32
    %9 = arith.select %8, %c1_i32_1, %c16_i32 : i32
    %10 = vector.broadcast %9 : i32 to vector<288x1xi32>
    %11 = arith.remsi %7, %10 : vector<288x1xi32>
    %c0_i32_2 = arith.constant 0 : i32
    %12 = vector.broadcast %c0_i32_2 : i32 to vector<288x1xi32>
    %13 = arith.cmpi ne, %11, %12 : vector<288x1xi32>
    %c0_i32_3 = arith.constant 0 : i32
    %14 = vector.broadcast %c0_i32_3 : i32 to vector<288x1xi32>
    %15 = arith.cmpi slt, %11, %14 : vector<288x1xi32>
    %c0_i32_4 = arith.constant 0 : i32
    %16 = arith.cmpi slt, %9, %c0_i32_4 : i32
    %17 = vector.broadcast %16 : i1 to vector<288x1xi1>
    %18 = vector.broadcast %17 : vector<288x1xi1> to vector<288x1xi1>
    %19 = arith.xori %15, %18 : vector<288x1xi1>
    %20 = arith.andi %19, %13 : vector<288x1xi1>
    %21 = vector.broadcast %9 : i32 to vector<288x1xi32>
    %22 = arith.addi %11, %21 : vector<288x1xi32>
    %23 = arith.select %20, %22, %11 : vector<288x1xi1>, vector<288x1xi32>
    %c0_i32_5 = arith.constant 0 : i32
    %24 = vector.broadcast %c0_i32_5 : i32 to vector<288x1xi32>
    %25 = arith.cmpi ne, %23, %24 : vector<288x1xi32>
    %cst = arith.constant 0.000000e+00 : f32
    %26 = vector.shape_cast %25 : vector<288x1xi1> to vector<288x1xi1>
    %27 = vector.broadcast %26 : vector<288x1xi1> to vector<288x128xi1>
    %28 = vector.broadcast %cst : f32 to vector<288x128xf32>
    %29 = arith.select %27, %5, %28 : vector<288x128xi1>, vector<288x128xf32>
    %c15_i32 = arith.constant 15 : i32
    %30 = vector.broadcast %c15_i32 : i32 to vector<288x1xi32>
    %31 = arith.cmpi ne, %23, %30 : vector<288x1xi32>
    %cst_6 = arith.constant 0.000000e+00 : f32
    %32 = vector.shape_cast %31 : vector<288x1xi1> to vector<288x1xi1>
    %33 = vector.broadcast %32 : vector<288x1xi1> to vector<288x128xi1>
    %34 = vector.broadcast %cst_6 : f32 to vector<288x128xf32>
    %35 = arith.select %33, %6, %34 : vector<288x128xi1>, vector<288x128xf32>
    %36 = tpu.concatenate %29, %4, %35 in 1 : vector<288x128xf32>, vector<288x128xf32>, vector<288x128xf32> -> vector<288x384xf32>
    %37 = vector.extract_strided_slice %36 {offsets = [0, 0], sizes = [256, 384], strides = [1, 1]} : vector<288x384xf32> to vector<256x384xf32>
    %c0_7 = arith.constant 0 : index
    %c0_8 = arith.constant 0 : index
    %c0_9 = arith.constant 0 : index
    %38 = vector.load %arg3[%c0_7, %c0_8, %c0_9] : memref<3x384x128xf32, #tpu.memory_space<vmem>>, vector<1x384x128xf32>
    %39 = vector.shape_cast %38 : vector<1x384x128xf32> to vector<384x128xf32>
    %cst_10 = arith.constant dense<0.000000e+00> : vector<256x128xf32>
    %40 = tpu.matmul %37, %39, %cst_10 {dimension_numbers = #tpu.dot_dimension_numbers<[1], [0], [0], [1], [0, 0, 1, 1], [], []>} : vector<256x384xf32>, vector<384x128xf32>, vector<256x128xf32> -> vector<256x128xf32>
    %41 = vector.extract_strided_slice %36 {offsets = [16, 0], sizes = [256, 384], strides = [1, 1]} : vector<288x384xf32> to vector<256x384xf32>
    %c1 = arith.constant 1 : index
    %c0_11 = arith.constant 0 : index
    %c0_12 = arith.constant 0 : index
    %42 = vector.load %arg3[%c1, %c0_11, %c0_12] : memref<3x384x128xf32, #tpu.memory_space<vmem>>, vector<1x384x128xf32>
    %43 = vector.shape_cast %42 : vector<1x384x128xf32> to vector<384x128xf32>
    %cst_13 = arith.constant dense<0.000000e+00> : vector<256x128xf32>
    %44 = tpu.matmul %41, %43, %cst_13 {dimension_numbers = #tpu.dot_dimension_numbers<[1], [0], [0], [1], [0, 0, 1, 1], [], []>} : vector<256x384xf32>, vector<384x128xf32>, vector<256x128xf32> -> vector<256x128xf32>
    %45 = arith.addf %40, %44 : vector<256x128xf32>
    %46 = vector.extract_strided_slice %36 {offsets = [32, 0], sizes = [256, 384], strides = [1, 1]} : vector<288x384xf32> to vector<256x384xf32>
    %c2 = arith.constant 2 : index
    %c0_14 = arith.constant 0 : index
    %c0_15 = arith.constant 0 : index
    %47 = vector.load %arg3[%c2, %c0_14, %c0_15] : memref<3x384x128xf32, #tpu.memory_space<vmem>>, vector<1x384x128xf32>
    %48 = vector.shape_cast %47 : vector<1x384x128xf32> to vector<384x128xf32>
    %cst_16 = arith.constant dense<0.000000e+00> : vector<256x128xf32>
    %49 = tpu.matmul %46, %48, %cst_16 {dimension_numbers = #tpu.dot_dimension_numbers<[1], [0], [0], [1], [0, 0, 1, 1], [], []>} : vector<256x384xf32>, vector<384x128xf32>, vector<256x128xf32> -> vector<256x128xf32>
    %50 = arith.addf %45, %49 : vector<256x128xf32>
    %c0_17 = arith.constant 0 : index
    %c0_18 = arith.constant 0 : index
    %51 = vector.load %arg4[%c0_17, %c0_18] : memref<1x128xf32, #tpu.memory_space<vmem>>, vector<1x128xf32>
    %52 = vector.broadcast %51 : vector<1x128xf32> to vector<256x128xf32>
    %53 = arith.addf %50, %52 : vector<256x128xf32>
    %cst_19 = arith.constant 0.000000e+00 : f32
    %54 = vector.broadcast %cst_19 : f32 to vector<256x128xf32>
    %55 = arith.maximumf %53, %54 : vector<256x128xf32>
    %c0_20 = arith.constant 0 : index
    %c0_21 = arith.constant 0 : index
    %c0_22 = arith.constant 0 : index
    %56 = vector.load %arg5[%c0_20, %c0_21, %c0_22] : memref<1x256x128xf32, #tpu.memory_space<vmem>>, vector<1x256x128xf32>
    %57 = vector.shape_cast %56 : vector<1x256x128xf32> to vector<256x128xf32>
    %58 = vector.shape_cast %55 : vector<256x128xf32> to vector<1x256x128xf32>
    tpu.vector_store %arg5[%c0_20, %c0_21, %c0_22], %58 {strides = array<i32>} : memref<1x256x128xf32, #tpu.memory_space<vmem>>, vector<1x256x128xf32>,
    return
  }
  func.func @transform_0(%arg0: i32, %arg1: i32) -> (i32, i32, i32) {
    %c0_i32 = arith.constant 0 : i32
    %c0_i32_0 = arith.constant 0 : i32
    %c0_i32_1 = arith.constant 0 : i32
    return %arg0, %c0_i32, %c0_i32_0 : i32, i32, i32
  }
  func.func @transform_1(%arg0: i32, %arg1: i32) -> (i32, i32, i32) {
    %c0_i32 = arith.constant 0 : i32
    %c0_i32_0 = arith.constant 0 : i32
    %c0_i32_1 = arith.constant 0 : i32
    %c0_i32_2 = arith.constant 0 : i32
    return %c0_i32, %c0_i32_0, %c0_i32_1 : i32, i32, i32
  }
  func.func @transform_2(%arg0: i32, %arg1: i32) -> (i32, i32) {
    %c0_i32 = arith.constant 0 : i32
    %c0_i32_0 = arith.constant 0 : i32
    %c0_i32_1 = arith.constant 0 : i32
    return %c0_i32, %c0_i32_0 : i32, i32
  }
  func.func @transform_3(%arg0: i32, %arg1: i32) -> (i32, i32, i32) {
    %c0_i32 = arith.constant 0 : i32
    %c0_i32_0 = arith.constant 0 : i32
    return %arg0, %arg1, %c0_i32 : i32, i32, i32
  }
}

</mosaic_0001>

<bundles_post_ra>
// kernel: tpu_custom_call.1
= control target key start
LH: loop header
LB: loop body
LE: loop exit
PB: predicated region body
PF: predicated region fallthrough
CT: control target
= control target key end

     0   :  { %8 = vsyncpa [#allocation3], 0  ;;  %s5704_s0 = inlined_call_operand.hbm [shape: f32[2,288,128], index: 0, kind: input, shape index: {}]   ;;  %s5705_s1 = inlined_call_operand.hbm [shape: f32[3,384,128], index: 1, kind: input, shape index: {}]   ;;  %s5706_s2 = inlined_call_operand.vmem [shape: f32[1,128], index: 2, kind: input, shape index: {}]   ;;  %s5707_s3 = inlined_call_operand.hbm [shape: f32[2,256,128], index: 3, kind: output, shape index: {}]  }
   0x1   :  { %10 = vsyncpa [#allocation3 + $0x1], 0 }
   0x2   :  { %11 = vsyncpa [#allocation6], 0 }
   0x3   :  { %12 = vsyncpa [#allocation4], 0 }
   0x4   :  { %14 = vsyncpa [#allocation4 + $0x1], 0  ;;  %s3926_s12 = smov 0   ;;  %s3928_s13 = smov 0  }
   0x5   :  { %s3930_s14 = smov 0   ;;  %s3932_s15 = smov 0  }
   0x6   :  { %s3934_s16 = smov 0   ;;  %s3936_s17 = smov 0  }
   0x7 LB: > { %s2903_s18 = sadd.s32 4294967295, %s3896_s17   ;;  %s2904_s19 = sadd.s32 4294967294, %s3896_s17   ;;  %s3896_s17 = sphi %s3936_s17, %s20_s17   ;;  %s3892_s16 = sphi %s3934_s16, %s6171_s16   ;;  %s3888_s15 = sphi %s3932_s15, %s6170_s15   ;;  %s3884_s14 = sphi %s3930_s14, %s6169_s14   ;;  %s3880_s13 = sphi %s3928_s13, %s6168_s13   ;;  %s3876_s12 = sphi %s3926_s12, %s6167_s12  }
   0x8   : > { %p52_p0 = scmp.ne.s32.totalorder %s3880_s13, %s3876_s12  ;;  %p3960_p1 = scmp.eq.s32.totalorder %s2903_s18, 0 }
   0x9   : > { %p3964_p2 = scmp.eq.s32.totalorder %s2903_s18, 1  ;;  %p126_p3 = scmp.eq.s32.totalorder %s2904_s19, 1 }
   0xa   : > { %s5877_s20 = scalar_select %p3960_p1, 1, 0 }
   0xb   : > { %s5878_s21 = scalar_select %p3964_p2, 1, 0 }
   0xc   : > { %p3970_p4 = por %p3960_p1, %p52_p0  ;;  %p2905_p5 = scmp.ge.s32.totalorder %s3896_s17, 1 }
   0xd   : > { %p3975_p6 = por %p126_p3, %p52_p0  ;;  %p133_p7 = scmp.lt.s32.totalorder %s3896_s17, 3 }
   0xe   : > { %s5879_s22 = scalar_select %p3970_p4, 1, 0 }
   0xf   : > { %s5880_s23 = scalar_select %p3975_p6, 1, 0 }
  0x10   : > { %p3980_p8 = pnand %p2905_p5, %p133_p7  ;;  %s3898_s25 = smov [#allocation5]  }
  0x11   : > { %s145_s26 = sshll.u32 %s3898_s25, 4  ;;  %s32_s28 = sadd.s32 1, %s3892_s16  ;;  %s146_s26 = int_to_ptr.vmem [resolvable:$true] %s145_s26 }
  0x12   : > { %s5881_s24 = scalar_select %p3980_p8, 1, 0 }
  0x13   : > { %p3650_p9 = pneg %p3980_p8  ;;  %s3752_s4 = scalar_lea.hbm %s5705_s1, 18432 }
  0x14   : > { %p3753_p12 = scmp.ne.s32.totalorder %s5705_s1, %s3752_s4  ;;  %p3759_p5 = scmp.lt.u32.totalorder %s3752_s4, %s5705_s1 }
  0x15   : > { %p3989_p11 = pnand %p3650_p9, %p3960_p1 }
  0x17   : > { %p3754_p13 = pneg %p3989_p11 }
  0x19   : > { %p3755_p0 = pnand %p3754_p13, %p3753_p12 }
  0x1b   : > { %p3756_p3 = pneg %p3755_p0 }
  0x1d   : > { %p3761_p7 = pnand %p3759_p5, %p3756_p3 }
  0x1f   : > { %3764 = shalt.err (!%p3761_p7)
}
  0x20   : > { %s3765_s9 = scalar_lea.vmem %s146_s26, 18432  ;;  %p3773_p1 = scmp.lt.s32.totalorder %s146_s26, %s146_s26 }
  0x21   : > { %p3766_p9 = scmp.ne.s32.totalorder %s146_s26, %s3765_s9  ;;  %p3774_p4 = scmp.lt.s32.totalorder %s3765_s9, %s3765_s9 }
  0x23   : > { %p3768_p10 = pnand %p3766_p9, %p3754_p13  ;;  %p3775_p8 = por %p3774_p4, %p3773_p1 }
  0x25   : > { %p3769_p6 = pneg %p3768_p10 }
  0x27   : > { %p3776_p2 = pnand %p3775_p8, %p3769_p6 }
  0x29   : > { %3779 = shalt.err (!%p3776_p2)
}
  0x2a   : > { %s3899_s10 = smov 128   ;;  %s3900_s11 = smov 8  }
  0x2b   : > { %3653 = dma.hbm_to_vmem [thread:$0]  (!%p3989_p11), %s5705_s1, 18432, %s146_s26, [#allocation6], %s3899_s10, %s3899_s10, %s3900_s11  }
  0x2c   : > { %p34_p1 = scmp.ge.s32.totalorder %s32_s28, 2  ;;  %s39_s25 = sadd.s32 1, %s3884_s14 }
  0x2d   : > { %p46_p2 = scmp.ne.s32.totalorder %s3884_s14, %s3880_s13  ;;  %p47_p4 = scmp.eq.s32.totalorder %s3896_s17, 0 }
  0x2e   : > { %s6173_s28 = smov (%p34_p1, %s32_s28), 0  ;;  %p5883_p8 = scmp.ne.s32.totalorder %s5878_s21, 0 }
  0x2f   : > { %p48_p6 = por %p47_p4, %p46_p2  ;;  %s36_s27 = ssub.s32 %s3892_s16, %s6173_s28 }
  0x30   : > { %p4021_p10 = por %p5883_p8, %p46_p2  ;;  %p3663_p12 = scmp.lt.s32.totalorder %s3896_s17, 2 }
  0x31   : > { %p37_p13 = scmp.eq.s32.totalorder %s36_s27, 0  ;;  %s162_s30 = sand.u32 1, %s3884_s14  }
  0x32   : > { %s3639_s4 = smul.u32 288, %s162_s30  ;;  %p4033_p11 = pnand %p3663_p12, %p48_p6 }
  0x33   : > { %s4030_s5 = scalar_select %p37_p13, %s3884_s14, %s39_s25  }
  0x34   : > { %s3640_s26 = smul.u32 4608, %s3892_s16  ;;  %s166_s6 = scalar_lea.vmem [#allocation2], %s3639_s4 }
  0x35   : > { %s173_s7 = sshll.u32 %s166_s6, 4  ;;  %s4044_s19 = scalar_lea.sflag [#allocation3], %s162_s30  ;;  %s4042_s7 = int_to_ptr.vmem [resolvable:$true] %s173_s7 }
  0x36   : > { %s4040_s18 = scalar_lea.hbm %s5704_s0, %s3640_s26  ;;  %p3782_p3 = pneg %p4033_p11 }
  0x37   : > { %s3780_s25 = scalar_lea.hbm %s4040_s18, 4608  ;;  %s3785_s26 = scalar_lea.hbm %s5704_s0, 9216 }
  0x38   : > { %p3781_p0 = scmp.ne.s32.totalorder %s4040_s18, %s3780_s25  ;;  %p3786_p9 = scmp.lt.u32.totalorder %s4040_s18, %s5704_s0 }
  0x39   : > { %p3787_p1 = scmp.lt.u32.totalorder %s3785_s26, %s3780_s25  ;;  %p3789_p4 = scmp.lt.u32.totalorder %s3780_s25, %s4040_s18 }
  0x3a   : > { %p3783_p5 = pnand %p3782_p3, %p3781_p0 }
  0x3b   : > { %p3788_p2 = por %p3787_p1, %p3786_p9 }
  0x3c   : > { %p3784_p7 = pneg %p3783_p5 }
  0x3d   : > { %p3790_p6 = por %p3789_p4, %p3788_p2 }
  0x3f   : > { %p3791_p8 = pnand %p3790_p6, %p3784_p7 }
  0x41   : > { %3794 = shalt.err (!%p3791_p8)
}
  0x42   : > { %s3795_s30 = scalar_lea.vmem %s4042_s7, 4608  ;;  %s3901_s21 = smov [#allocation2]  }
  0x43   : > { %p3796_p12 = scmp.ne.s32.totalorder %s4042_s7, %s3795_s30  ;;  %s3800_s27 = sshll.u32 %s3901_s21, 4  ;;  %s3801_s27 = int_to_ptr.vmem [resolvable:$false] %s3800_s27 }
  0x44   : > { %s3802_s4 = scalar_lea.vmem %s3801_s27, 9216  ;;  %p3803_p5 = scmp.lt.s32.totalorder %s4042_s7, %s3801_s27 }
  0x45   : > { %p3798_p13 = pnand %p3796_p12, %p3782_p3  ;;  %p3804_p9 = scmp.lt.s32.totalorder %s3802_s4, %s3795_s30 }
  0x47   : > { %p3799_p0 = pneg %p3798_p13  ;;  %p3805_p1 = por %p3804_p9, %p3803_p5 }
  0x49   : > { %p3806_p2 = pnand %p3805_p1, %p3799_p0 }
  0x4b   : > { %3809 = shalt.err (!%p3806_p2)
}
  0x4c   : > { %3657 = dma.hbm_to_vmem [thread:$0]  (!%p4033_p11), %s4040_s18, 4608, %s4042_s7, %s4044_s19, %s3899_s10, %s3899_s10, %s3900_s11  }
  0x4d   : > { %p5886_p3 = scmp.ne.s32.totalorder %s5881_s24, 0 }
  0x4f   : > { %185 = sbr.rel (%p5886_p3) target bundleno = 681 (0x2a9), region = 32 }
  0x56   : > { %s4078_s25 = sand.u32 1, %s3880_s13   ;;  %p5887_p7 = scmp.ne.s32.totalorder %s5879_s22, 0 }
  0x57   : > { %s3641_s26 = smul.u32 288, %s4078_s25  ;;  %s188_s6 = scalar_lea.sflag [#allocation3], %s4078_s25 }
  0x59   : > { %s4082_s9 = scalar_lea.vmem [#allocation2], %s3641_s26 }
  0x5a   : > { %3863 = dma.done.wait (%p5887_p7), %s188_s6, 4608  }
  0x5b   : > { %3865 = vsyncadd (%p5887_p7), %s188_s6, 4294962688  ;;  %p5888_p11 = scmp.ne.s32.totalorder %s5877_s20, 0 }
  0x5d   : > { %3867 = dma.done.wait (%p5888_p11), [#allocation6], 18432  }
  0x5e   : > { %3869 = vsyncadd (%p5888_p11), [#allocation6], 4294948864  ;;  %v5713_v0 = vmov 0.0|0.0   ;;  %v1209_v1 = vld [vmem:[#allocation5 + $0x180] sm:$0xff]  ;;  %v1210_v2 = vld [vmem:[#allocation5 + $0x188] sm:$0xff]  ;;  %v293_v17 = vlaneseq  ;;  %s2911_s24 = sshll.u32 %s4078_s25, 8 }
  0x5f   : > { %3399 = vmatprep.subr.bf16.mxu0 %v5713_v0  ;;  %v1241_v3 = vld [vmem:[#allocation5 + $0x280] sm:$0xff]  ;;  %v3400_v4 = vpack.c.bf16 %v1210_v2, %v1209_v1  ;;  %v1242_v5 = vld [vmem:[#allocation5 + $0x288] sm:$0xff]  ;;  %v1211_v6 = vld [vmem:[#allocation5 + $0x190] sm:$0xff]  ;;  %s5553_s10 = scalar_lea.vmem [#allocation7], %s2911_s24  ;;  %s3014_s11 = sshll.u32 %s3888_s15, 12 }
  0x60   : > { %v1212_v7 = vld [vmem:[#allocation5 + $0x198] sm:$0xff]  ;;  %v3447_v8 = vpack.c.bf16 %v1242_v5, %v1241_v3  ;;  %v1243_v9 = vld [vmem:[#allocation5 + $0x290] sm:$0xff]  ;;  %v1245_v13 = vld [vmem:[#allocation5 + $0x2a0] sm:$0xff]  ;;  %v4095_v24 = vshrl.u32 %v293_v17, 7  ;;  %s2807_s7 = sshll.u32 %s5553_s10, 4  ;;  %s5652_s19 = scalar_lea.hbm %s5707_s3, %s3014_s11  ;;  %s5654_s7 = int_to_ptr.vmem [resolvable:$true] %s2807_s7 }
  0x61   : > { %v1244_v10 = vld [vmem:[#allocation5 + $0x298] sm:$0xff]  ;;  %3401 = vmatpush1.bf16.msra.mxu0 %v3400_v4  ;;  %v3403_v11 = vpack.c.bf16 %v1212_v7, %v1211_v6  ;;  %v1246_v14 = vld [vmem:[#allocation5 + $0x2a8] sm:$0xff]  ;;  %v1213_v15 = vld [vmem:[#allocation5 + $0x1a0] sm:$0xff]  ;;  %s2792_s30 = scalar_lea.sflag [#allocation4], %s4078_s25  ;;  %s3810_s21 = scalar_lea.vmem %s5654_s7, 4096 }
  0x62   : > { %v3451_v12 = vpack.c.bf16 %v1244_v10, %v1243_v9  ;;  %3448 = vmatprep.subr.bf16.mxu1 %v3447_v8  ;;  %3402 = vmatprep.subr.bf16.mxu0 %v5713_v0  ;;  %v1214_v16 = vld [vmem:[#allocation5 + $0x1a8] sm:$0xff]  ;;  %v3455_v18 = vpack.c.bf16 %v1246_v14, %v1245_v13  ;;  %v1247_v20 = vld [vmem:[#allocation5 + $0x2b0] sm:$0xff]  ;;  %v1248_v21 = vld [vmem:[#allocation5 + $0x2b8] sm:$0xff]  ;;  %5889 = vst [vmem:[#allocation11_spill] sm:$0xff] %v4095_v24  ;;  %vm5779_vm0 = vcmp.lt.s32.totalorder %v4095_v24, 7  ;;  %v407_v54 = vadd.s32 24, %v4095_v24  ;;  %p3811_p4 = scmp.ne.s32.totalorder %s5654_s7, %s3810_s21 }
  0x63   : > { %3450 = vmatpush3.bf16.msra.mxu1 %v3447_v8  ;;  %v3406_v19 = vpack.c.bf16 %v1214_v16, %v1213_v15  ;;  %v1215_v22 = vld [vmem:[#allocation5 + $0x1b0] sm:$0xff]  ;;  %v1216_v23 = vld [vmem:[#allocation5 + $0x1b8] sm:$0xff]  ;;  %v3459_v25 = vpack.c.bf16 %v1248_v21, %v1247_v20  ;;  %v1249_v28 = vld [vmem:[#allocation5 + $0x2c0] sm:$0xff]  ;;  %v409_v61 = vadd.s32 40, %v4095_v24  ;;  %v411_v10 = vadd.s32 56, %v4095_v24  ;;  %s3903_s15 = smov [#allocation7]  }
  0x64   : > { %3452 = vmatprep.subr.bf16.mxu1 %v3451_v12  ;;  %v4098_v26 = vld [vmem:[%s4082_s9 + $0x10] sm:$0xff]  ;;  %v3409_v27 = vpack.c.bf16 %v1216_v23, %v1215_v22  ;;  %v1250_v29 = vld [vmem:[#allocation5 + $0x2c8] sm:$0xff]  ;;  %v4101_v30 = vld [vmem:[%s4082_s9 + $0x18] sm:$0xff]  ;;  %v465_v63 = vand.u32 15, %v407_v54  ;;  %vm5782_vm9 = vcmp.lt.s32.totalorder %v4095_v24, 1  ;;  %p3812_p6 = pnand %p3811_p4, %p4021_p10  ;;  %s3814_s27 = sshll.u32 %s3903_s15, 4  ;;  %s3815_s27 = int_to_ptr.vmem [resolvable:$false] %s3814_s27 }
  0x65   : > { %3404 = vmatpush1.bf16.msra.mxu0 %v3403_v11  ;;  %v5712_v31 = vrot.slane %v4098_v26, 1  ;;  %1321 = vmatprep.mubr.f32.mxu0 %v4098_v26  ;;  %v1217_v32 = vld [vmem:[#allocation5 + $0x1c0] sm:$0xff]  ;;  %v1218_v33 = vld [vmem:[#allocation5 + $0x1c8] sm:$0xff]  ;;  %v335_v34 = vrot.slane %v4101_v30, 1  ;;  %v3463_v35 = vpack.c.bf16 %v1250_v29, %v1249_v28  ;;  %v1251_v38 = vld [vmem:[#allocation5 + $0x2d0] sm:$0xff]  ;;  %v479_v9 = vand.u32 15, %v409_v61  ;;  %p3817_p12 = scmp.lt.s32.totalorder %s5654_s7, %s3815_s27 }
  0x66   : > { %3405 = vmatprep.subr.bf16.mxu0 %v5713_v0  ;;  %v3412_v37 = vpack.c.bf16 %v1218_v33, %v1217_v32  ;;  %v1252_v39 = vld [vmem:[#allocation5 + $0x2d8] sm:$0xff]  ;;  %v1219_v40 = vld [vmem:[#allocation5 + $0x1d0] sm:$0xff]  ;;  %v1253_v44 = vld [vmem:[#allocation5 + $0x2e0] sm:$0xff]  ;;  %vm4145_vm1 = vcmp.ne.s32.totalorder %v465_v63, 15  ;;  %v5897_v29 = vmov 0  ;;  %p3813_p8 = pneg %p3812_p6  ;;  %s3816_s4 = scalar_lea.vmem %s3815_s27, 8192 }
  0x67   : > { %3454 = vmatpush3.bf16.msra.mxu1 %v3451_v12  ;;  %v4114_v36 = vsel %vm5779_vm0, %v5712_v31, %v335_v34  ;;  %v1220_v41 = vld [vmem:[#allocation5 + $0x1d8] sm:$0xff]  ;;  %v3467_v42 = vpack.c.bf16 %v1252_v39, %v1251_v38  ;;  %v1254_v45 = vld [vmem:[#allocation5 + $0x2e8] sm:$0xff]  ;;  %v1221_v46 = vld [vmem:[#allocation5 + $0x1e0] sm:$0xff]  ;;  %v5892_v12 = vmov 0  ;;  %vm4172_vm2 = vcmp.ne.s32.totalorder %v479_v9, 15  ;;  %p3818_p13 = scmp.lt.s32.totalorder %s3816_s4, %s3810_s21 }
  0x68   : > { %3456 = vmatprep.subr.bf16.mxu1 %v3455_v18  ;;  %5890 = vst [vmem:[#allocation12_spill] sm:$0xff] %v4114_v36  ;;  %3191 = vmatprep.mubr.f32.mxu1 %v4114_v36  ;;  %v3415_v43 = vpack.c.bf16 %v1220_v41, %v1219_v40  ;;  %v1222_v47 = vld [vmem:[#allocation5 + $0x1e8] sm:$0xff]  ;;  %v3471_v48 = vpack.c.bf16 %v1254_v45, %v1253_v44  ;;  %v1255_v50 = vld [vmem:[#allocation5 + $0x2f0] sm:$0xff]  ;;  %v1256_v51 = vld [vmem:[#allocation5 + $0x2f8] sm:$0xff]  ;;  %v5893_v12 = vsel %vm4145_vm1, 4294967295, %v5892_v12  ;;  %v5898_v29 = vsel %vm4172_vm2, 4294967295, %v5897_v29 }
  0x69   : > { %3407 = vmatpush1.bf16.msra.mxu0 %v3406_v19  ;;  %v3418_v49 = vpack.c.bf16 %v1222_v47, %v1221_v46  ;;  %v1223_v52 = vld [vmem:[#allocation5 + $0x1f0] sm:$0xff]  ;;  %v1224_v53 = vld [vmem:[#allocation5 + $0x1f8] sm:$0xff]  ;;  %v3475_v55 = vpack.c.bf16 %v1256_v51, %v1255_v50  ;;  %v4122_v56 = vld [vmem:[%s4082_s9 + $0x20] sm:$0xff]  ;;  %5894 = vst [vmem:[#allocation14_spill] sm:$0xff] %v5893_v12  ;;  %v415_v45 = vadd.s32 88, %v4095_v24  ;;  %v5902_v47 = vmov 0  ;;  %p3819_p0 = por %p3818_p13, %p3817_p12 }
  0x6a   : > { %3408 = vmatprep.subr.bf16.mxu0 %v5713_v0  ;;  %v3421_v57 = vpack.c.bf16 %v1224_v53, %v1223_v52  ;;  %v4125_v58 = vld [vmem:[%s4082_s9 + $0x28] sm:$0xff]  ;;  %v1225_v59 = vld [vmem:[#allocation5 + $0x200] sm:$0xff]  ;;  %v336_v62 = vrot.slane %v4122_v56, 1  ;;  %v4132_v4 = vld [vmem:[%s4082_s9 + $0x30] sm:$0xff]  ;;  %5899 = vst [vmem:[#allocation17_spill] sm:$0xff] %v5898_v29  ;;  %v5963_v12 = vmov 0 }
  0x6b   : > { %3458 = vmatpush3.bf16.msra.mxu1 %v3455_v18  ;;  %v1226_v60 = vld [vmem:[#allocation5 + $0x208] sm:$0xff]  ;;  %v1160_v1 = vld [vmem:[#allocation5] sm:$0xff]  ;;  %v337_v3 = vrot.slane %v4125_v58, 1  ;;  %v4135_v6 = vld [vmem:[%s4082_s9 + $0x38] sm:$0xff]  ;;  %v338_v14 = vrot.slane %v4132_v4, 1  ;;  %v521_v61 = vand.u32 15, %v415_v45  ;;  %p3820_p5 = pnand %p3819_p0, %p3813_p8 }
  0x6c   : > { %3460 = vmatprep.subr.bf16.mxu1 %v3459_v25  ;;  %v1161_v2 = vld [vmem:[#allocation5 + $0x8] sm:$0xff]  ;;  %v3424_v5 = vpack.c.bf16 %v1226_v60, %v1225_v59  ;;  %v1227_v7 = vld [vmem:[#allocation5 + $0x210] sm:$0xff]  ;;  %v1228_v8 = vld [vmem:[#allocation5 + $0x218] sm:$0xff]  ;;  %v4143_v11 = vsel %vm5779_vm0, %v335_v34, %v336_v62  ;;  %v339_v18 = vrot.slane %v4135_v6, 1  ;;  %v435_v36 = vadd.s32 248, %v4095_v24 }
  0x6d   : > { %3410 = vmatpush1.bf16.msra.mxu0 %v3409_v27  ;;  %5891 = vst [vmem:[#allocation13_spill] sm:$0xff] %v4143_v11  ;;  %v3480_v13 = vpack.c.bf16 %v1161_v2, %v1160_v1  ;;  %v4153_v15 = vsel %vm5779_vm0, %v336_v62, %v337_v3  ;;  %v1162_v16 = vld [vmem:[#allocation5 + $0x10] sm:$0xff]  ;;  %v1163_v17 = vld [vmem:[#allocation5 + $0x18] sm:$0xff]  ;;  %v4157_v19 = vld [vmem:[%s4082_s9 + $0x40] sm:$0xff]  ;;  %v3427_v20 = vpack.c.bf16 %v1228_v8, %v1227_v7  ;;  %v413_v27 = vadd.s32 72, %v4095_v24 }
  0x6e   : > { %3411 = vmatprep.subr.bf16.mxu0 %v5713_v0  ;;  %5895 = vst [vmem:[#allocation15_spill] sm:$0xff] %v4153_v15  ;;  %v4160_v21 = vld [vmem:[%s4082_s9 + $0x48] sm:$0xff]  ;;  %v1229_v22 = vld [vmem:[#allocation5 + $0x220] sm:$0xff]  ;;  %v4170_v28 = vsel %vm5779_vm0, %v337_v3, %v338_v14  ;;  %v3483_v32 = vpack.c.bf16 %v1163_v17, %v1162_v16  ;;  %v340_v33 = vrot.slane %v4157_v19, 1  ;;  %v4180_v34 = vsel %vm5779_vm0, %v338_v14, %v339_v18  ;;  %v4184_v39 = vld [vmem:[%s4082_s9 + $0x50] sm:$0xff] }
  0x6f   : > { %3462 = vmatpush3.bf16.msra.mxu1 %v3459_v25  ;;  %v1230_v23 = vld [vmem:[#allocation5 + $0x228] sm:$0xff]  ;;  %v493_v25 = vand.u32 15, %v411_v10  ;;  %5896 = vst [vmem:[#allocation16_spill] sm:$0xff] %v4170_v28  ;;  %5900 = vst [vmem:[#allocation18_spill] sm:$0xff] %v4180_v34  ;;  %v341_v38 = vrot.slane %v4160_v21, 1  ;;  %v4187_v41 = vld [vmem:[%s4082_s9 + $0x58] sm:$0xff] }
  0x70   : > { %3464 = vmatprep.subr.bf16.mxu1 %v3463_v35  ;;  %v3430_v40 = vpack.c.bf16 %v1230_v23, %v1229_v22  ;;  %v507_v44 = vand.u32 15, %v413_v27  ;;  %v4197_v46 = vsel %vm5779_vm0, %v339_v18, %v340_v33  ;;  %v1166_v51 = vld [vmem:[#allocation5 + $0x30] sm:$0xff]  ;;  %v1167_v52 = vld [vmem:[#allocation5 + $0x38] sm:$0xff]  ;;  %v343_v53 = vrot.slane %v4187_v41, 1  ;;  %v4211_v54 = vld [vmem:[%s4082_s9 + $0x60] sm:$0xff] }
  0x71   : > { %3413 = vmatpush1.bf16.msra.mxu0 %v3412_v37  ;;  %v1165_v37 = vld [vmem:[#allocation5 + $0x28] sm:$0xff]  ;;  %5901 = vst [vmem:[#allocation19_spill] sm:$0xff] %v4197_v46  ;;  %vm4199_vm3 = vcmp.ne.s32.totalorder %v493_v25, 15  ;;  %v4207_v50 = vsel %vm5779_vm0, %v340_v33, %v341_v38  ;;  %v1233_v59 = vld [vmem:[#allocation5 + $0x240] sm:$0xff]  ;;  %v417_v62 = vadd.s32 104, %v4095_v24  ;;  %v5907_v1 = vmov 0 }
  0x72   : > { %3414 = vmatprep.subr.bf16.mxu0 %v5713_v0  ;;  %v5903_v47 = vsel %vm4199_vm3, 4294967295, %v5902_v47  ;;  %5905 = vst [vmem:[#allocation21_spill] sm:$0xff] %v4207_v50  ;;  %v1234_v60 = vld [vmem:[#allocation5 + $0x248] sm:$0xff]  ;;  %vm4226_vm4 = vcmp.ne.s32.totalorder %v507_v44, 15  ;;  %v3489_v2 = vpack.c.bf16 %v1167_v52, %v1166_v51  ;;  %v344_v3 = vrot.slane %v4211_v54, 1  ;;  %v1168_v7 = vld [vmem:[#allocation5 + $0x40] sm:$0xff] }
  0x73   : > { %3466 = vmatpush3.bf16.msra.mxu1 %v3463_v35  ;;  %v1164_v35 = vld [vmem:[#allocation5 + $0x20] sm:$0xff]  ;;  %5904 = vst [vmem:[#allocation20_spill] sm:$0xff] %v5903_v47  ;;  %v5908_v1 = vsel %vm4226_vm4, 4294967295, %v5907_v1  ;;  %v1169_v8 = vld [vmem:[#allocation5 + $0x48] sm:$0xff]  ;;  %v4238_v10 = vld [vmem:[%s4082_s9 + $0x70] sm:$0xff]  ;;  %v535_v18 = vand.u32 15, %v417_v62 }
  0x74   : > { %3468 = vmatprep.subr.bf16.mxu1 %v3467_v42  ;;  %5909 = vst [vmem:[#allocation23_spill] sm:$0xff] %v5908_v1  ;;  %v4241_v14 = vld [vmem:[%s4082_s9 + $0x78] sm:$0xff]  ;;  %v1235_v16 = vld [vmem:[#allocation5 + $0x250] sm:$0xff]  ;;  %v4251_v22 = vsel %vm5779_vm0, %v343_v53, %v344_v3  ;;  %vm4253_vm5 = vcmp.ne.s32.totalorder %v521_v61, 15  ;;  %v5912_v23 = vmov 0  ;;  %v3492_v25 = vpack.c.bf16 %v1169_v8, %v1168_v7  ;;  %v1238_v44 = vld [vmem:[#allocation5 + $0x268] sm:$0xff] }
  0x75   : > { %3416 = vmatpush1.bf16.msra.mxu0 %v3415_v43  ;;  %v1232_v43 = vld [vmem:[#allocation5 + $0x238] sm:$0xff]  ;;  %5911 = vst [vmem:[#allocation25_spill] sm:$0xff] %v4251_v22  ;;  %v5913_v23 = vsel %vm4253_vm5, 4294967295, %v5912_v23  ;;  %v346_v27 = vrot.slane %v4238_v10, 1  ;;  %v1170_v33 = vld [vmem:[#allocation5 + $0x50] sm:$0xff]  ;;  %vm4280_vm6 = vcmp.ne.s32.totalorder %v535_v18, 15 }
  0x76   : > { %3417 = vmatprep.subr.bf16.mxu0 %v5713_v0  ;;  %v1236_v17 = vld [vmem:[#allocation5 + $0x258] sm:$0xff]  ;;  %5914 = vst [vmem:[#allocation26_spill] sm:$0xff] %v5913_v23  ;;  %v5917_v51 = vmov 0  ;;  %v4292_v62 = vld [vmem:[%s4082_s9 + $0x90] sm:$0xff]  ;;  %v5921_v8 = vmov 0  ;;  %v4328_v31 = vld [vmem:[%s4082_s9 + $0xa8] sm:$0xff] }
  0x77   : > { %3470 = vmatpush3.bf16.msra.mxu1 %v3467_v42  ;;  %v1231_v42 = vld [vmem:[#allocation5 + $0x230] sm:$0xff]  ;;  %v5918_v51 = vsel %vm4280_vm6, 4294967295, %v5917_v51  ;;  %v4296_v7 = vld [vmem:[%s4082_s9 + $0x98] sm:$0xff]  ;;  %v1197_v23 = vld [vmem:[#allocation5 + $0x128] sm:$0xff]  ;;  %v431_v47 = vadd.s32 216, %v4095_v24 }
  0x78   : > { %3472 = vmatprep.subr.bf16.mxu1 %v3471_v48  ;;  %5919 = vst [vmem:[#allocation29_spill] sm:$0xff] %v5918_v51  ;;  %v4368_v51 = vld [vmem:[%s4082_s9 + $0xb8] sm:$0xff] }
  0x79   : > { %3419 = vmatpush1.bf16.msra.mxu0 %v3418_v49  ;;  %v342_v49 = vrot.slane %v4184_v39, 1  ;;  %v633_v29 = vand.u32 15, %v431_v47 }
  0x7a   : > { %3420 = vmatprep.subr.bf16.mxu0 %v5713_v0 }
  0x7b   : > { %3474 = vmatpush3.bf16.msra.mxu1 %v3471_v48  ;;  %v3486_v48 = vpack.c.bf16 %v1165_v37, %v1164_v35  ;;  %v4224_v63 = vsel %vm5779_vm0, %v341_v38, %v342_v49  ;;  %v1171_v35 = vld [vmem:[#allocation5 + $0x58] sm:$0xff]  ;;  %v347_v37 = vrot.slane %v4241_v14, 1  ;;  %v4265_v38 = vld [vmem:[%s4082_s9 + $0x80] sm:$0xff] }
  0x7c   : > { %3476 = vmatprep.subr.bf16.mxu1 %v3475_v55  ;;  %5906 = vst [vmem:[#allocation22_spill] sm:$0xff] %v4224_v63  ;;  %v3495_v52 = vpack.c.bf16 %v1171_v35, %v1170_v33  ;;  %v1192_v33 = vld [vmem:[#allocation5 + $0x100] sm:$0xff]  ;;  %v1193_v35 = vld [vmem:[#allocation5 + $0x108] sm:$0xff] }
  0x7d   : > { %3422 = vmatpush1.bf16.msra.mxu0 %v3421_v57  ;;  %v4214_v57 = vld [vmem:[%s4082_s9 + $0x68] sm:$0xff] }
  0x7e   : > { %3423 = vmatprep.subr.bf16.mxu0 %v5713_v0  ;;  %v345_v9 = vrot.slane %v4214_v57, 1 }
  0x7f   : > { %3478 = vmatpush3.bf16.msra.mxu1 %v3475_v55  ;;  %v3433_v55 = vpack.c.bf16 %v1232_v43, %v1231_v42  ;;  %v4268_v42 = vld [vmem:[%s4082_s9 + $0x88] sm:$0xff]  ;;  %v1237_v43 = vld [vmem:[#allocation5 + $0x260] sm:$0xff] }
  0x80   : > { %3479 = vmatprep.subr.bf16.mxu1 %v5713_v0  ;;  %v349_v61 = vrot.slane %v4268_v42, 1 }
  0x81   : > { %3425 = vmatpush1.bf16.msra.mxu0 %v3424_v5  ;;  %v4234_v5 = vsel %vm5779_vm0, %v342_v49, %v343_v53  ;;  %v4278_v49 = vsel %vm5779_vm0, %v345_v9, %v346_v27  ;;  %v348_v53 = vrot.slane %v4265_v38, 1 }
  0x82   : > { %3192 = vmatmul.mubr.msk.f32.vlgmr.msra.gmra.mrb[0].mxu1 %vm4145_vm1, %v4143_v11  ;;  %3426 = vmatprep.subr.bf16.mxu0 %v5713_v0  ;;  %5910 = vst [vmem:[#allocation24_spill] sm:$0xff] %v4234_v5  ;;  %5916 = vst [vmem:[#allocation28_spill] sm:$0xff] %v4278_v49 }
  0x83   : > { %3481 = vmatpush1.bf16.msra.mxu1 %v3480_v13  ;;  %3194 = vmatprep.mubr.f32.mxu1 %v4153_v15  ;;  %v3436_v13 = vpack.c.bf16 %v1234_v60, %v1233_v59  ;;  %v1172_v59 = vld [vmem:[#allocation5 + $0x60] sm:$0xff]  ;;  %v1173_v60 = vld [vmem:[#allocation5 + $0x68] sm:$0xff]  ;;  %v4312_v18 = vsel %vm5779_vm0, %v347_v37, %v348_v53  ;;  %v1203_v15 = vld [vmem:[#allocation5 + $0x158] sm:$0xff] }
  0x84   : > { %3482 = vmatprep.subr.bf16.mxu1 %v5713_v0  ;;  %5924 = vst [vmem:[#allocation32_spill] sm:$0xff] %v4312_v18 }
  0x85   : > { %3428 = vmatpush1.bf16.msra.mxu0 %v3427_v20  ;;  %v419_v20 = vadd.s32 120, %v4095_v24 }
  0x86   : > { %3195 = vmatmul.mubr.msk.f32.gmra.mrb[2].mxu1 %vm4172_vm2, %v4170_v28  ;;  %3429 = vmatprep.subr.bf16.mxu0 %v5713_v0 }
  0x87   : > { %3484 = vmatpush1.bf16.msra.mxu1 %v3483_v32  ;;  %3197 = vmatprep.mubr.f32.mxu1 %v4180_v34  ;;  %v4261_v32 = vsel %vm5779_vm0, %v344_v3, %v345_v9  ;;  %v549_v45 = vand.u32 15, %v419_v20  ;;  %v406_v3 = vadd.s32 16, %v4095_v24  ;;  %v1239_v9 = vld [vmem:[#allocation5 + $0x270] sm:$0xff]  ;;  %v3498_v20 = vpack.c.bf16 %v1173_v60, %v1172_v59  ;;  %v4476_v34 = vld [vmem:[%s4082_s9 + $0xe8] sm:$0xff] }
  0x88   : > { %3485 = vmatprep.subr.bf16.mxu1 %v5713_v0  ;;  %5915 = vst [vmem:[#allocation27_spill] sm:$0xff] %v4261_v32  ;;  %v259_v59 = vrot.slane %v4098_v26, 7  ;;  %5953 = vst [vmem:[#allocation47_spill] sm:$0xff] %v4476_v34 }
  0x89   : > { %3431 = vmatpush1.bf16.msra.mxu0 %v3430_v40  ;;  %v3439_v40 = vpack.c.bf16 %v1236_v17, %v1235_v16  ;;  %vm4302_vm7 = vcmp.ne.s32.totalorder %v549_v45, 15  ;;  %v4307_v17 = vld [vmem:[%s4082_s9 + $0x8] sm:$0xff]  ;;  %v351_v45 = vrot.slane %v4296_v7, 1  ;;  %v458_v60 = vand.u32 15, %v406_v3 }
  0x8a   : > { %3198 = vmatmul.mubr.msk.f32.gmra.mrb[4].mxu1 %vm4199_vm3, %v4197_v46  ;;  %3432 = vmatprep.subr.bf16.mxu0 %v5713_v0  ;;  %v5922_v8 = vsel %vm4302_vm7, 4294967295, %v5921_v8  ;;  %v5948_v46 = vmov 0 }
  0x8b   : > { %3487 = vmatpush1.bf16.msra.mxu1 %v3486_v48  ;;  %3200 = vmatprep.mubr.f32.mxu1 %v4207_v50  ;;  %v421_v48 = vadd.s32 136, %v4095_v24  ;;  %5923 = vst [vmem:[#allocation31_spill] sm:$0xff] %v5922_v8  ;;  %v1195_v8 = vld [vmem:[#allocation5 + $0x118] sm:$0xff]  ;;  %vm4361_vm10 = vcmp.ne.s32.totalorder %v458_v60, 0 }
  0x8c   : > { %3488 = vmatprep.subr.bf16.mxu1 %v5713_v0 }
  0x8d   : > { %3434 = vmatpush1.bf16.msra.mxu0 %v3433_v55  ;;  %v4288_v55 = vsel %vm5779_vm0, %v346_v27, %v347_v37  ;;  %v563_v16 = vand.u32 15, %v421_v48  ;;  %v423_v27 = vadd.s32 152, %v4095_v24  ;;  %v4323_v37 = vld [vmem:[%s4082_s9 + $0xa0] sm:$0xff] }
  0x8e   : > { %3201 = vmatmul.mubr.msk.f32.gmra.mrb[6].mxu1 %vm4226_vm4, %v4224_v63  ;;  %3435 = vmatprep.subr.bf16.mxu0 %v5713_v0  ;;  %5920 = vst [vmem:[#allocation30_spill] sm:$0xff] %v4288_v55  ;;  %v4441_v63 = vld [vmem:[%s4082_s9 + $0xd8] sm:$0xff] }
  0x8f   : > { %3490 = vmatpush1.bf16.msra.mxu1 %v3489_v2  ;;  %3203 = vmatprep.mubr.f32.mxu1 %v4234_v5  ;;  %v3442_v2 = vpack.c.bf16 %v1238_v44, %v1237_v43  ;;  %v1174_v43 = vld [vmem:[#allocation5 + $0x70] sm:$0xff]  ;;  %v1175_v44 = vld [vmem:[#allocation5 + $0x78] sm:$0xff]  ;;  %vm4334_vm8 = vcmp.ne.s32.totalorder %v563_v16, 15  ;;  %v352_v16 = vrot.slane %v4323_v37, 1  ;;  %v429_v5 = vadd.s32 200, %v4095_v24 }
  0x90   : > { %3491 = vmatprep.subr.bf16.mxu1 %v5713_v0 }
  0x91   : > { %3437 = vmatpush1.bf16.msra.mxu0 %v3436_v13  ;;  %v1240_v13 = vld [vmem:[#allocation5 + $0x278] sm:$0xff]  ;;  %v4377_v60 = vsel %vm5779_vm0, %v351_v45, %v352_v16  ;;  %v619_v50 = vand.u32 15, %v429_v5 }
  0x92   : > { %3204 = vmatmul.mubr.msk.f32.gmra.mrb[8].mxu1 %vm4253_vm5, %v4251_v22  ;;  %3438 = vmatprep.subr.bf16.mxu0 %v5713_v0  ;;  %v3445_v48 = vpack.c.bf16 %v1240_v13, %v1239_v9  ;;  %v3527_v9 = vpack.c.bf16 %v1193_v35, %v1192_v33  ;;  %v3501_v13 = vpack.c.bf16 %v1175_v44, %v1174_v43  ;;  %v1177_v33 = vld [vmem:[#allocation5 + $0x88] sm:$0xff]  ;;  %v353_v35 = vrot.slane %v4328_v31, 1 }
  0x93   : > { %3493 = vmatpush1.bf16.msra.mxu1 %v3492_v25  ;;  %3206 = vmatprep.mubr.f32.mxu1 %v4261_v32  ;;  %v350_v25 = vrot.slane %v4292_v62, 1  ;;  %v408_v44 = vadd.s32 32, %v4095_v24  ;;  %5935 = vst [vmem:[#allocation37_spill] sm:$0xff] %v4377_v60  ;;  %v5936_v32 = vmov 0  ;;  %v4403_v22 = vld [vmem:[%s4082_s9 + $0xc8] sm:$0xff]  ;;  %vm4481_vm15 = vcmp.ne.s32.totalorder %v619_v50, 15 }
  0x94   : > { %3494 = vmatprep.subr.bf16.mxu1 %v5713_v0  ;;  %v433_v50 = vadd.s32 232, %v4095_v24 }
  0x95   : > { %3440 = vmatpush1.bf16.msra.mxu0 %v3439_v40  ;;  %v4319_v40 = vsel %vm5779_vm0, %v348_v53, %v349_v61  ;;  %v5926_v53 = vmov 0  ;;  %v4343_v3 = vsel %vm5779_vm0, %v349_v61, %v350_v25  ;;  %v5932_v61 = vrot.slane %v4307_v17, 7 }
  0x96   : > { %3207 = vmatmul.mubr.msk.f32.gmra.mrb[10].mxu1 %vm4280_vm6, %v4278_v49  ;;  %3441 = vmatprep.subr.bf16.mxu0 %v5713_v0  ;;  %5925 = vst [vmem:[#allocation33_spill] sm:$0xff] %v4319_v40  ;;  %v5927_v53 = vsel %vm4334_vm8, 4294967295, %v5926_v53  ;;  %5929 = vst [vmem:[#allocation35_spill] sm:$0xff] %v4343_v3  ;;  %v427_v49 = vadd.s32 184, %v4095_v24 }
  0x97   : > { %3496 = vmatpush1.bf16.msra.mxu1 %v3495_v52  ;;  %3209 = vmatprep.mubr.f32.mxu1 %v4288_v55  ;;  %5928 = vst [vmem:[#allocation34_spill] sm:$0xff] %v5927_v53  ;;  %v577_v52 = vand.u32 15, %v423_v27  ;;  %v4349_v55 = vsel %vm5779_vm0, %v350_v25, %v351_v45  ;;  %v4359_v27 = vsel %vm5782_vm9, %v5932_v61, %v259_v59  ;;  %v260_v25 = vrot.slane %v4101_v30, 7  ;;  %v1179_v45 = vld [vmem:[#allocation5 + $0x98] sm:$0xff] }
  0x98   : > { %3497 = vmatprep.subr.bf16.mxu1 %v5713_v0  ;;  %5931 = vst [vmem:[#allocation36_spill] sm:$0xff] %v4349_v55 }
  0x99   : > { %3443 = vmatpush1.bf16.msra.mxu0 %v3442_v2  ;;  %v425_v2 = vadd.s32 168, %v4095_v24  ;;  %vm4379_vm11 = vcmp.ne.s32.totalorder %v577_v52, 15  ;;  %v355_v52 = vrot.slane %v4368_v51, 1 }
  0x9a   : > { %3210 = vmatmul.mubr.msk.f32.gmra.mrb[12].mxu1 %vm4302_vm7, %v4312_v18  ;;  %3444 = vmatprep.subr.bf16.mxu0 %v5713_v0  ;;  %v1194_v0 = vld [vmem:[#allocation5 + $0x110] sm:$0xff]  ;;  %v5930_v18 = vmov 0.0|0.0   ;;  %v5937_v32 = vsel %vm4379_vm11, 4294967295, %v5936_v32 }
  0x9b   : > { %3499 = vmatpush1.bf16.msra.mxu1 %v3498_v20  ;;  %3212 = vmatprep.mubr.f32.mxu1 %v4319_v40  ;;  %v1176_v20 = vld [vmem:[#allocation5 + $0x80] sm:$0xff]  ;;  %v4353_v40 = vld [vmem:[%s4082_s9 + $0xb0] sm:$0xff]  ;;  %v3531_v61 = vpack.c.bf16 %v1195_v8, %v1194_v0  ;;  %5938 = vst [vmem:[#allocation38_spill] sm:$0xff] %v5937_v32  ;;  %v4390_v0 = vsel %vm5779_vm0, %v352_v16, %v353_v35  ;;  %v605_v16 = vand.u32 15, %v427_v49 }
  0x9c   : > { %3500 = vmatprep.subr.bf16.mxu1 %v5930_v18  ;;  %v3504_v53 = vpack.c.bf16 %v1177_v33, %v1176_v20  ;;  %5939 = vst [vmem:[#allocation39_spill] sm:$0xff] %v4390_v0  ;;  %v1178_v8 = vld [vmem:[#allocation5 + $0x90] sm:$0xff]  ;;  %v4399_v20 = vsel %vm5782_vm9, %v259_v59, %v260_v25  ;;  %v261_v33 = vrot.slane %v4122_v56, 7 }
  0x9d   : > { %3446 = vmatpush1.bf16.msra.mxu0 %v3445_v48  ;;  %v591_v48 = vand.u32 15, %v425_v2  ;;  %v354_v2 = vrot.slane %v4353_v40, 1  ;;  %v1198_v32 = vld [vmem:[#allocation5 + $0x130] sm:$0xff]  ;;  %vm4452_vm14 = vcmp.ne.s32.totalorder %v605_v16, 15  ;;  %v359_v16 = vrot.slane %v4441_v63, 1 }
  0x9e   : > { %3213 = vmatmul.mubr.msk.f32.gmra.mrb[14].mxu1 %vm4334_vm8, %v4343_v3  ;;  %3528 = vmatprep.subr.bf16.mxu0 %v3527_v9  ;;  %v1196_v3 = vld [vmem:[#allocation5 + $0x120] sm:$0xff]  ;;  %v5949_v46 = vsel %vm4452_vm14, 4294967295, %v5948_v46 }
  0x9f   : > { %3502 = vmatpush1.bf16.msra.mxu1 %v3501_v13  ;;  %3215 = vmatprep.mubr.f32.mxu1 %v4349_v55  ;;  %v4394_v13 = vld [vmem:[%s4082_s9 + $0xc0] sm:$0xff]  ;;  %v472_v55 = vand.u32 15, %v408_v44  ;;  %v3535_v1 = vpack.c.bf16 %v1197_v23, %v1196_v3  ;;  %v4412_v59 = vsel %vm5779_vm0, %v353_v35, %v354_v2  ;;  %vm4414_vm12 = vcmp.ne.s32.totalorder %v591_v48, 15  ;;  %v1181_v3 = vld [vmem:[#allocation5 + $0xa8] sm:$0xff]  ;;  %v4427_v48 = vld [vmem:[%s4082_s9 + $0xd0] sm:$0xff]  ;;  %5950 = vst [vmem:[#allocation44_spill] sm:$0xff] %v5949_v46 }
  0xa0   : > { %2912 = vmatmul.mubr.msk.f32.vlgmr.msra.gmra.mrb[0].mxu0 %vm4361_vm10, %v4359_v27  ;;  %3503 = vmatprep.subr.bf16.mxu1 %v5930_v18  ;;  %5940 = vst [vmem:[#allocation40_spill] sm:$0xff] %v4412_v59  ;;  %v5941_v44 = vmov 0  ;;  %v356_v49 = vrot.slane %v4394_v13, 1  ;;  %v4423_v23 = vsel %vm5779_vm0, %v354_v2, %v355_v52  ;;  %v357_v35 = vrot.slane %v4403_v22, 1  ;;  %v4492_v46 = vld [vmem:[%s4082_s9 + $0xf0] sm:$0xff] }
  0xa1   : > { %1326 = vmatprep.mubr.f32.mxu0 %v4101_v30  ;;  %3530 = vmatpush3.bf16.msra.mxu0 %v3527_v9  ;;  %v5942_v44 = vsel %vm4414_vm12, 4294967295, %v5941_v44  ;;  %v3507_v9 = vpack.c.bf16 %v1179_v45, %v1178_v8  ;;  %5944 = vst [vmem:[#allocation42_spill] sm:$0xff] %v4423_v23  ;;  %v4432_v8 = vsel %vm5782_vm9, %v260_v25, %v261_v33  ;;  %vm4434_vm13 = vcmp.ne.s32.totalorder %v472_v55, 0 }
  0xa2   : > { %3216 = vmatmul.mubr.msk.f32.gmra.mrb[16].mxu1 %vm4379_vm11, %v4377_v60  ;;  %3532 = vmatprep.subr.bf16.mxu0 %v3531_v61  ;;  %5943 = vst [vmem:[#allocation41_spill] sm:$0xff] %v5942_v44  ;;  %v1199_v60 = vld [vmem:[#allocation5 + $0x138] sm:$0xff]  ;;  %v5945_v45 = vmov 0  ;;  %v410_v2 = vadd.s32 48, %v4095_v24  ;;  %v4450_v25 = vsel %vm5779_vm0, %v355_v52, %v356_v49  ;;  %v358_v5 = vrot.slane %v4427_v48, 1  ;;  %v1200_v44 = vld [vmem:[#allocation5 + $0x140] sm:$0xff] }
  0xa3   : > { %3505 = vmatpush1.bf16.msra.mxu1 %v3504_v53  ;;  %3218 = vmatprep.mubr.f32.mxu1 %v4390_v0  ;;  %v1180_v53 = vld [vmem:[#allocation5 + $0xa0] sm:$0xff]  ;;  %v5946_v45 = vsel %vm4434_vm13, 4294967295, %v5945_v45  ;;  %v262_v0 = vrot.slane %v4125_v58, 7  ;;  %v3539_v55 = vpack.c.bf16 %v1199_v60, %v1198_v32  ;;  %5947 = vst [vmem:[#allocation43_spill] sm:$0xff] %v4450_v25  ;;  %v4463_v32 = vsel %vm5779_vm0, %v356_v49, %v357_v35  ;;  %v1182_v60 = vld [vmem:[#allocation5 + $0xb0] sm:$0xff]  ;;  %v1183_v52 = vld [vmem:[#allocation5 + $0xb8] sm:$0xff] }
  0xa4   : > { %1327 = vmatmul.mubr.f32.gmra.mrb[2].mxu0 %v4399_v20  ;;  %3506 = vmatprep.subr.bf16.mxu1 %v5930_v18  ;;  %5951 = vst [vmem:[#allocation45_spill] sm:$0xff] %v4463_v32  ;;  %v5954_v49 = vmov 0  ;;  %5958 = vst [vmem:[#allocation50_spill] sm:$0xff] %v4492_v46  ;;  %v4499_v47 = vsel %vm5779_vm0, %v358_v5, %v359_v16 }
  0xa5   : > { %1331 = vmatprep.mubr.f32.mxu0 %v4122_v56  ;;  %3534 = vmatpush3.bf16.msra.mxu0 %v3531_v61  ;;  %v3510_v61 = vpack.c.bf16 %v1181_v3, %v1180_v53  ;;  %v4472_v53 = vsel %vm5782_vm9, %v261_v33, %v262_v0  ;;  %v263_v3 = vrot.slane %v4132_v4, 7  ;;  %v5955_v49 = vsel %vm4481_vm15, 4294967295, %v5954_v49  ;;  %5959 = vst [vmem:[#allocation51_spill] sm:$0xff] %v4499_v47 }
  0xa6   : > { %3219 = vmatmul.mubr.msk.f32.gmra.mrb[18].mxu1 %vm4414_vm12, %v4412_v59  ;;  %3536 = vmatprep.subr.bf16.mxu0 %v3535_v1  ;;  %v1201_v59 = vld [vmem:[#allocation5 + $0x148] sm:$0xff]  ;;  %5956 = vst [vmem:[#allocation48_spill] sm:$0xff] %v5955_v49  ;;  %v4488_v33 = vsel %vm5779_vm0, %v357_v35, %v358_v5  ;;  %v361_v35 = vrot.slane %v4476_v34, 1  ;;  %v4514_v5 = vld [vmem:[%s4082_s9 + $0xf8] sm:$0xff]  ;;  %vm4519_vm0 = vcmp.ne.s32.totalorder %v633_v29, 15  ;;  %v1204_v34 = vld [vmem:[#allocation5 + $0x160] sm:$0xff] }
  0xa7   : > { %3508 = vmatpush1.bf16.msra.mxu1 %v3507_v9  ;;  %3221 = vmatprep.mubr.f32.mxu1 %v4423_v23  ;;  %v4467_v9 = vld [vmem:[%s4082_s9 + $0xe0] sm:$0xff]  ;;  %v486_v23 = vand.u32 15, %v410_v2  ;;  %v3543_v28 = vpack.c.bf16 %v1201_v59, %v1200_v44  ;;  %5957 = vst [vmem:[#allocation49_spill] sm:$0xff] %v4488_v33  ;;  %v3513_v2 = vpack.c.bf16 %v1183_v52, %v1182_v60  ;;  %v1185_v44 = vld [vmem:[#allocation5 + $0xc8] sm:$0xff]  ;;  %v5960_v60 = vmov 0  ;;  %5962 = vst [vmem:[#allocation52_spill] sm:$0xff] %v4514_v5 }
  0xa8   : > { %2913 = vmatmul.mubr.msk.f32.gmra.mrb[4].mxu0 %vm4434_vm13, %v4432_v8  ;;  %3509 = vmatprep.subr.bf16.mxu1 %v5930_v18  ;;  %5952 = vst [vmem:[#allocation46_spill] sm:$0xff] %v4467_v9  ;;  %v1184_v59 = vld [vmem:[#allocation5 + $0xc0] sm:$0xff]  ;;  %v264_v52 = vrot.slane %v4135_v6, 7  ;;  %v5964_v12 = vsel %vm4519_vm0, 4294967295, %v5963_v12  ;;  %v1187_v29 = vld [vmem:[#allocation5 + $0xd8] sm:$0xff] }
  0xa9   : > { %1336 = vmatprep.mubr.f32.mxu0 %v4125_v58  ;;  %3538 = vmatpush3.bf16.msra.mxu0 %v3535_v1  ;;  %v360_v1 = vrot.slane %v4467_v9, 1  ;;  %5965 = vst [vmem:[#allocation53_spill] sm:$0xff] %v5964_v12  ;;  %v3516_v49 = vpack.c.bf16 %v1185_v44, %v1184_v59  ;;  %v4549_v44 = vld [vmem:[%s4082_s9 + $0x108] sm:$0xff]  ;;  %v661_v12 = vand.u32 15, %v435_v36  ;;  %v1206_v9 = vld [vmem:[#allocation5 + $0x170] sm:$0xff] }
  0xaa   : > { %3222 = vmatmul.mubr.msk.f32.gmra.mrb[20].mxu1 %vm4452_vm14, %v4450_v25  ;;  %3540 = vmatprep.subr.bf16.mxu0 %v3539_v55  ;;  %v1202_v25 = vld [vmem:[#allocation5 + $0x150] sm:$0xff]  ;;  %vm4507_vm14 = vcmp.ne.s32.totalorder %v486_v23, 0  ;;  %5972 = vst [vmem:[#allocation57_spill] sm:$0xff] %v4549_v44 }
  0xab   : > { %3511 = vmatpush1.bf16.msra.mxu1 %v3510_v61  ;;  %3224 = vmatprep.mubr.f32.mxu1 %v4463_v32  ;;  %v4505_v61 = vsel %vm5782_vm9, %v262_v0, %v263_v3  ;;  %v5961_v60 = vsel %vm4507_vm14, 4294967295, %v5960_v60  ;;  %v412_v32 = vadd.s32 64, %v4095_v24  ;;  %v362_v0 = vrot.slane %v4492_v46, 1  ;;  %v1186_v23 = vld [vmem:[#allocation5 + $0xd0] sm:$0xff]  ;;  %v1205_v46 = vld [vmem:[#allocation5 + $0x168] sm:$0xff] }
  0xac   : > { %1337 = vmatmul.mubr.f32.gmra.mrb[6].mxu0 %v4472_v53  ;;  %3512 = vmatprep.subr.bf16.mxu1 %v5930_v18  ;;  %v3547_v11 = vpack.c.bf16 %v1203_v15, %v1202_v25  ;;  %vm5966_vm9 = vcmp.lt.s32.totalorder %v4095_v24, 7  ;;  %v363_v25 = vrot.slane %v4514_v5, 1  ;;  %v4559_v5 = vld [vmem:[%s4082_s9 + $0x110] sm:$0xff] }
  0xad   : > { %1341 = vmatprep.mubr.f32.mxu0 %v4132_v4  ;;  %3542 = vmatpush3.bf16.msra.mxu0 %v3539_v55  ;;  %v4527_v55 = vsel %vm5966_vm9, %v359_v16, %v360_v1  ;;  %v4540_v16 = vld [vmem:[%s4082_s9 + $0x100] sm:$0xff]  ;;  %v500_v59 = vand.u32 15, %v412_v32  ;;  %5974 = vst [vmem:[#allocation59_spill] sm:$0xff] %v4559_v5  ;;  %v5975_v32 = vmov 0 }
  0xae   : > { %3225 = vmatmul.mubr.msk.f32.gmra.mrb[22].mxu1 %vm4481_vm15, %v4488_v33  ;;  %3544 = vmatprep.subr.bf16.mxu0 %v3543_v28  ;;  %5967 = vst [vmem:[#allocation54_spill] sm:$0xff] %v4527_v55  ;;  %v647_v33 = vand.u32 15, %v433_v50  ;;  %vm5968_vm15 = vmmov %vm5966_vm9  ;;  %vm5971_vm9 = vcmp.lt.s32.totalorder %v4095_v24, 1  ;;  %v265_v50 = vrot.slane %v4157_v19, 7 }
  0xaf   : > { %3514 = vmatpush1.bf16.msra.mxu1 %v3513_v2  ;;  %3227 = vmatprep.mubr.f32.mxu1 %v4499_v47  ;;  %v4536_v15 = vsel %vm5968_vm15, %v360_v1, %v361_v35  ;;  %5970 = vst [vmem:[#allocation56_spill] sm:$0xff] %v4540_v16  ;;  %v4545_v2 = vsel %vm5971_vm9, %v263_v3, %v264_v52  ;;  %vm4580_vm12 = vcmp.ne.s32.totalorder %v500_v59, 0 }
  0xb0   : > { %2914 = vmatmul.mubr.msk.f32.gmra.mrb[8].mxu0 %vm4507_vm14, %v4505_v61  ;;  %3515 = vmatprep.subr.bf16.mxu1 %v5930_v18  ;;  %5969 = vst [vmem:[#allocation55_spill] sm:$0xff] %v4536_v15  ;;  %v4556_v1 = vsel %vm5968_vm15, %v361_v35, %v362_v0  ;;  %v3519_v47 = vpack.c.bf16 %v1187_v29, %v1186_v23  ;;  %vm4562_vm9 = vcmp.ne.s32.totalorder %v647_v33, 15  ;;  %v1207_v35 = vld [vmem:[#allocation5 + $0x178] sm:$0xff]  ;;  %v365_v33 = vrot.slane %v4549_v44, 1 }
  0xb1   : > { %1346 = vmatprep.mubr.f32.mxu0 %v4135_v6  ;;  %3546 = vmatpush3.bf16.msra.mxu0 %v3543_v28  ;;  %5973 = vst [vmem:[#allocation58_spill] sm:$0xff] %v4556_v1  ;;  %v3551_v3 = vpack.c.bf16 %v1205_v46, %v1204_v34  ;;  %v5976_v32 = vsel %vm4562_vm9, 4294967295, %v5975_v32  ;;  %v364_v28 = vrot.slane %v4540_v16, 1  ;;  %v4572_v34 = vsel %vm5968_vm15, %v362_v0, %v363_v25  ;;  %v1188_v46 = vld [vmem:[#allocation5 + $0xe0] sm:$0xff]  ;;  %v1190_v16 = vld [vmem:[#allocation5 + $0xf0] sm:$0xff] }
  0xb2   : > { %3228 = vmatmul.mubr.msk.f32.gmra.mrb[24].mxu1 %vm4519_vm0, %v4527_v55  ;;  %3548 = vmatprep.subr.bf16.mxu0 %v3547_v11  ;;  %5977 = vst [vmem:[#allocation60_spill] sm:$0xff] %v5976_v32  ;;  %v437_v55 = vadd.s32 264, %v4095_v24  ;;  %5978 = vst [vmem:[#allocation61_spill] sm:$0xff] %v4572_v34  ;;  %vm5979_vm0 = vcmp.lt.s32.totalorder %v4095_v24, 1  ;;  %v5980_v23 = vmov 0  ;;  %v266_v29 = vrot.slane %v4160_v21, 7 }
  0xb3   : > { %3517 = vmatpush1.bf16.msra.mxu1 %v3516_v49  ;;  %3230 = vmatprep.mubr.f32.mxu1 %v4536_v15  ;;  %v1189_v49 = vld [vmem:[#allocation5 + $0xe8] sm:$0xff]  ;;  %v4578_v36 = vsel %vm5979_vm0, %v264_v52, %v265_v50  ;;  %v5981_v23 = vsel %vm4580_vm12, 4294967295, %v5980_v23  ;;  %v414_v15 = vadd.s32 80, %v4095_v24  ;;  %v5822_v0 = vrot.slane %v4559_v5, 1  ;;  %vm5982_vm0 = vmmov %vm5968_vm15 }
  0xb4   : > { %1347 = vmatmul.mubr.f32.gmra.mrb[10].mxu0 %v4545_v2  ;;  %3518 = vmatprep.subr.bf16.mxu1 %v5930_v18  ;;  %v3555_v52 = vpack.c.bf16 %v1207_v35, %v1206_v9  ;;  %v4593_v59 = vsel %vm5982_vm0, %v363_v25, %v364_v28  ;;  %vm4595_vm15 = vcmp.ne.s32.totalorder %v661_v12, 15  ;;  %v5983_v44 = vmov 0  ;;  %v4611_v12 = vld [vmem:[%s4082_s9 + $0x118] sm:$0xff]  ;;  %v2191_v5 = vld [vmem:[#allocation5 + $0x408] sm:$0xff] }
  0xb5   : > { %1351 = vmatprep.mubr.f32.mxu0 %v4157_v19  ;;  %3550 = vmatpush3.bf16.msra.mxu0 %v3547_v11  ;;  %v5984_v44 = vsel %vm4595_vm15, 4294967295, %v5983_v44  ;;  %v3522_v11 = vpack.c.bf16 %v1189_v49, %v1188_v46  ;;  %v675_v32 = vand.u32 15, %v437_v55  ;;  %5989 = vst [vmem:[#allocation65_spill] sm:$0xff] %v4611_v12  ;;  %v267_v25 = vrot.slane %v4184_v39, 7 }
  0xb6   : > { %3231 = vmatmul.mubr.msk.f32.gmra.mrb[26].mxu1 %vm4562_vm9, %v4556_v1  ;;  %3552 = vmatprep.subr.bf16.mxu0 %v3551_v3  ;;  %5985 = vst [vmem:[#allocation62_spill] sm:$0xff] %v5984_v44  ;;  %v1191_v1 = vld [vmem:[#allocation5 + $0xf8] sm:$0xff]  ;;  %vm5986_vm9 = vmmov %vm5982_vm0  ;;  %vm5990_vm0 = vcmp.lt.s32.totalorder %v4095_v24, 1  ;;  %v514_v35 = vand.u32 15, %v414_v15  ;;  %v444_v49 = vand.u32 15, %v4095_v24 }
  0xb7   : > { %3520 = vmatpush1.bf16.msra.mxu1 %v3519_v47  ;;  %3233 = vmatprep.mubr.f32.mxu1 %v4572_v34  ;;  %v4605_v9 = vsel %vm5986_vm9, %v364_v28, %v365_v33  ;;  %v4608_v47 = vld [vmem:[%s4082_s9] sm:$0xff]  ;;  %v4616_v55 = vsel %vm5990_vm0, %v265_v50, %v266_v29  ;;  %v4626_v28 = vsel %vm5986_vm9, %v365_v33, %v5822_v0  ;;  %vm4629_vm0 = vcmp.ne.s32.totalorder %v675_v32, 15 }
  0xb8   : > { %2915 = vmatmul.mubr.msk.f32.gmra.mrb[12].mxu0 %vm4580_vm12, %v4578_v36  ;;  %3521 = vmatprep.subr.bf16.mxu1 %v5930_v18  ;;  %5987 = vst [vmem:[#allocation63_spill] sm:$0xff] %v4605_v9  ;;  %5988 = vst [vmem:[#allocation64_spill] sm:$0xff] %v4608_v47  ;;  %v3525_v46 = vpack.c.bf16 %v1191_v1, %v1190_v16  ;;  %v5992_v50 = vmov 0  ;;  %v257_v15 = vrot.slane %v4608_v47, 7  ;;  %v2158_v33 = vld [vmem:[#allocation5 + $0x300] sm:$0xff]  ;;  %v2159_v16 = vld [vmem:[#allocation5 + $0x308] sm:$0xff] }
  0xb9   : > { %1356 = vmatprep.mubr.f32.mxu0 %v4160_v21  ;;  %3554 = vmatpush3.bf16.msra.mxu0 %v3551_v3  ;;  %5991 = vst [vmem:[#allocation66_spill] sm:$0xff] %v4626_v28  ;;  %v5993_v50 = vsel %vm4629_vm0, 4294967295, %v5992_v50  ;;  %vm5995_vm9 = vcmp.lt.s32.totalorder %v4095_v24, 1  ;;  %v5996_v32 = vmov 0  ;;  %v416_v0 = vadd.s32 96, %v4095_v24  ;;  %v2190_v3 = vld [vmem:[#allocation5 + $0x400] sm:$0xff] }
  0xba   : > { %3234 = vmatmul.mubr.msk.f32.gmra.mrb[28].mxu1 %vm4595_vm15, %v4593_v59  ;;  %3556 = vmatprep.subr.bf16.mxu0 %v3555_v52  ;;  %5994 = vst [vmem:[#allocation67_spill] sm:$0xff] %v5993_v50  ;;  %v4641_v1 = vsel %vm5995_vm9, %v266_v29, %v267_v25  ;;  %vm4643_vm15 = vcmp.ne.s32.totalorder %v514_v35, 0  ;;  %v5998_v29 = vrot.slane %v4611_v12, 7  ;;  %vm872_vm11 = vcmp.ne.s32.totalorder %v444_v49, 0  ;;  %v2161_v50 = vld [vmem:[#allocation5 + $0x318] sm:$0xff] }
  0xbb   : > { %3523 = vmatpush1.bf16.msra.mxu1 %v3522_v11  ;;  %3236 = vmatprep.mubr.f32.mxu1 %v4605_v9  ;;  %v5997_v32 = vsel %vm4643_vm15, 4294967295, %v5996_v32  ;;  %v268_v11 = vrot.slane %v4187_v41, 7  ;;  %v3560_v9 = vpack.c.bf16 %v2159_v16, %v2158_v33  ;;  %v4657_v44 = vpack.c.bf16 %v2191_v5, %v2190_v3  ;;  %v2163_v16 = vld [vmem:[#allocation5 + $0x328] sm:$0xff] }
  0xbc   : > { %1357 = vmatmul.mubr.f32.gmra.mrb[14].mxu0 %v4616_v55  ;;  %3524 = vmatprep.subr.bf16.mxu1 %v5930_v18  ;;  %v331_v35 = vsel %vm5995_vm9, %v5998_v29, %v257_v15  ;;  %v269_v29 = vrot.slane %v4211_v54, 7  ;;  %v528_v49 = vand.u32 15, %v416_v0  ;;  %v6001_v5 = vrot.slane %v4307_v17, 7 }
  0xbd   : > { %1361 = vmatprep.mubr.f32.mxu0 %v4184_v39  ;;  %3558 = vmatpush3.bf16.msra.mxu0 %v3555_v52  ;;  %v2160_v52 = vld [vmem:[#allocation5 + $0x310] sm:$0xff] }
  0xbe   : > { %3237 = vmatmul.mubr.msk.f32.gmra.mrb[30].mxu1 %vm4629_vm0, %v4626_v28  ;;  %vm5999_vm0 = vmmov %vm5995_vm9  ;;  %3608 = vmatprep.subr.bf16.mxu0 %v4657_v44  ;;  %v3563_v33 = vpack.c.bf16 %v2161_v50, %v2160_v52  ;;  %v418_v50 = vadd.s32 112, %v4095_v24  ;;  %v2165_v52 = vld [vmem:[#allocation5 + $0x338] sm:$0xff] }
  0xbf   : > { %3526 = vmatpush1.bf16.msra.mxu1 %v3525_v46  ;;  %1771 = vmatprep.mubr.f32.mxu1 %v4608_v47  ;;  %v4666_v46 = vsel %vm5999_vm0, %v267_v25, %v268_v11  ;;  %vm6002_vm9 = vmmov %vm5999_vm0  ;;  %v2162_v25 = vld [vmem:[#allocation5 + $0x320] sm:$0xff]  ;;  %v4680_v0 = vsel %vm5999_vm0, %v268_v11, %v269_v29  ;;  %v2164_v11 = vld [vmem:[#allocation5 + $0x330] sm:$0xff] }
  0xc0   : > { %2916 = vmatmul.mubr.msk.f32.gmra.mrb[16].mxu0 %vm4643_vm15, %v4641_v1  ;;  %3559 = vmatprep.subr.bf16.mxu1 %v5930_v18  ;;  %6000 = vst [vmem:[#allocation68_spill] sm:$0xff] %v4666_v46  ;;  %v330_v3 = vsel %vm6002_vm9, %v257_v15, %v6001_v5  ;;  %v3566_v15 = vpack.c.bf16 %v2163_v16, %v2162_v25  ;;  %vm6005_vm9 = vmmov %vm5999_vm0  ;;  %v271_v5 = vrot.slane %v4238_v10, 7  ;;  %v2166_v25 = vld [vmem:[#allocation5 + $0x340] sm:$0xff]  ;;  %v2167_v16 = vld [vmem:[#allocation5 + $0x348] sm:$0xff] }
  0xc1   : > { %1366 = vmatprep.mubr.f32.mxu0 %v4187_v41  ;;  %v3572_v43 = vpack.c.bf16 %v2167_v16, %v2166_v25  ;;  %v6010_v25 = vmov 0  ;;  %v422_v16 = vadd.s32 144, %v4095_v24 }
  0xc2   : > { %2944 = vmatmul.mubr.msk.f32.vlgmr.msra.gmra.mrb[32].mxu1 %vm872_vm11, %v331_v35  ;;  %vm4682_vm11 = vcmp.ne.s32.totalorder %v528_v49, 0  ;;  %v270_v35 = vrot.slane %v4214_v57, 7 }
  0xc3   : > { %3561 = vmatpush1.bf16.msra.mxu1 %v3560_v9  ;;  %1776 = vmatprep.mubr.f32.mxu1 %v4307_v17  ;;  %v6003_v9 = vmov 0 }
  0xc4   : > { %1367 = vmatmul.mubr.f32.gmra.mrb[18].mxu0 %v4666_v46  ;;  %3562 = vmatprep.subr.bf16.mxu1 %v5930_v18  ;;  %v6004_v9 = vsel %vm4682_vm11, 4294967295, %v6003_v9  ;;  %v4696_v49 = vsel %vm6005_vm9, %v269_v29, %v270_v35  ;;  %v4708_v29 = vsel %vm5999_vm0, %v270_v35, %v271_v5  ;;  %v2168_v35 = vld [vmem:[#allocation5 + $0x350] sm:$0xff] }
  0xc5   : > { %1371 = vmatprep.mubr.f32.mxu0 %v4211_v54  ;;  %6006 = vst [vmem:[#allocation69_spill] sm:$0xff] %v4696_v49 }
  0xc6   : > { %1777 = vmatmul.mubr.f32.gmra.mrb[34].mxu1 %v330_v3  ;;  %v542_v3 = vand.u32 15, %v418_v50  ;;  %v6007_v50 = vmov 0 }
  0xc7   : > { %1781 = vmatprep.mubr.f32.mxu1 %v4098_v26  ;;  %3564 = vmatpush1.bf16.msra.mxu1 %v3563_v33  ;;  %v3569_v33 = vpack.c.bf16 %v2165_v52, %v2164_v11 }
  0xc8   : > { %2917 = vmatmul.mubr.msk.f32.gmra.mrb[20].mxu0 %vm4682_vm11, %v4680_v0  ;;  %3565 = vmatprep.subr.bf16.mxu1 %v5930_v18  ;;  %vm4710_vm9 = vcmp.ne.s32.totalorder %v542_v3, 0  ;;  %v2170_v3 = vld [vmem:[#allocation5 + $0x360] sm:$0xff] }
  0xc9   : > { %1376 = vmatprep.mubr.f32.mxu0 %v4214_v57  ;;  %v6008_v50 = vsel %vm4710_vm9, 4294967295, %v6007_v50 }
  0xca   : > { %2945 = vmatmul.mubr.msk.f32.gmra.mrb[36].mxu1 %vm4361_vm10, %v4359_v27  ;;  %v420_v27 = vadd.s32 128, %v4095_v24  ;;  %vm6009_vm10 = vmmov %vm5999_vm0 }
  0xcb   : > { %1786 = vmatprep.mubr.f32.mxu1 %v4101_v30  ;;  %3567 = vmatpush1.bf16.msra.mxu1 %v3566_v15  ;;  %v272_v30 = vrot.slane %v4241_v14, 7  ;;  %v2169_v15 = vld [vmem:[#allocation5 + $0x358] sm:$0xff] }
  0xcc   : > { %1377 = vmatmul.mubr.f32.gmra.mrb[22].mxu0 %v4696_v49  ;;  %3568 = vmatprep.subr.bf16.mxu1 %v5930_v18  ;;  %v556_v52 = vand.u32 15, %v420_v27 }
  0xcd   : > { %1381 = vmatprep.mubr.f32.mxu0 %v4238_v10  ;;  %v4725_v11 = vsel %vm6009_vm10, %v271_v5, %v272_v30 }
  0xce   : > { %1787 = vmatmul.mubr.f32.gmra.mrb[38].mxu1 %v4399_v20  ;;  %v273_v20 = vrot.slane %v4265_v38, 7  ;;  %vm4739_vm10 = vcmp.ne.s32.totalorder %v556_v52, 0  ;;  %v570_v52 = vand.u32 15, %v422_v16  ;;  %v424_v16 = vadd.s32 160, %v4095_v24 }
  0xcf   : > { %1791 = vmatprep.mubr.f32.mxu1 %v4122_v56  ;;  %3570 = vmatpush1.bf16.msra.mxu1 %v3569_v33  ;;  %v3575_v56 = vpack.c.bf16 %v2169_v15, %v2168_v35  ;;  %v2171_v33 = vld [vmem:[#allocation5 + $0x368] sm:$0xff]  ;;  %v6011_v25 = vsel %vm4739_vm10, 4294967295, %v6010_v25  ;;  %v275_v15 = vrot.slane %v4292_v62, 7 }
  0xd0   : > { %2918 = vmatmul.mubr.msk.f32.gmra.mrb[24].mxu0 %vm4710_vm9, %v4708_v29  ;;  %3571 = vmatprep.subr.bf16.mxu1 %v5930_v18  ;;  %v4737_v5 = vsel %vm5999_vm0, %v272_v30, %v273_v20  ;;  %v3578_v27 = vpack.c.bf16 %v2171_v33, %v2170_v3  ;;  %v2172_v30 = vld [vmem:[#allocation5 + $0x370] sm:$0xff]  ;;  %v2175_v3 = vld [vmem:[#allocation5 + $0x388] sm:$0xff]  ;;  %v6013_v33 = vmov 0  ;;  %v584_v28 = vand.u32 15, %v424_v16 }
  0xd1   : > { %1386 = vmatprep.mubr.f32.mxu0 %v4241_v14  ;;  %v426_v16 = vadd.s32 176, %v4095_v24 }
  0xd2   : > { %2946 = vmatmul.mubr.msk.f32.gmra.mrb[40].mxu1 %vm4434_vm13, %v4432_v8  ;;  %vm4768_vm13 = vcmp.ne.s32.totalorder %v570_v52, 0  ;;  %v277_v52 = vrot.slane %v4323_v37, 7 }
  0xd3   : > { %1796 = vmatprep.mubr.f32.mxu1 %v4125_v58  ;;  %3573 = vmatpush1.bf16.msra.mxu1 %v3572_v43  ;;  %v274_v58 = vrot.slane %v4268_v42, 7  ;;  %v2173_v43 = vld [vmem:[#allocation5 + $0x378] sm:$0xff]  ;;  %v6014_v33 = vsel %vm4768_vm13, 4294967295, %v6013_v33  ;;  %v598_v12 = vand.u32 15, %v426_v16  ;;  %v428_v16 = vadd.s32 192, %v4095_v24 }
  0xd4   : > { %1387 = vmatmul.mubr.f32.gmra.mrb[26].mxu0 %v4725_v11  ;;  %3574 = vmatprep.subr.bf16.mxu1 %v5930_v18  ;;  %6015 = vst [vmem:[#allocation71_spill] sm:$0xff] %v6014_v33 }
  0xd5   : > { %1391 = vmatprep.mubr.f32.mxu0 %v4265_v38  ;;  %v4754_v35 = vsel %vm5999_vm0, %v273_v20, %v274_v58  ;;  %v4766_v20 = vsel %vm5999_vm0, %v274_v58, %v275_v15  ;;  %v2176_v58 = vld [vmem:[#allocation5 + $0x390] sm:$0xff] }
  0xd6   : > { %1797 = vmatmul.mubr.f32.gmra.mrb[42].mxu1 %v4472_v53  ;;  %6012 = vst [vmem:[#allocation70_spill] sm:$0xff] %v4766_v20 }
  0xd7   : > { %1801 = vmatprep.mubr.f32.mxu1 %v4132_v4  ;;  %3576 = vmatpush1.bf16.msra.mxu1 %v3575_v56  ;;  %v3581_v4 = vpack.c.bf16 %v2173_v43, %v2172_v30  ;;  %v2174_v56 = vld [vmem:[#allocation5 + $0x380] sm:$0xff]  ;;  %v2177_v30 = vld [vmem:[#allocation5 + $0x398] sm:$0xff] }
  0xd8   : > { %2919 = vmatmul.mubr.msk.f32.gmra.mrb[28].mxu0 %vm4739_vm10, %v4737_v5  ;;  %3577 = vmatprep.subr.bf16.mxu1 %v5930_v18 }
  0xd9   : > { %1396 = vmatprep.mubr.f32.mxu0 %v4268_v42 }
  0xda   : > { %2947 = vmatmul.mubr.msk.f32.gmra.mrb[44].mxu1 %vm4507_vm14, %v4505_v61  ;;  %vm4797_vm14 = vcmp.ne.s32.totalorder %v584_v28, 0  ;;  %v2180_v28 = vld [vmem:[#allocation5 + $0x3b0] sm:$0xff] }
  0xdb   : > { %1806 = vmatprep.mubr.f32.mxu1 %v4135_v6  ;;  %3579 = vmatpush1.bf16.msra.mxu1 %v3578_v27  ;;  %v276_v6 = vrot.slane %v4296_v7, 7  ;;  %v3584_v27 = vpack.c.bf16 %v2175_v3, %v2174_v56  ;;  %v2179_v56 = vld [vmem:[#allocation5 + $0x3a8] sm:$0xff]  ;;  %v6017_v3 = vmov 0 }
  0xdc   : > { %1397 = vmatmul.mubr.f32.gmra.mrb[30].mxu0 %v4754_v35  ;;  %3580 = vmatprep.subr.bf16.mxu1 %v5930_v18  ;;  %v6018_v3 = vsel %vm4797_vm14, 4294967295, %v6017_v3 }
  0xdd   : > { %1401 = vmatprep.mubr.f32.mxu0 %v4292_v62  ;;  %v4783_v43 = vsel %vm5999_vm0, %v275_v15, %v276_v6  ;;  %v4795_v15 = vsel %vm5999_vm0, %v276_v6, %v277_v52  ;;  %6019 = vst [vmem:[#allocation73_spill] sm:$0xff] %v6018_v3  ;;  %v2181_v6 = vld [vmem:[#allocation5 + $0x3b8] sm:$0xff]  ;;  %v5853_v3 = vrot.slane %v4608_v47, 1 }
  0xde   : > { %1807 = vmatmul.mubr.f32.gmra.mrb[46].mxu1 %v4545_v2  ;;  %6016 = vst [vmem:[#allocation72_spill] sm:$0xff] %v4783_v43 }
  0xdf   : > { %1811 = vmatprep.mubr.f32.mxu1 %v4157_v19  ;;  %3582 = vmatpush1.bf16.msra.mxu1 %v3581_v4  ;;  %v3587_v19 = vpack.c.bf16 %v2177_v30, %v2176_v58  ;;  %v2178_v4 = vld [vmem:[#allocation5 + $0x3a0] sm:$0xff]  ;;  %v279_v30 = vrot.slane %v4353_v40, 7 }
  0xe0   : > { %2920 = vmatmul.mubr.msk.f32.gmra.mrb[32].mxu0 %vm4768_vm13, %v4766_v20  ;;  %3583 = vmatprep.subr.bf16.mxu1 %v5930_v18 }
  0xe1   : > { %1406 = vmatprep.mubr.f32.mxu0 %v4296_v7 }
  0xe2   : > { %2948 = vmatmul.mubr.msk.f32.gmra.mrb[48].mxu1 %vm4580_vm12, %v4578_v36  ;;  %vm4826_vm12 = vcmp.ne.s32.totalorder %v598_v12, 0  ;;  %v2184_v12 = vld [vmem:[#allocation5 + $0x3d0] sm:$0xff] }
  0xe3   : > { %1816 = vmatprep.mubr.f32.mxu1 %v4160_v21  ;;  %3585 = vmatpush1.bf16.msra.mxu1 %v3584_v27  ;;  %v278_v21 = vrot.slane %v4328_v31, 7  ;;  %v3590_v27 = vpack.c.bf16 %v2179_v56, %v2178_v4  ;;  %v2183_v4 = vld [vmem:[#allocation5 + $0x3c8] sm:$0xff]  ;;  %v3740_v56 = vld [vmem:[%s4082_s9 + $0xc0] sm:$0xff] }
  0xe4   : > { %1407 = vmatmul.mubr.f32.gmra.mrb[34].mxu0 %v4783_v43  ;;  %3586 = vmatprep.subr.bf16.mxu1 %v5930_v18 }
  0xe5   : > { %1411 = vmatprep.mubr.f32.mxu0 %v4323_v37  ;;  %v4812_v58 = vsel %vm5999_vm0, %v277_v52, %v278_v21  ;;  %v4824_v52 = vsel %vm5999_vm0, %v278_v21, %v279_v30  ;;  %v2185_v21 = vld [vmem:[#allocation5 + $0x3d8] sm:$0xff] }
  0xe6   : > { %1817 = vmatmul.mubr.f32.gmra.mrb[50].mxu1 %v4616_v55 }
  0xe7   : > { %1821 = vmatprep.mubr.f32.mxu1 %v4184_v39  ;;  %3588 = vmatpush1.bf16.msra.mxu1 %v3587_v19  ;;  %v3593_v39 = vpack.c.bf16 %v2181_v6, %v2180_v28  ;;  %v2182_v19 = vld [vmem:[#allocation5 + $0x3c0] sm:$0xff]  ;;  %v281_v6 = vrot.slane %v4394_v13, 7 }
  0xe8   : > { %2921 = vmatmul.mubr.msk.f32.gmra.mrb[36].mxu0 %vm4797_vm14, %v4795_v15  ;;  %3589 = vmatprep.subr.bf16.mxu1 %v5930_v18 }
  0xe9   : > { %1416 = vmatprep.mubr.f32.mxu0 %v4328_v31 }
  0xea   : > { %2949 = vmatmul.mubr.msk.f32.gmra.mrb[52].mxu1 %vm4643_vm15, %v4641_v1 }
  0xeb   : > { %1826 = vmatprep.mubr.f32.mxu1 %v4187_v41  ;;  %3591 = vmatpush1.bf16.msra.mxu1 %v3590_v27  ;;  %v280_v41 = vrot.slane %v4368_v51, 7  ;;  %v3596_v27 = vpack.c.bf16 %v2183_v4, %v2182_v19  ;;  %v2187_v19 = vld [vmem:[#allocation5 + $0x3e8] sm:$0xff]  ;;  %v6023_v4 = vmov 0 }
  0xec   : > { %1417 = vmatmul.mubr.f32.gmra.mrb[38].mxu0 %v4812_v58  ;;  %3592 = vmatprep.subr.bf16.mxu1 %v5930_v18 }
  0xed   : > { %1421 = vmatprep.mubr.f32.mxu0 %v4353_v40  ;;  %v4841_v28 = vsel %vm5999_vm0, %v279_v30, %v280_v41  ;;  %v4853_v30 = vsel %vm5999_vm0, %v280_v41, %v281_v6  ;;  %v2189_v41 = vld [vmem:[#allocation5 + $0x3f8] sm:$0xff] }
  0xee   : > { %1827 = vmatmul.mubr.f32.gmra.mrb[54].mxu1 %v4666_v46  ;;  %v612_v46 = vand.u32 15, %v428_v16  ;;  %6022 = vst [vmem:[#allocation74_spill] sm:$0xff] %v4853_v30  ;;  %v430_v16 = vadd.s32 208, %v4095_v24 }
  0xef   : > { %1831 = vmatprep.mubr.f32.mxu1 %v4211_v54  ;;  %3594 = vmatpush1.bf16.msra.mxu1 %v3593_v39  ;;  %v3599_v54 = vpack.c.bf16 %v2185_v21, %v2184_v12  ;;  %v2186_v39 = vld [vmem:[#allocation5 + $0x3e0] sm:$0xff]  ;;  %v283_v21 = vrot.slane %v4427_v48, 7 }
  0xf0   : > { %2922 = vmatmul.mubr.msk.f32.gmra.mrb[40].mxu0 %vm4826_vm12, %v4824_v52  ;;  %3595 = vmatprep.subr.bf16.mxu1 %v5930_v18  ;;  %vm4855_vm15 = vcmp.ne.s32.totalorder %v612_v46, 0  ;;  %v2188_v46 = vld [vmem:[#allocation5 + $0x3f0] sm:$0xff] }
  0xf1   : > { %1426 = vmatprep.mubr.f32.mxu0 %v4368_v51  ;;  %v6024_v4 = vsel %vm4855_vm15, 4294967295, %v6023_v4 }
  0xf2   : > { %2950 = vmatmul.mubr.msk.f32.gmra.mrb[56].mxu1 %vm4682_vm11, %v4680_v0  ;;  %6025 = vst [vmem:[#allocation75_spill] sm:$0xff] %v6024_v4  ;;  %v6109_v4 = vld [vmem:[#allocation58_spill] sm:$0xff] }
  0xf3   : > { %1836 = vmatprep.mubr.f32.mxu1 %v4214_v57  ;;  %3597 = vmatpush1.bf16.msra.mxu1 %v3596_v27  ;;  %v282_v57 = vrot.slane %v4403_v22, 7  ;;  %v3602_v27 = vpack.c.bf16 %v2187_v19, %v2186_v39  ;;  %v284_v39 = vrot.slane %v4441_v63, 7 }
  0xf4   : > { %1427 = vmatmul.mubr.f32.gmra.mrb[42].mxu0 %v4841_v28  ;;  %3598 = vmatprep.subr.bf16.mxu1 %v5930_v18 }
  0xf5   : > { %1431 = vmatprep.mubr.f32.mxu0 %v4394_v13  ;;  %v4870_v12 = vsel %vm5999_vm0, %v281_v6, %v282_v57  ;;  %v4882_v6 = vsel %vm5999_vm0, %v282_v57, %v283_v21 }
  0xf6   : > { %1837 = vmatmul.mubr.f32.gmra.mrb[58].mxu1 %v4696_v49  ;;  %6026 = vst [vmem:[#allocation76_spill] sm:$0xff] %v4870_v12  ;;  %v626_v49 = vand.u32 15, %v430_v16  ;;  %6027 = vst [vmem:[#allocation77_spill] sm:$0xff] %v4882_v6  ;;  %v6035_v16 = vmov 0 }
  0xf7   : > { %1841 = vmatprep.mubr.f32.mxu1 %v4238_v10  ;;  %3600 = vmatpush1.bf16.msra.mxu1 %v3599_v54  ;;  %v3605_v10 = vpack.c.bf16 %v2189_v41, %v2188_v46  ;;  %v6028_v54 = vmov 0  ;;  %v434_v41 = vadd.s32 240, %v4095_v24 }
  0xf8   : > { %2923 = vmatmul.mubr.msk.f32.gmra.mrb[44].mxu0 %vm4855_vm15, %v4853_v30  ;;  %3601 = vmatprep.subr.bf16.mxu1 %v5930_v18  ;;  %vm4884_vm11 = vcmp.ne.s32.totalorder %v626_v49, 0  ;;  %v6032_v49 = vld [vmem:[#allocation46_spill] sm:$0xff] }
  0xf9   : > { %1436 = vmatprep.mubr.f32.mxu0 %v4403_v22  ;;  %v6029_v54 = vsel %vm4884_vm11, 4294967295, %v6028_v54  ;;  %v285_v19 = vrot.slane %v6032_v49, 7 }
  0xfa   : > { %2951 = vmatmul.mubr.msk.f32.gmra.mrb[60].mxu1 %vm4710_vm9, %v4708_v29  ;;  %6030 = vst [vmem:[#allocation78_spill] sm:$0xff] %v6029_v54  ;;  %vm6033_vm9 = vmmov %vm5999_vm0  ;;  %v6101_v54 = vld [vmem:[#allocation48_spill] sm:$0xff] }
  0xfb   : > { %1846 = vmatprep.mubr.f32.mxu1 %v4241_v14  ;;  %3603 = vmatpush1.bf16.msra.mxu1 %v3602_v27  ;;  %v432_v14 = vadd.s32 224, %v4095_v24  ;;  %v6038_v27 = vld [vmem:[#allocation47_spill] sm:$0xff] }
  0xfc   : > { %1437 = vmatmul.mubr.f32.gmra.mrb[46].mxu0 %v4870_v12  ;;  %3604 = vmatprep.subr.bf16.mxu1 %v5930_v18  ;;  %v4898_v18 = vsel %vm5999_vm0, %v283_v21, %v284_v39  ;;  %v286_v46 = vrot.slane %v6038_v27, 7  ;;  %v6041_v21 = vld [vmem:[#allocation50_spill] sm:$0xff] }
  0xfd   : > { %1441 = vmatprep.mubr.f32.mxu0 %v4427_v48  ;;  %6031 = vst [vmem:[#allocation79_spill] sm:$0xff] %v4898_v18  ;;  %v640_v57 = vand.u32 15, %v432_v14  ;;  %v6043_v14 = vmov 0 }
  0xfe   : > { %1847 = vmatmul.mubr.f32.gmra.mrb[62].mxu1 %v4725_v11 }
  0xff   : > { %1851 = vmatprep.mubr.f32.mxu1 %v4265_v38  ;;  %3606 = vmatpush1.bf16.msra.mxu1 %v3605_v10  ;;  %v4909_v38 = vsel %vm6033_vm9, %v284_v39, %v285_v19  ;;  %vm4911_vm8 = vcmp.ne.s32.totalorder %v640_v57, 0  ;;  %vm6039_vm9 = vmmov %vm5999_vm0  ;;  %v287_v10 = vrot.slane %v6041_v21, 7  ;;  %v654_v39 = vand.u32 15, %v434_v41 }
 0x100   : > { %2924 = vmatmul.mubr.msk.f32.gmra.mrb[48].mxu0 %vm4884_vm11, %v4882_v6  ;;  %6034 = vst [vmem:[#allocation46_spill] sm:$0xff] %v4909_v38  ;;  %v6036_v16 = vsel %vm4911_vm8, 4294967295, %v6035_v16  ;;  %v436_v41 = vadd.s32 256, %v4095_v24 }
 0x101   : > { %1446 = vmatprep.mubr.f32.mxu0 %v4441_v63  ;;  %6037 = vst [vmem:[#allocation80_spill] sm:$0xff] %v6036_v16  ;;  %v6092_v16 = vld [vmem:[#allocation41_spill] sm:$0xff] }
 0x102   : > { %2952 = vmatmul.mubr.msk.f32.gmra.mrb[64].mxu1 %vm4739_vm10, %v4737_v5  ;;  %vm4938_vm10 = vcmp.ne.s32.totalorder %v654_v39, 0  ;;  %v668_v33 = vand.u32 15, %v436_v41 }
 0x103   : > { %1856 = vmatprep.mubr.f32.mxu1 %v4268_v42  ;;  %v4925_v42 = vsel %vm6039_vm9, %v285_v19, %v286_v46  ;;  %v6044_v14 = vsel %vm4938_vm10, 4294967295, %v6043_v14  ;;  %v6046_v19 = vld [vmem:[#allocation52_spill] sm:$0xff]  ;;  %vm6047_vm9 = vmmov %vm5999_vm0 }
 0x104   : > { %1447 = vmatmul.mubr.f32.gmra.mrb[50].mxu0 %v4898_v18  ;;  %6040 = vst [vmem:[#allocation47_spill] sm:$0xff] %v4925_v42  ;;  %6045 = vst [vmem:[#allocation81_spill] sm:$0xff] %v6044_v14  ;;  %v288_v57 = vrot.slane %v6046_v19, 7  ;;  %v6085_v14 = vld [vmem:[#allocation36_spill] sm:$0xff] }
 0x105   : > { %1451 = vmatprep.mubr.f32.mxu0 %v6032_v49 }
 0x106   : > { %1857 = vmatmul.mubr.f32.gmra.mrb[66].mxu1 %v4754_v35 }
 0x107   : > { %1861 = vmatprep.mubr.f32.mxu1 %v4292_v62  ;;  %v4936_v62 = vsel %vm5999_vm0, %v286_v46, %v287_v10  ;;  %v6049_v46 = vld [vmem:[#allocation56_spill] sm:$0xff] }
 0x108   : > { %2925 = vmatmul.mubr.msk.f32.gmra.mrb[52].mxu0 %vm4911_vm8, %v4909_v38  ;;  %6042 = vst [vmem:[#allocation50_spill] sm:$0xff] %v4936_v62  ;;  %v289_v39 = vrot.slane %v6049_v46, 7 }
 0x109   : > { %1456 = vmatprep.mubr.f32.mxu0 %v6038_v27 }
 0x10a   : > { %2953 = vmatmul.mubr.msk.f32.gmra.mrb[68].mxu1 %vm4768_vm13, %v4766_v20  ;;  %vm4965_vm13 = vcmp.ne.s32.totalorder %v668_v33, 0  ;;  %v405_v20 = vadd.s32 8, %v4095_v24 }
 0x10b   : > { %1866 = vmatprep.mubr.f32.mxu1 %v4296_v7  ;;  %v4952_v7 = vsel %vm6047_vm9, %v287_v10, %v288_v57  ;;  %v6051_v10 = vmov 0  ;;  %vm6055_vm9 = vmmov %vm5999_vm0 }
 0x10c   : > { %1457 = vmatmul.mubr.f32.gmra.mrb[54].mxu0 %v4925_v42  ;;  %6048 = vst [vmem:[#allocation52_spill] sm:$0xff] %v4952_v7  ;;  %v6052_v10 = vsel %vm4965_vm13, 4294967295, %v6051_v10 }
 0x10d   : > { %1461 = vmatprep.mubr.f32.mxu0 %v6041_v21  ;;  %6053 = vst [vmem:[#allocation82_spill] sm:$0xff] %v6052_v10  ;;  %v6075_v10 = vld [vmem:[#allocation27_spill] sm:$0xff] }
 0x10e   : > { %1867 = vmatmul.mubr.f32.gmra.mrb[70].mxu1 %v4783_v43  ;;  %v6054_v43 = vld [vmem:[#allocation57_spill] sm:$0xff] }
 0x10f   : > { %1871 = vmatprep.mubr.f32.mxu1 %v4323_v37  ;;  %v4963_v37 = vsel %vm5999_vm0, %v288_v57, %v289_v39  ;;  %v5851_v41 = vrot.slane %v6054_v43, 7  ;;  %v451_v57 = vand.u32 15, %v405_v20  ;;  %vm6057_vm0 = vcmp.lt.s32.totalorder %v4095_v24, 7 }
 0x110   : > { %2926 = vmatmul.mubr.msk.f32.gmra.mrb[56].mxu0 %vm4938_vm10, %v4936_v62  ;;  %6050 = vst [vmem:[#allocation56_spill] sm:$0xff] %v4963_v37 }
 0x111   : > { %1466 = vmatprep.mubr.f32.mxu0 %v6046_v19  ;;  %v4983_v33 = vsel %vm6055_vm9, %v289_v39, %v5851_v41  ;;  %v6058_v39 = vrot.slane %v4098_v26, 1  ;;  %vm6059_vm9 = vmmov %vm6057_vm0 }
 0x112   : > { %2954 = vmatmul.mubr.msk.f32.gmra.mrb[72].mxu1 %vm4797_vm14, %v4795_v15  ;;  %6056 = vst [vmem:[#allocation83_spill] sm:$0xff] %v4983_v33 }
 0x113   : > { %1876 = vmatprep.mubr.f32.mxu1 %v4328_v31  ;;  %v333_v31 = vrot.slane %v4307_v17, 1 }
 0x114   : > { %1467 = vmatmul.mubr.f32.gmra.mrb[58].mxu0 %v4952_v7 }
 0x115   : > { %1471 = vmatprep.mubr.f32.mxu0 %v6049_v46  ;;  %v403_v17 = vsel %vm6057_vm0, %v5853_v3, %v333_v31  ;;  %v2193_v46 = vld [vmem:[#allocation5 + $0x418] sm:$0xff]  ;;  %v402_v20 = vsel %vm6059_vm9, %v333_v31, %v6058_v39  ;;  %v2195_v3 = vld [vmem:[#allocation5 + $0x428] sm:$0xff]  ;;  %v2196_v31 = vld [vmem:[#allocation5 + $0x430] sm:$0xff]  ;;  %vm6093_vm9 = vnez %v6092_v16 }
 0x116   : > { %1877 = vmatmul.mubr.f32.gmra.mrb[74].mxu1 %v4812_v58  ;;  %v2199_v39 = vld [vmem:[#allocation5 + $0x448] sm:$0xff] }
 0x117   : > { %1881 = vmatprep.mubr.f32.mxu1 %v4353_v40  ;;  %v2192_v40 = vld [vmem:[#allocation5 + $0x410] sm:$0xff] }
 0x118   : > { %2927 = vmatmul.mubr.msk.f32.gmra.mrb[60].mxu0 %vm4965_vm13, %v4963_v37  ;;  %vm1017_vm13 = vcmp.ne.s32.totalorder %v451_v57, 15  ;;  %v3611_v41 = vpack.c.bf16 %v2193_v46, %v2192_v40  ;;  %v2197_v57 = vld [vmem:[#allocation5 + $0x438] sm:$0xff]  ;;  %v2198_v46 = vld [vmem:[#allocation5 + $0x440] sm:$0xff]  ;;  %v2203_v40 = vld [vmem:[#allocation5 + $0x468] sm:$0xff] }
 0x119   : > { %1476 = vmatprep.mubr.f32.mxu0 %v6054_v43  ;;  %v2194_v43 = vld [vmem:[#allocation5 + $0x420] sm:$0xff]  ;;  %v6076_v37 = vld [vmem:[#allocation28_spill] sm:$0xff] }
 0x11a   : > { %2955 = vmatmul.mubr.msk.f32.gmra.mrb[76].mxu1 %vm4826_vm12, %v4824_v52  ;;  %v3615_v26 = vpack.c.bf16 %v2195_v3, %v2194_v43  ;;  %v6064_v43 = vld [vmem:[#allocation16_spill] sm:$0xff]  ;;  %v3730_v3 = vld [vmem:[%s4082_s9 + $0x70] sm:$0xff] }
 0x11b   : > { %1886 = vmatprep.mubr.f32.mxu1 %v4368_v51  ;;  %v6060_v51 = vld [vmem:[#allocation12_spill] sm:$0xff] }
 0x11c   : > { %1477 = vmatmul.mubr.f32.gmra.mrb[62].mxu0 %v4983_v33  ;;  %v3733_v33 = vld [vmem:[%s4082_s9 + $0x88] sm:$0xff] }
 0x11d   : > { %3271 = vmatprep.mubr.f32.mxu0 %v403_v17  ;;  %v6061_v17 = vld [vmem:[#allocation13_spill] sm:$0xff] }
 0x11e   : > { %1887 = vmatmul.mubr.f32.gmra.mrb[78].mxu1 %v4841_v28 }
 0x11f   : > { %1891 = vmatprep.mubr.f32.mxu1 %v4394_v13  ;;  %v6063_v13 = vld [vmem:[#allocation15_spill] sm:$0xff] }
 0x120   : > { %3272 = vmatmul.mubr.msk.f32.vlgmr.msra.gmra.mrb[64].mxu0 %vm1017_vm13, %v402_v20  ;;  %v2200_v20 = vld [vmem:[#allocation5 + $0x450] sm:$0xff]  ;;  %vm6086_vm13 = vnez %v5946_v45  ;;  %v6094_v45 = vld [vmem:[#allocation42_spill] sm:$0xff] }
 0x121   : > { %3274 = vmatprep.mubr.f32.mxu0 %v6060_v51  ;;  %3610 = vmatpush3.bf16.msra.mxu0 %v4657_v44  ;;  %v3619_v44 = vpack.c.bf16 %v2197_v57, %v2196_v31  ;;  %v2201_v51 = vld [vmem:[#allocation5 + $0x458] sm:$0xff]  ;;  %v6069_v57 = vld [vmem:[#allocation21_spill] sm:$0xff] }
 0x122   : > { %2956 = vmatmul.mubr.msk.f32.gmra.mrb[80].mxu1 %vm4855_vm15, %v4853_v30  ;;  %3612 = vmatprep.subr.bf16.mxu0 %v3611_v41  ;;  %v3727_v30 = vld [vmem:[%s4082_s9 + $0x58] sm:$0xff] }
 0x123   : > { %1896 = vmatprep.mubr.f32.mxu1 %v4403_v22  ;;  %v6066_v22 = vld [vmem:[#allocation18_spill] sm:$0xff] }
 0x124   : > { %3275 = vmatmul.mubr.msk.f32.gmra.mrb[66].mxu0 %vm4145_vm1, %v6061_v17  ;;  %v2202_v17 = vld [vmem:[#allocation5 + $0x460] sm:$0xff] }
 0x125   : > { %3277 = vmatprep.mubr.f32.mxu0 %v6063_v13  ;;  %3614 = vmatpush3.bf16.msra.mxu0 %v3611_v41  ;;  %v3623_v41 = vpack.c.bf16 %v2199_v39, %v2198_v46  ;;  %v6070_v46 = vld [vmem:[#allocation22_spill] sm:$0xff] }
 0x126   : > { %1897 = vmatmul.mubr.f32.gmra.mrb[82].mxu1 %v4870_v12  ;;  %3616 = vmatprep.subr.bf16.mxu0 %v3615_v26  ;;  %v3726_v12 = vld [vmem:[%s4082_s9 + $0x50] sm:$0xff] }
 0x127   : > { %1901 = vmatprep.mubr.f32.mxu1 %v4427_v48  ;;  %v6067_v48 = vld [vmem:[#allocation19_spill] sm:$0xff] }
 0x128   : > { %3278 = vmatmul.mubr.msk.f32.gmra.mrb[68].mxu0 %vm4172_vm2, %v6064_v43 }
 0x129   : > { %3280 = vmatprep.mubr.f32.mxu0 %v6066_v22  ;;  %3618 = vmatpush3.bf16.msra.mxu0 %v3615_v26  ;;  %v3627_v26 = vpack.c.bf16 %v2201_v51, %v2200_v20  ;;  %v2204_v20 = vld [vmem:[#allocation5 + $0x470] sm:$0xff]  ;;  %v2205_v51 = vld [vmem:[#allocation5 + $0x478] sm:$0xff] }
 0x12a   : > { %2957 = vmatmul.mubr.msk.f32.gmra.mrb[84].mxu1 %vm4884_vm11, %v4882_v6  ;;  %3620 = vmatprep.subr.bf16.mxu0 %v3619_v44  ;;  %v6103_v6 = vld [vmem:[#allocation51_spill] sm:$0xff] }
 0x12b   : > { %1906 = vmatprep.mubr.f32.mxu1 %v4441_v63  ;;  %v6072_v63 = vld [vmem:[#allocation24_spill] sm:$0xff] }
 0x12c   : > { %3281 = vmatmul.mubr.msk.f32.gmra.mrb[70].mxu0 %vm4199_vm3, %v6067_v48 }
 0x12d   : > { %3283 = vmatprep.mubr.f32.mxu0 %v6069_v57  ;;  %3622 = vmatpush3.bf16.msra.mxu0 %v3619_v44  ;;  %v3631_v44 = vpack.c.bf16 %v2203_v40, %v2202_v17  ;;  %v3735_v40 = vld [vmem:[%s4082_s9 + $0x98] sm:$0xff] }
 0x12e   : > { %1907 = vmatmul.mubr.f32.gmra.mrb[86].mxu1 %v4898_v18  ;;  %3624 = vmatprep.subr.bf16.mxu0 %v3623_v41  ;;  %v6100_v18 = vld [vmem:[#allocation49_spill] sm:$0xff] }
 0x12f   : > { %1911 = vmatprep.mubr.f32.mxu1 %v6032_v49  ;;  %v6073_v49 = vld [vmem:[#allocation25_spill] sm:$0xff] }
 0x130   : > { %3284 = vmatmul.mubr.msk.f32.gmra.mrb[72].mxu0 %vm4226_vm4, %v6070_v46 }
 0x131   : > { %3286 = vmatprep.mubr.f32.mxu0 %v6072_v63  ;;  %3626 = vmatpush3.bf16.msra.mxu0 %v3623_v41  ;;  %v3635_v41 = vpack.c.bf16 %v2205_v51, %v2204_v20  ;;  %v3720_v20 = vld [vmem:[%s4082_s9 + $0x20] sm:$0xff]  ;;  %v6083_v51 = vld [vmem:[#allocation34_spill] sm:$0xff] }
 0x132   : > { %2958 = vmatmul.mubr.msk.f32.gmra.mrb[88].mxu1 %vm4911_vm8, %v4909_v38  ;;  %3628 = vmatprep.subr.bf16.mxu0 %v3627_v26  ;;  %vm6084_vm1 = vnez %v6083_v51  ;;  %v6097_v38 = vld [vmem:[#allocation44_spill] sm:$0xff]  ;;  %vm6102_vm8 = vnez %v6101_v54 }
 0x133   : > { %1916 = vmatprep.mubr.f32.mxu1 %v6038_v27  ;;  %v6078_v27 = vld [vmem:[#allocation30_spill] sm:$0xff] }
 0x134   : > { %3287 = vmatmul.mubr.msk.f32.gmra.mrb[74].mxu0 %vm4253_vm5, %v6073_v49 }
 0x135   : > { %3289 = vmatprep.mubr.f32.mxu0 %v6075_v10  ;;  %3630 = vmatpush3.bf16.msra.mxu0 %v3627_v26  ;;  %v6079_v26 = vld [vmem:[#allocation32_spill] sm:$0xff] }
 0x136   : > { %1917 = vmatmul.mubr.f32.gmra.mrb[90].mxu1 %v4925_v42  ;;  %3632 = vmatprep.subr.bf16.mxu0 %v3631_v44  ;;  %v6091_v42 = vld [vmem:[#allocation40_spill] sm:$0xff] }
 0x137   : > { %1921 = vmatprep.mubr.f32.mxu1 %v6041_v21  ;;  %v6081_v21 = vld [vmem:[#allocation33_spill] sm:$0xff] }
 0x138   : > { %3290 = vmatmul.mubr.msk.f32.gmra.mrb[76].mxu0 %vm4280_vm6, %v6076_v37 }
 0x139   : > { %3292 = vmatprep.mubr.f32.mxu0 %v6078_v27  ;;  %3634 = vmatpush3.bf16.msra.mxu0 %v3631_v44  ;;  %v6082_v44 = vld [vmem:[#allocation35_spill] sm:$0xff] }
 0x13a   : > { %2959 = vmatmul.mubr.msk.f32.gmra.mrb[92].mxu1 %vm4938_vm10, %v4936_v62  ;;  %3636 = vmatprep.subr.bf16.mxu0 %v3635_v41  ;;  %v6087_v62 = vld [vmem:[#allocation37_spill] sm:$0xff]  ;;  %vm6098_vm10 = vnez %v6097_v38 }
 0x13b   : > { %1926 = vmatprep.mubr.f32.mxu1 %v6046_v19  ;;  %v3721_v19 = vld [vmem:[%s4082_s9 + $0x28] sm:$0xff] }
 0x13c   : > { %3293 = vmatmul.mubr.msk.f32.gmra.mrb[78].mxu0 %vm4302_vm7, %v6079_v26 }
 0x13d   : > { %3295 = vmatprep.mubr.f32.mxu0 %v6081_v21  ;;  %3638 = vmatpush3.bf16.msra.mxu0 %v3635_v41  ;;  %v6088_v41 = vld [vmem:[#allocation38_spill] sm:$0xff] }
 0x13e   : > { %1927 = vmatmul.mubr.f32.gmra.mrb[94].mxu1 %v4952_v7  ;;  %vm6089_vm0 = vnez %v6088_v41  ;;  %v6090_v7 = vld [vmem:[#allocation39_spill] sm:$0xff] }
 0x13f   : > { %2270 = vmatprep.mubr.f32.mxu1 %v3720_v20  ;;  %v3722_v20 = vld [vmem:[%s4082_s9 + $0x30] sm:$0xff] }
 0x140   : > { %3296 = vmatmul.mubr.msk.f32.gmra.mrb[80].mxu0 %vm6084_vm1, %v6082_v44 }
 0x141   : > { %3298 = vmatprep.mubr.f32.mxu0 %v6085_v14 }
 0x142   : > { %2976 = vmatmul.mubr.msk.f32.vlgmr.msra.gmra.mrb[96].mxu1 %vm6086_vm13, %v4432_v8  ;;  %vm6095_vm13 = vnez %v5961_v60  ;;  %v3723_v8 = vld [vmem:[%s4082_s9 + $0x38] sm:$0xff] }
 0x143   : > { %2275 = vmatprep.mubr.f32.mxu1 %v3721_v19  ;;  %v6096_v19 = vld [vmem:[#allocation43_spill] sm:$0xff]  ;;  %v6105_v60 = vld [vmem:[#allocation54_spill] sm:$0xff] }
 0x144   : > { %3299 = vmatmul.mubr.msk.f32.gmra.mrb[82].mxu0 %vm6089_vm0, %v6087_v62 }
 0x145   : > { %3301 = vmatprep.mubr.f32.mxu0 %v6090_v7 }
 0x146   : > { %2276 = vmatmul.mubr.f32.gmra.mrb[98].mxu1 %v4472_v53  ;;  %v6099_v53 = vld [vmem:[#allocation45_spill] sm:$0xff] }
 0x147   : > { %2280 = vmatprep.mubr.f32.mxu1 %v3722_v20  ;;  %v3724_v20 = vld [vmem:[%s4082_s9 + $0x40] sm:$0xff] }
 0x148   : > { %3302 = vmatmul.mubr.msk.f32.gmra.mrb[84].mxu0 %vm6093_vm9, %v6091_v42 }
 0x149   : > { %3304 = vmatprep.mubr.f32.mxu0 %v6094_v45 }
 0x14a   : > { %2977 = vmatmul.mubr.msk.f32.gmra.mrb[100].mxu1 %vm6095_vm13, %v4505_v61  ;;  %vm6104_vm13 = vnez %v5981_v23  ;;  %v3725_v61 = vld [vmem:[%s4082_s9 + $0x48] sm:$0xff] }
 0x14b   : > { %2285 = vmatprep.mubr.f32.mxu1 %v3723_v8  ;;  %v6106_v8 = vld [vmem:[#allocation53_spill] sm:$0xff]  ;;  %v6110_v23 = vld [vmem:[#allocation60_spill] sm:$0xff] }
 0x14c   : > { %3305 = vmatmul.mubr.msk.f32.gmra.mrb[86].mxu0 %vm6098_vm10, %v6096_v19  ;;  %vm6107_vm11 = vnez %v6106_v8  ;;  %vm6111_vm15 = vnez %v6110_v23  ;;  %v3728_v23 = vld [vmem:[%s4082_s9 + $0x60] sm:$0xff] }
 0x14d   : > { %3307 = vmatprep.mubr.f32.mxu0 %v6099_v53 }
 0x14e   : > { %2286 = vmatmul.mubr.f32.gmra.mrb[102].mxu1 %v4545_v2 }
 0x14f   : > { %2290 = vmatprep.mubr.f32.mxu1 %v3724_v20  ;;  %v6108_v20 = vld [vmem:[#allocation55_spill] sm:$0xff] }
 0x150   : > { %3308 = vmatmul.mubr.msk.f32.gmra.mrb[88].mxu0 %vm6102_vm8, %v6100_v18 }
 0x151   : > { %3310 = vmatprep.mubr.f32.mxu0 %v6103_v6 }
 0x152   : > { %2978 = vmatmul.mubr.msk.f32.gmra.mrb[104].mxu1 %vm6104_vm13, %v4578_v36  ;;  %vm6112_vm13 = vnez %v5997_v32 }
 0x153   : > { %2295 = vmatprep.mubr.f32.mxu1 %v3725_v61 }
 0x154   : > { %3311 = vmatmul.mubr.msk.f32.gmra.mrb[90].mxu0 %vm6107_vm11, %v6105_v60 }
 0x155   : > { %v5093_v2 = vpop.f32.mrb[0].mxu1  ;;  %3313 = vmatprep.mubr.f32.mxu0 %v6108_v20 }
 0x156   : > { %v1548_v47 = vpop.f32.mrb[1].mxu1  ;;  %2296 = vmatmul.mubr.f32.gmra.mrb[106].mxu1 %v4616_v55  ;;  %v6113_v55 = vld [vmem:[#allocation62_spill] sm:$0xff] }
 0x157   : > { %2300 = vmatprep.mubr.f32.mxu1 %v3726_v12  ;;  %vm6114_vm11 = vnez %v6113_v55 }
 0x158   : > { %3314 = vmatmul.mubr.msk.f32.gmra.mrb[92].mxu0 %vm6111_vm15, %v6109_v4 }
 0x159   : > { %v5101_v36 = vpop.f32.mrb[2].mxu1  ;;  %3316 = vmatprep.mubr.f32.mxu0 %v4572_v34  ;;  %v6115_v34 = vld [vmem:[#allocation68_spill] sm:$0xff] }
 0x15a   : > { %v5104_v61 = vpop.f32.mrb[3].mxu1  ;;  %2979 = vmatmul.mubr.msk.f32.gmra.mrb[108].mxu1 %vm6112_vm13, %v4641_v1  ;;  %vm6116_vm13 = vnez %v6004_v9 }
 0x15b   : > { %2305 = vmatprep.mubr.f32.mxu1 %v3727_v30  ;;  %v3729_v30 = vld [vmem:[%s4082_s9 + $0x68] sm:$0xff] }
 0x15c   : > { %3317 = vmatmul.mubr.msk.f32.gmra.mrb[94].mxu0 %vm6114_vm11, %v4593_v59 }
 0x15d   : > { %v5113_v12 = vpop.f32.mrb[4].mxu1  ;;  %3351 = vmatprep.mubr.f32.mxu0 %v6063_v13 }
 0x15e   : > { %v5116_v24 = vpop.f32.mrb[5].mxu1  ;;  %2306 = vmatmul.mubr.f32.gmra.mrb[110].mxu1 %v6115_v34 }
 0x15f   : > { %2310 = vmatprep.mubr.f32.mxu1 %v3728_v23 }
 0x160   : > { %3352 = vmatmul.mubr.msk.f32.vlgmr.msra.gmra.mrb[96].mxu0 %vm4172_vm2, %v6064_v43  ;;  %v6117_v43 = vld [vmem:[#allocation69_spill] sm:$0xff]  ;;  %vm6118_vm2 = vnez %v6008_v50 }
 0x161   : > { %v5123_v1 = vpop.f32.mrb[6].mxu1  ;;  %3354 = vmatprep.mubr.f32.mxu0 %v6066_v22  ;;  %v3731_v22 = vld [vmem:[%s4082_s9 + $0x78] sm:$0xff] }
 0x162   : > { %v5126_v32 = vpop.f32.mrb[7].mxu1  ;;  %2980 = vmatmul.mubr.msk.f32.gmra.mrb[112].mxu1 %vm6116_vm13, %v4680_v0 }
 0x163   : > { %2315 = vmatprep.mubr.f32.mxu1 %v3729_v30  ;;  %v3736_v30 = vld [vmem:[%s4082_s9 + $0xa0] sm:$0xff] }
 0x164   : > { %3355 = vmatmul.mubr.msk.f32.gmra.mrb[98].mxu0 %vm4199_vm3, %v6067_v48  ;;  %vm6119_vm3 = vnez %v6011_v25  ;;  %v3734_v25 = vld [vmem:[%s4082_s9 + $0x90] sm:$0xff] }
 0x165   : > { %v5135_v34 = vpop.f32.mrb[8].mxu1  ;;  %3357 = vmatprep.mubr.f32.mxu0 %v6069_v57  ;;  %v3732_v57 = vld [vmem:[%s4082_s9 + $0x80] sm:$0xff] }
 0x166   : > { %v5138_v13 = vpop.f32.mrb[9].mxu1  ;;  %2316 = vmatmul.mubr.f32.gmra.mrb[114].mxu1 %v6117_v43  ;;  %v6134_v43 = vld [vmem:[#allocation76_spill] sm:$0xff] }
 0x167   : > { %2320 = vmatprep.mubr.f32.mxu1 %v3730_v3 }
 0x168   : > { %3358 = vmatmul.mubr.msk.f32.gmra.mrb[100].mxu0 %vm4226_vm4, %v6070_v46 }
 0x169   : > { %v5145_v0 = vpop.f32.mrb[10].mxu1  ;;  %3360 = vmatprep.mubr.f32.mxu0 %v6072_v63 }
 0x16a   : > { %v5148_v9 = vpop.f32.mrb[11].mxu1  ;;  %2981 = vmatmul.mubr.msk.f32.gmra.mrb[116].mxu1 %vm6118_vm2, %v4708_v29 }
 0x16b   : > { %2325 = vmatprep.mubr.f32.mxu1 %v3731_v22  ;;  %v3737_v22 = vld [vmem:[%s4082_s9 + $0xa8] sm:$0xff] }
 0x16c   : > { %3361 = vmatmul.mubr.msk.f32.gmra.mrb[102].mxu0 %vm4253_vm5, %v6073_v49  ;;  %vm6125_vm5 = vnez %v6106_v8  ;;  %v6127_v8 = vld [vmem:[#allocation61_spill] sm:$0xff] }
 0x16d   : > { %v5157_v48 = vpop.f32.mrb[12].mxu1  ;;  %3363 = vmatprep.mubr.f32.mxu0 %v6075_v10 }
 0x16e   : > { %v5160_v31 = vpop.f32.mrb[13].mxu1  ;;  %2326 = vmatmul.mubr.f32.gmra.mrb[118].mxu1 %v4725_v11 }
 0x16f   : > { %2330 = vmatprep.mubr.f32.mxu1 %v3732_v57  ;;  %v3738_v57 = vld [vmem:[%s4082_s9 + $0xb0] sm:$0xff] }
 0x170   : > { %3364 = vmatmul.mubr.msk.f32.gmra.mrb[104].mxu0 %vm4280_vm6, %v6076_v37 }
 0x171   : > { %v5167_v29 = vpop.f32.mrb[14].mxu1  ;;  %3366 = vmatprep.mubr.f32.mxu0 %v6078_v27  ;;  %v6120_v27 = vld [vmem:[#allocation70_spill] sm:$0xff] }
 0x172   : > { %v5170_v50 = vpop.f32.mrb[15].mxu1  ;;  %2982 = vmatmul.mubr.msk.f32.gmra.mrb[120].mxu1 %vm6119_vm3, %v4737_v5 }
 0x173   : > { %v1323_v10 = vpop.f32.mrb[0].mxu0  ;;  %2335 = vmatprep.mubr.f32.mxu1 %v3733_v33 }
 0x174   : > { %v5176_v11 = vadd.f32 %v1548_v47, %v1323_v10  ;;  %3367 = vmatmul.mubr.msk.f32.gmra.mrb[106].mxu0 %vm4302_vm7, %v6079_v26  ;;  %v1325_v37 = vpop.f32.mrb[1].mxu0 }
 0x175   : > { %v5181_v46 = vpop.f32.mrb[16].mxu1  ;;  %3369 = vmatprep.mubr.f32.mxu0 %v6081_v21 }
 0x176   : > { %v5184_v39 = vpop.f32.mrb[17].mxu1  ;;  %2336 = vmatmul.mubr.f32.gmra.mrb[122].mxu1 %v4754_v35  ;;  %v6121_v35 = vld [vmem:[#allocation71_spill] sm:$0xff] }
 0x177   : > { %v1328_v5 = vpop.f32.mrb[2].mxu0  ;;  %2340 = vmatprep.mubr.f32.mxu1 %v3734_v25  ;;  %vm6122_vm4 = vnez %v6121_v35 }
 0x178   : > { %v5189_v47 = vadd.f32 %v5093_v2, %v1328_v5  ;;  %3370 = vmatmul.mubr.msk.f32.gmra.mrb[108].mxu0 %vm6084_vm1, %v6082_v44  ;;  %v1330_v63 = vpop.f32.mrb[3].mxu0  ;;  %v6123_v2 = vld [vmem:[#allocation72_spill] sm:$0xff] }
 0x179   : > { %v5194_v49 = vpop.f32.mrb[18].mxu1  ;;  %3372 = vmatprep.mubr.f32.mxu0 %v6085_v14  ;;  %v6130_v63 = vld [vmem:[#allocation75_spill] sm:$0xff] }
 0x17a   : > { %v5197_v17 = vpop.f32.mrb[19].mxu1  ;;  %2983 = vmatmul.mubr.msk.f32.gmra.mrb[124].mxu1 %vm6122_vm4, %v6120_v27  ;;  %vm6131_vm6 = vnez %v6130_v63  ;;  %v6132_v27 = vld [vmem:[#allocation65_spill] sm:$0xff] }
 0x17b   : > { %v1333_v26 = vpop.f32.mrb[4].mxu0  ;;  %2345 = vmatprep.mubr.f32.mxu1 %v3735_v40 }
 0x17c   : > { %v5204_v21 = vadd.f32 %v5104_v61, %v1333_v26  ;;  %3373 = vmatmul.mubr.msk.f32.gmra.mrb[110].mxu0 %vm6089_vm0, %v6087_v62  ;;  %v1335_v44 = vpop.f32.mrb[5].mxu0  ;;  %v3741_v26 = vld [vmem:[%s4082_s9 + $0xc8] sm:$0xff] }
 0x17d   : > { %v5209_v51 = vpop.f32.mrb[20].mxu1  ;;  %3375 = vmatprep.mubr.f32.mxu0 %v6090_v7 }
 0x17e   : > { %v5212_v14 = vpop.f32.mrb[21].mxu1  ;;  %2346 = vmatmul.mubr.f32.gmra.mrb[126].mxu1 %v6123_v2  ;;  %v6133_v2 = vld [vmem:[#allocation63_spill] sm:$0xff] }
 0x17f   : > { %v1338_v23 = vpop.f32.mrb[6].mxu0  ;;  %2350 = vmatprep.mubr.f32.mxu1 %v3736_v30 }
 0x180   : > { %v5217_v61 = vadd.f32 %v5101_v36, %v1338_v23  ;;  %3376 = vmatmul.mubr.msk.f32.gmra.mrb[112].mxu0 %vm6093_vm9, %v6091_v42  ;;  %v1340_v62 = vpop.f32.mrb[7].mxu0 }
 0x181   : > { %v5222_v41 = vpop.f32.mrb[22].mxu1  ;;  %3378 = vmatprep.mubr.f32.mxu0 %v6094_v45 }
 0x182   : > { %v5225_v7 = vpop.f32.mrb[23].mxu1  ;;  %2984 = vmatmul.mubr.msk.f32.gmra.mrb[128].mxu1 %vm4797_vm14, %v4795_v15 }
 0x183   : > { %v1343_v3 = vpop.f32.mrb[8].mxu0  ;;  %2355 = vmatprep.mubr.f32.mxu1 %v3737_v22 }
 0x184   : > { %v5232_v36 = vadd.f32 %v5116_v24, %v1343_v3  ;;  %v1345_v16 = vpop.f32.mrb[9].mxu0  ;;  %3379 = vmatmul.mubr.msk.f32.gmra.mrb[114].mxu0 %vm6098_vm10, %v6096_v19  ;;  %v6135_v3 = vld [vmem:[#allocation59_spill] sm:$0xff] }
 0x185   : > { %v5237_v42 = vpop.f32.mrb[24].mxu1  ;;  %3381 = vmatprep.mubr.f32.mxu0 %v6099_v53  ;;  %v3739_v53 = vld [vmem:[%s4082_s9 + $0xb8] sm:$0xff]  ;;  %v6136_v22 = vrot.slane %v6135_v3, 1  ;;  %v6149_v3 = vld [vmem:[#allocation80_spill] sm:$0xff] }
 0x186   : > { %v5240_v45 = vpop.f32.mrb[25].mxu1  ;;  %2356 = vmatmul.mubr.f32.gmra.mrb[130].mxu1 %v4812_v58 }
 0x187   : > { %v1348_v15 = vpop.f32.mrb[10].mxu0  ;;  %2360 = vmatprep.mubr.f32.mxu1 %v3738_v57  ;;  %v6138_v57 = vld [vmem:[#allocation66_spill] sm:$0xff] }
 0x188   : > { %v5245_v24 = vadd.f32 %v5113_v12, %v1348_v15  ;;  %v1350_v10 = vpop.f32.mrb[11].mxu0  ;;  %3382 = vmatmul.mubr.msk.f32.gmra.mrb[116].mxu0 %vm6102_vm8, %v6100_v18  ;;  %v3742_v15 = vld [vmem:[%s4082_s9 + $0xd0] sm:$0xff] }
 0x189   : > { %v5250_v38 = vpop.f32.mrb[26].mxu1  ;;  %3384 = vmatprep.mubr.f32.mxu0 %v6103_v6  ;;  %v6139_v10 = vld [vmem:[#allocation67_spill] sm:$0xff] }
 0x18a   : > { %v5253_v19 = vpop.f32.mrb[27].mxu1  ;;  %2985 = vmatmul.mubr.msk.f32.gmra.mrb[132].mxu1 %vm4826_vm12, %v4824_v52  ;;  %vm6140_vm8 = vnez %v6139_v10  ;;  %v3746_v10 = vld [vmem:[%s4082_s9 + $0xf0] sm:$0xff] }
 0x18b   : > { %v1353_v58 = vpop.f32.mrb[12].mxu0  ;;  %2365 = vmatprep.mubr.f32.mxu1 %v3739_v53 }
 0x18c   : > { %v5260_v12 = vadd.f32 %v5126_v32, %v1353_v58  ;;  %v1355_v33 = vpop.f32.mrb[13].mxu0  ;;  %3385 = vmatmul.mubr.msk.f32.gmra.mrb[118].mxu0 %vm6125_vm5, %v6105_v60  ;;  %v6141_v58 = vld [vmem:[#allocation64_spill] sm:$0xff] }
 0x18d   : > { %v5265_v54 = vpop.f32.mrb[28].mxu1  ;;  %3387 = vmatprep.mubr.f32.mxu0 %v6108_v20  ;;  %v6128_v20 = vld [vmem:[#allocation11_spill] sm:$0xff]  ;;  %v6142_v53 = vrot.slane %v6141_v58, 1 }
 0x18e   : > { %v5268_v6 = vpop.f32.mrb[29].mxu1  ;;  %2366 = vmatmul.mubr.f32.gmra.mrb[134].mxu1 %v4841_v28  ;;  %v439_v5 = vadd.s32 280, %v6128_v20  ;;  %v6129_v28 = vld [vmem:[#allocation74_spill] sm:$0xff]  ;;  %vm6137_vm7 = vcmp.lt.s32.totalorder %v6128_v20, 7  ;;  %vm6162_vm0 = vcmp.lt.s32.totalorder %v6128_v20, 1 }
 0x18f   : > { %v1358_v52 = vpop.f32.mrb[14].mxu0  ;;  %2370 = vmatprep.mubr.f32.mxu1 %v3740_v56  ;;  %vm6143_vm12 = vmmov %vm6137_vm7 }
 0x190   : > { %v5273_v18 = vadd.f32 %v5123_v1, %v1358_v52  ;;  %v1360_v32 = vpop.f32.mrb[15].mxu0  ;;  %3388 = vmatmul.mubr.msk.f32.gmra.mrb[120].mxu0 %vm6111_vm15, %v6109_v4  ;;  %v367_v1 = vrot.slane %v6132_v27, 1  ;;  %v689_v23 = vand.u32 15, %v439_v5  ;;  %vm6164_vm13 = vmmov %vm6162_vm0 }
 0x191   : > { %v5278_v60 = vpop.f32.mrb[30].mxu1  ;;  %3390 = vmatprep.mubr.f32.mxu0 %v6127_v8  ;;  %v6145_v32 = vld [vmem:[#allocation78_spill] sm:$0xff] }
 0x192   : > { %v5282_v25 = vpop.f32.mrb[31].mxu1  ;;  %2986 = vmatmul.mubr.msk.f32.gmra.mrb[136].mxu1 %vm6131_vm6, %v6129_v28  ;;  %v404_v33 = vsel %vm6143_vm12, %v367_v1, %v6142_v53  ;;  %vm1051_vm14 = vcmp.ne.s32.totalorder %v689_v23, 15  ;;  %vm6146_vm15 = vnez %v6145_v32  ;;  %v3743_v8 = vld [vmem:[%s4082_s9 + $0xd8] sm:$0xff] }
 0x193   : > { %v1363_v35 = vpop.f32.mrb[16].mxu0  ;;  %2375 = vmatprep.mubr.f32.mxu1 %v3741_v26  ;;  %v3747_v32 = vld [vmem:[%s4082_s9 + $0xf8] sm:$0xff] }
 0x194   : > { %v5290_v4 = vadd.f32 %v5138_v13, %v1363_v35  ;;  %v1365_v40 = vpop.f32.mrb[17].mxu0  ;;  %3391 = vmatmul.mubr.msk.f32.gmra.mrb[122].mxu0 %vm6114_vm11, %v4593_v59  ;;  %v369_v13 = vsel %vm6137_vm7, %v6136_v22, %v367_v1  ;;  %v6147_v35 = vld [vmem:[#allocation79_spill] sm:$0xff]  ;;  %vm6150_vm11 = vnez %v6149_v3  ;;  %v3745_v22 = vld [vmem:[%s4082_s9 + $0xe8] sm:$0xff] }
 0x195   : > { %v1773_v44 = vpop.f32.mrb[32].mxu1  ;;  %3393 = vmatprep.mubr.f32.mxu0 %v6133_v2  ;;  %v3744_v40 = vld [vmem:[%s4082_s9 + $0xe0] sm:$0xff] }
 0x196   : > { %v5297_v30 = vadd.f32 %v1773_v44, %v5176_v11  ;;  %v1775_v62 = vpop.f32.mrb[33].mxu1  ;;  %2376 = vmatmul.mubr.f32.gmra.mrb[138].mxu1 %v6134_v43  ;;  %v6148_v43 = vld [vmem:[#allocation46_spill] sm:$0xff] }
 0x197   : > { %v1368_v16 = vpop.f32.mrb[18].mxu0  ;;  %2380 = vmatprep.mubr.f32.mxu1 %v3742_v15 }
 0x198   : > { %v5306_v59 = vadd.f32 %v5135_v34, %v1368_v16  ;;  %v1370_v55 = vpop.f32.mrb[19].mxu0  ;;  %3394 = vmatmul.mubr.msk.f32.gmra.mrb[124].mxu0 %vm6140_vm8, %v6138_v57  ;;  %v6144_v34 = vld [vmem:[#allocation77_spill] sm:$0xff] }
 0x199   : > { %v1778_v11 = vpop.f32.mrb[34].mxu1  ;;  %3396 = vmatprep.mubr.f32.mxu0 %v369_v13 }
 0x19a   : > { %v5316_v52 = vadd.f32 %v1778_v11, %v5189_v47  ;;  %v1780_v56 = vpop.f32.mrb[35].mxu1  ;;  %2987 = vmatmul.mubr.msk.f32.gmra.mrb[140].mxu1 %vm6146_vm15, %v6144_v34  ;;  %v6153_v34 = vld [vmem:[#allocation81_spill] sm:$0xff] }
 0x19b   : > { %v1373_v37 = vpop.f32.mrb[20].mxu0  ;;  %2385 = vmatprep.mubr.f32.mxu1 %v3743_v8  ;;  %v6152_v56 = vld [vmem:[#allocation50_spill] sm:$0xff]  ;;  %vm6154_vm10 = vnez %v6153_v34 }
 0x19c   : > { %v5323_v5 = vadd.f32 %v5148_v9, %v1373_v37  ;;  %v1375_v28 = vpop.f32.mrb[21].mxu0  ;;  %3397 = vmatmul.mubr.msk.f32.gmra.mrb[126].mxu0 %vm1051_vm14, %v404_v33 }
 0x19d   : > { %v1783_v63 = vpop.f32.mrb[36].mxu1 }
 0x19e   : > { %v5326_v1 = vadd.f32 %v1783_v63, %v5204_v21  ;;  %v1785_v47 = vpop.f32.mrb[37].mxu1  ;;  %2386 = vmatmul.mubr.f32.gmra.mrb[142].mxu1 %v6147_v35  ;;  %v6155_v63 = vld [vmem:[#allocation52_spill] sm:$0xff]  ;;  %v3748_v35 = vld [vmem:[%s4082_s9 + $0x100] sm:$0xff] }
 0x19f   : > { %v1378_v26 = vpop.f32.mrb[22].mxu0  ;;  %2390 = vmatprep.mubr.f32.mxu1 %v3744_v40 }
 0x1a0   : > { %v5331_v44 = vadd.f32 %v5145_v0, %v1378_v26  ;;  %v1380_v2 = vpop.f32.mrb[23].mxu0  ;;  %v438_v26 = vadd.s32 272, %v6128_v20 }
 0x1a1   : > { %v1788_v9 = vpop.f32.mrb[38].mxu1 }
 0x1a2   : > { %v5334_v23 = vadd.f32 %v1788_v9, %v5217_v61  ;;  %v1790_v62 = vpop.f32.mrb[39].mxu1  ;;  %2988 = vmatmul.mubr.msk.f32.gmra.mrb[144].mxu1 %vm6150_vm11, %v6148_v43  ;;  %v6151_v61 = vld [vmem:[#allocation47_spill] sm:$0xff]  ;;  %v6157_v43 = vld [vmem:[#allocation82_spill] sm:$0xff] }
 0x1a3   : > { %v1383_v21 = vpop.f32.mrb[24].mxu0  ;;  %2395 = vmatprep.mubr.f32.mxu1 %v3745_v22  ;;  %vm6158_vm1 = vnez %v6157_v43  ;;  %v3750_v22 = vld [vmem:[%s4082_s9 + $0x110] sm:$0xff] }
 0x1a4   : > { %v5341_v13 = vadd.f32 %v5160_v31, %v1383_v21  ;;  %v1385_v0 = vpop.f32.mrb[25].mxu0  ;;  %v3749_v21 = vld [vmem:[%s4082_s9 + $0x108] sm:$0xff] }
 0x1a5   : > { %v1793_v16 = vpop.f32.mrb[40].mxu1  ;;  %v291_v0 = vrot.slane %v3750_v22, 7 }
 0x1a6   : > { %v5344_v15 = vadd.f32 %v1793_v16, %v5232_v36  ;;  %v1795_v55 = vpop.f32.mrb[41].mxu1  ;;  %2396 = vmatmul.mubr.f32.gmra.mrb[146].mxu1 %v6151_v61  ;;  %v682_v16 = vand.u32 15, %v438_v26 }
 0x1a7   : > { %v1388_v57 = vpop.f32.mrb[26].mxu0  ;;  %2400 = vmatprep.mubr.f32.mxu1 %v3746_v10  ;;  %v6159_v10 = vld [vmem:[#allocation83_spill] sm:$0xff] }
 0x1a8   : > { %v5349_v11 = vadd.f32 %v5157_v48, %v1388_v57  ;;  %v1390_v58 = vpop.f32.mrb[27].mxu0  ;;  %vm906_vm9 = vcmp.ne.s32.totalorder %v682_v16, 0 }
 0x1a9   : > { %v1798_v53 = vpop.f32.mrb[42].mxu1 }
 0x1aa   : > { %v5352_v31 = vadd.f32 %v1798_v53, %v5245_v24  ;;  %v1800_v33 = vpop.f32.mrb[43].mxu1  ;;  %2989 = vmatmul.mubr.msk.f32.gmra.mrb[148].mxu1 %vm6154_vm10, %v6152_v56  ;;  %v6160_v53 = vld [vmem:[#allocation57_spill] sm:$0xff] }
 0x1ab   : > { %v1393_v36 = vpop.f32.mrb[28].mxu0  ;;  %2405 = vmatprep.mubr.f32.mxu1 %v3747_v32  ;;  %v6161_v33 = vrot.slane %v6160_v53, 7 }
 0x1ac   : > { %v5359_v37 = vadd.f32 %v5170_v50, %v1393_v36  ;;  %v1395_v8 = vpop.f32.mrb[29].mxu0 }
 0x1ad   : > { %v1803_v48 = vpop.f32.mrb[44].mxu1  ;;  %v297_v56 = vsel %vm6162_vm0, %v6161_v33, %v291_v0 }
 0x1ae   : > { %v5362_v28 = vadd.f32 %v1803_v48, %v5260_v12  ;;  %v1805_v24 = vpop.f32.mrb[45].mxu1  ;;  %2406 = vmatmul.mubr.f32.gmra.mrb[150].mxu1 %v6155_v63  ;;  %v6156_v12 = vld [vmem:[#allocation56_spill] sm:$0xff]  ;;  %v3751_v48 = vld [vmem:[%s4082_s9 + $0x118] sm:$0xff] }
 0x1af   : > { %v1398_v47 = vpop.f32.mrb[30].mxu0  ;;  %2410 = vmatprep.mubr.f32.mxu1 %v3748_v35  ;;  %v6163_v24 = vrot.slane %v6132_v27, 7 }
 0x1b0   : > { %v5368_v40 = vadd.f32 %v5167_v29, %v1398_v47  ;;  %v1400_v50 = vpop.f32.mrb[31].mxu0 }
 0x1b1   : > { %v1808_v2 = vpop.f32.mrb[46].mxu1  ;;  %v296_v63 = vsel %vm6164_vm13, %v291_v0, %v6163_v24 }
 0x1b2   : > { %v5371_v9 = vadd.f32 %v1808_v2, %v5273_v18  ;;  %v1810_v62 = vpop.f32.mrb[47].mxu1  ;;  %2990 = vmatmul.mubr.msk.f32.gmra.mrb[152].mxu1 %vm6158_vm1, %v6156_v12 }
 0x1b3   : > { %v1403_v3 = vpop.f32.mrb[32].mxu0  ;;  %2415 = vmatprep.mubr.f32.mxu1 %v3749_v21 }
 0x1b4   : > { %v1629_v55 = vadd.f32 %v5184_v39, %v1403_v3  ;;  %v1405_v29 = vpop.f32.mrb[33].mxu0 }
 0x1b5   : > { %v1813_v61 = vpop.f32.mrb[48].mxu1 }
 0x1b6   : > { %v5380_v57 = vadd.f32 %v1813_v61, %v5290_v4  ;;  %v1815_v18 = vpop.f32.mrb[49].mxu1  ;;  %2416 = vmatmul.mubr.f32.gmra.mrb[154].mxu1 %v6159_v10 }
 0x1b7   : > { %v1408_v58 = vpop.f32.mrb[34].mxu0  ;;  %2420 = vmatprep.mubr.f32.mxu1 %v3750_v22 }
 0x1b8   : > { %v1634_v34 = vadd.f32 %v5181_v46, %v1408_v58  ;;  %v1410_v39 = vpop.f32.mrb[35].mxu0 }
 0x1b9   : > { %v1818_v36 = vpop.f32.mrb[50].mxu1 }
 0x1ba   : > { %v5389_v32 = vadd.f32 %v1818_v36, %v5306_v59  ;;  %v1820_v4 = vpop.f32.mrb[51].mxu1  ;;  %2991 = vmatmul.mubr.msk.f32.gmra.mrb[156].mxu1 %vm906_vm9, %v297_v56 }
 0x1bb   : > { %v1413_v8 = vpop.f32.mrb[36].mxu0  ;;  %2425 = vmatprep.mubr.f32.mxu1 %v3751_v48 }
 0x1bc   : > { %v1639_v47 = vadd.f32 %v5197_v17, %v1413_v8  ;;  %v1415_v35 = vpop.f32.mrb[37].mxu0 }
 0x1bd   : > { %v1823_v26 = vpop.f32.mrb[52].mxu1 }
 0x1be   : > { %v5398_v46 = vadd.f32 %v1823_v26, %v5323_v5  ;;  %v1825_v50 = vpop.f32.mrb[53].mxu1  ;;  %2426 = vmatmul.mubr.f32.gmra.mrb[158].mxu1 %v296_v63 }
 0x1bf   : > { %v1418_v59 = vpop.f32.mrb[38].mxu0 }
 0x1c0   : > { %v1644_v2 = vadd.f32 %v5194_v49, %v1418_v59  ;;  %v1420_v62 = vpop.f32.mrb[39].mxu0 }
 0x1c1   : > { %v1828_v12 = vpop.f32.mrb[54].mxu1 }
 0x1c2   : > { %v5402_v43 = vadd.f32 %v1828_v12, %v5331_v44  ;;  %v1830_v27 = vpop.f32.mrb[55].mxu1 }
 0x1c3   : > { %v1423_v20 = vpop.f32.mrb[40].mxu0 }
 0x1c4   : > { %v1649_v3 = vadd.f32 %v5212_v14, %v1423_v20  ;;  %v1425_v17 = vpop.f32.mrb[41].mxu0 }
 0x1c5   : > { %v1833_v21 = vpop.f32.mrb[56].mxu1 }
 0x1c6   : > { %v5406_v22 = vadd.f32 %v1833_v21, %v5341_v13  ;;  %v1835_v5 = vpop.f32.mrb[57].mxu1 }
 0x1c7   : > { %v1428_v0 = vpop.f32.mrb[42].mxu0 }
 0x1c8   : > { %v1654_v16 = vadd.f32 %v5209_v51, %v1428_v0  ;;  %v1430_v29 = vpop.f32.mrb[43].mxu0 }
 0x1c9   : > { %v1838_v49 = vpop.f32.mrb[58].mxu1 }
 0x1ca   : > { %v5410_v61 = vadd.f32 %v1838_v49, %v5349_v11  ;;  %v1840_v44 = vpop.f32.mrb[59].mxu1 }
 0x1cb   : > { %v1433_v18 = vpop.f32.mrb[44].mxu0 }
 0x1cc   : > { %v1659_v10 = vadd.f32 %v5225_v7, %v1433_v18  ;;  %v1435_v58 = vpop.f32.mrb[45].mxu0 }
 0x1cd   : > { %v1843_v14 = vpop.f32.mrb[60].mxu1 }
 0x1ce   : > { %v5414_v53 = vadd.f32 %v1843_v14, %v5359_v37  ;;  %v1845_v13 = vpop.f32.mrb[61].mxu1 }
 0x1cf   : > { %v1438_v33 = vpop.f32.mrb[46].mxu0 }
 0x1d0   : > { %v1664_v56 = vadd.f32 %v5222_v41, %v1438_v33  ;;  %v1440_v39 = vpop.f32.mrb[47].mxu0 }
 0x1d1   : > { %v1848_v51 = vpop.f32.mrb[62].mxu1 }
 0x1d2   : > { %v5418_v36 = vadd.f32 %v1848_v51, %v5368_v40  ;;  %v1850_v11 = vpop.f32.mrb[63].mxu1 }
 0x1d3   : > { %v1443_v4 = vpop.f32.mrb[48].mxu0 }
 0x1d4   : > { %v1669_v8 = vadd.f32 %v5240_v45, %v1443_v4  ;;  %v1445_v48 = vpop.f32.mrb[49].mxu0 }
 0x1d5   : > { %v1853_v7 = vpop.f32.mrb[64].mxu1 }
 0x1d6   : > { %v5421_v24 = vadd.f32 %v1853_v7, %v1629_v55  ;;  %v1855_v63 = vpop.f32.mrb[65].mxu1 }
 0x1d7   : > { %v1448_v37 = vpop.f32.mrb[50].mxu0 }
 0x1d8   : > { %v1674_v35 = vadd.f32 %v5237_v42, %v1448_v37  ;;  %v1450_v26 = vpop.f32.mrb[51].mxu0 }
 0x1d9   : > { %v1858_v50 = vpop.f32.mrb[66].mxu1 }
 0x1da   : > { %v5424_v41 = vadd.f32 %v1858_v50, %v1634_v34  ;;  %v1860_v59 = vpop.f32.mrb[67].mxu1 }
 0x1db   : > { %v1453_v62 = vpop.f32.mrb[52].mxu0 }
 0x1dc   : > { %v1679_v40 = vadd.f32 %v5253_v19, %v1453_v62  ;;  %v1455_v12 = vpop.f32.mrb[53].mxu0 }
 0x1dd   : > { %v1863_v27 = vpop.f32.mrb[68].mxu1 }
 0x1de   : > { %v5427_v20 = vadd.f32 %v1863_v27, %v1639_v47  ;;  %v1865_v45 = vpop.f32.mrb[69].mxu1 }
 0x1df   : > { %v1458_v17 = vpop.f32.mrb[54].mxu0 }
 0x1e0   : > { %v1684_v55 = vadd.f32 %v5250_v38, %v1458_v17  ;;  %v1460_v21 = vpop.f32.mrb[55].mxu0 }
 0x1e1   : > { %v1868_v5 = vpop.f32.mrb[70].mxu1 }
 0x1e2   : > { %v5430_v0 = vadd.f32 %v1868_v5, %v1644_v2  ;;  %v1870_v42 = vpop.f32.mrb[71].mxu1 }
 0x1e3   : > { %v1463_v29 = vpop.f32.mrb[56].mxu0 }
 0x1e4   : > { %v1689_v34 = vadd.f32 %v5268_v6, %v1463_v29  ;;  %v1465_v49 = vpop.f32.mrb[57].mxu0 }
 0x1e5   : > { %v1873_v44 = vpop.f32.mrb[72].mxu1 }
 0x1e6   : > { %v5433_v18 = vadd.f32 %v1873_v44, %v1649_v3  ;;  %v1875_v19 = vpop.f32.mrb[73].mxu1 }
 0x1e7   : > { %v1468_v58 = vpop.f32.mrb[58].mxu0 }
 0x1e8   : > { %v1694_v47 = vadd.f32 %v5265_v54, %v1468_v58  ;;  %v1470_v14 = vpop.f32.mrb[59].mxu0 }
 0x1e9   : > { %v1878_v13 = vpop.f32.mrb[74].mxu1 }
 0x1ea   : > { %v5436_v33 = vadd.f32 %v1878_v13, %v1654_v16  ;;  %v1880_v38 = vpop.f32.mrb[75].mxu1 }
 0x1eb   : > { %v1473_v39 = vpop.f32.mrb[60].mxu0 }
 0x1ec   : > { %v1699_v2 = vadd.f32 %v5282_v25, %v1473_v39  ;;  %v1475_v51 = vpop.f32.mrb[61].mxu0 }
 0x1ed   : > { %v1883_v11 = vpop.f32.mrb[76].mxu1 }
 0x1ee   : > { %v5439_v4 = vadd.f32 %v1883_v11, %v1659_v10  ;;  %v1885_v6 = vpop.f32.mrb[77].mxu1 }
 0x1ef   : > { %v1478_v48 = vpop.f32.mrb[62].mxu0 }
 0x1f0   : > { %v1704_v3 = vadd.f32 %v5278_v60, %v1478_v48  ;;  %v1480_v7 = vpop.f32.mrb[63].mxu0 }
 0x1f1   : > { %v1888_v63 = vpop.f32.mrb[78].mxu1 }
 0x1f2   : > { %v5442_v37 = vadd.f32 %v1888_v63, %v1664_v56  ;;  %v1890_v54 = vpop.f32.mrb[79].mxu1 }
 0x1f3   : > { %v3273_v26 = vpop.f32.mrb[64].mxu0 }
 0x1f4   : > { %v5445_v16 = vadd.f32 %v3273_v26, %v5316_v52  ;;  %v1998_v50 = vpop.f32.mrb[65].mxu0 }
 0x1f5   : > { %v1893_v59 = vpop.f32.mrb[80].mxu1  ;;  %v5448_v25 = vadd.f32 %v1998_v50, %v5297_v30 }
 0x1f6   : > { %v5450_v10 = vadd.f32 %v1893_v59, %v1669_v8  ;;  %v1895_v62 = vpop.f32.mrb[81].mxu1 }
 0x1f7   : > { %v3276_v12 = vpop.f32.mrb[66].mxu0 }
 0x1f8   : > { %v5453_v60 = vadd.f32 %v3276_v12, %v5334_v23  ;;  %v2008_v27 = vpop.f32.mrb[67].mxu0 }
 0x1f9   : > { %v1898_v56 = vpop.f32.mrb[82].mxu1  ;;  %v5456_v45 = vadd.f32 %v2008_v27, %v5326_v1 }
 0x1fa   : > { %v5458_v17 = vadd.f32 %v1898_v56, %v1674_v35  ;;  %v1900_v52 = vpop.f32.mrb[83].mxu1 }
 0x1fb   : > { %v3279_v21 = vpop.f32.mrb[68].mxu0 }
 0x1fc   : > { %v5461_v5 = vadd.f32 %v3279_v21, %v5352_v31  ;;  %v2018_v30 = vpop.f32.mrb[69].mxu0 }
 0x1fd   : > { %v1903_v8 = vpop.f32.mrb[84].mxu1  ;;  %v5464_v42 = vadd.f32 %v2018_v30, %v5344_v15 }
 0x1fe   : > { %v5466_v29 = vadd.f32 %v1903_v8, %v1679_v40  ;;  %v1905_v23 = vpop.f32.mrb[85].mxu1 }
 0x1ff   : > { %v3282_v49 = vpop.f32.mrb[70].mxu0 }
 0x200   : > { %v5469_v44 = vadd.f32 %v3282_v49, %v5371_v9  ;;  %v2028_v1 = vpop.f32.mrb[71].mxu0 }
 0x201   : > { %v1908_v35 = vpop.f32.mrb[86].mxu1  ;;  %v5472_v19 = vadd.f32 %v2028_v1, %v5362_v28 }
 0x202   : > { %v1909_v58 = vadd.f32 %v1908_v35, %v1684_v55  ;;  %v1910_v31 = vpop.f32.mrb[87].mxu1 }
 0x203   : > { %v3285_v14 = vpop.f32.mrb[72].mxu0 }
 0x204   : > { %v5475_v13 = vadd.f32 %v3285_v14, %v5389_v32  ;;  %v2038_v15 = vpop.f32.mrb[73].mxu0 }
 0x205   : > { %v1913_v38 = vpop.f32.mrb[88].mxu1  ;;  %v5478_v40 = vadd.f32 %v2038_v15, %v5380_v57 }
 0x206   : > { %v1914_v39 = vadd.f32 %v1913_v38, %v1689_v34  ;;  %v1915_v51 = vpop.f32.mrb[89].mxu1 }
 0x207   : > { %v3288_v9 = vpop.f32.mrb[74].mxu0 }
 0x208   : > { %v5481_v11 = vadd.f32 %v3288_v9, %v5402_v43  ;;  %v2048_v6 = vpop.f32.mrb[75].mxu0 }
 0x209   : > { %v1918_v28 = vpop.f32.mrb[90].mxu1  ;;  %v5484_v55 = vadd.f32 %v2048_v6, %v5398_v46 }
 0x20a   : > { %v1919_v48 = vadd.f32 %v1918_v28, %v1694_v47  ;;  %v1920_v7 = vpop.f32.mrb[91].mxu1 }
 0x20b   : > { %v3291_v32 = vpop.f32.mrb[76].mxu0 }
 0x20c   : > { %v5487_v63 = vadd.f32 %v3291_v32, %v5410_v61  ;;  %v2058_v54 = vpop.f32.mrb[77].mxu0 }
 0x20d   : > { %v1923_v57 = vpop.f32.mrb[92].mxu1  ;;  %v5490_v34 = vadd.f32 %v2058_v54, %v5406_v22 }
 0x20e   : > { %v1924_v26 = vadd.f32 %v1923_v57, %v1699_v2  ;;  %v1925_v50 = vpop.f32.mrb[93].mxu1 }
 0x20f   : > { %v3294_v43 = vpop.f32.mrb[78].mxu0 }
 0x210   : > { %v5493_v59 = vadd.f32 %v3294_v43, %v5418_v36  ;;  %v2068_v62 = vpop.f32.mrb[79].mxu0 }
 0x211   : > { %v1928_v46 = vpop.f32.mrb[94].mxu1  ;;  %v5496_v47 = vadd.f32 %v2068_v62, %v5414_v53 }
 0x212   : > { %v1929_v12 = vadd.f32 %v1928_v46, %v1704_v3  ;;  %v1930_v27 = vpop.f32.mrb[95].mxu1 }
 0x213   : > { %v3297_v61 = vpop.f32.mrb[80].mxu0 }
 0x214   : > { %v5499_v56 = vadd.f32 %v3297_v61, %v5424_v41  ;;  %v2078_v52 = vpop.f32.mrb[81].mxu0 }
 0x215   : > { %v5502_v22 = vadd.f32 %v2078_v52, %v5421_v24  ;;  %v2272_v2 = vpop.f32.mrb[96].mxu1 }
 0x216   : > { %v2274_v21 = vpop.f32.mrb[97].mxu1 }
 0x217   : > { %v3300_v30 = vpop.f32.mrb[82].mxu0 }
 0x218   : > { %v5505_v36 = vadd.f32 %v3300_v30, %v5430_v0  ;;  %v2088_v8 = vpop.f32.mrb[83].mxu0 }
 0x219   : > { %v5508_v53 = vadd.f32 %v2088_v8, %v5427_v20  ;;  %v2277_v3 = vpop.f32.mrb[98].mxu1 }
 0x21a   : > { %v2279_v23 = vpop.f32.mrb[99].mxu1 }
 0x21b   : > { %v3303_v49 = vpop.f32.mrb[84].mxu0 }
 0x21c   : > { %v5511_v41 = vadd.f32 %v3303_v49, %v5436_v33  ;;  %v2098_v1 = vpop.f32.mrb[85].mxu0 }
 0x21d   : > { %v5514_v24 = vadd.f32 %v2098_v1, %v5433_v18  ;;  %v2282_v35 = vpop.f32.mrb[100].mxu1 }
 0x21e   : > { %v2284_v31 = vpop.f32.mrb[101].mxu1 }
 0x21f   : > { %v3306_v14 = vpop.f32.mrb[86].mxu0 }
 0x220   : > { %v5517_v0 = vadd.f32 %v3306_v14, %v5442_v37  ;;  %v2108_v15 = vpop.f32.mrb[87].mxu0 }
 0x221   : > { %v5520_v20 = vadd.f32 %v2108_v15, %v5439_v4  ;;  %v2287_v38 = vpop.f32.mrb[102].mxu1 }
 0x222   : > { %v2289_v51 = vpop.f32.mrb[103].mxu1 }
 0x223   : > { %v3309_v9 = vpop.f32.mrb[88].mxu0 }
 0x224   : > { %v5523_v33 = vadd.f32 %v3309_v9, %v5458_v17  ;;  %v2118_v6 = vpop.f32.mrb[89].mxu0 }
 0x225   : > { %v5526_v18 = vadd.f32 %v2118_v6, %v5450_v10  ;;  %v2292_v28 = vpop.f32.mrb[104].mxu1 }
 0x226   : > { %v2294_v7 = vpop.f32.mrb[105].mxu1 }
 0x227   : > { %v3312_v32 = vpop.f32.mrb[90].mxu0 }
 0x228   : > { %v5528_v54 = vadd.f32 %v3312_v32, %v1909_v58  ;;  %v2128_v37 = vpop.f32.mrb[91].mxu0 }
 0x229   : > { %v5531_v57 = vadd.f32 %v2128_v37, %v5466_v29  ;;  %v2297_v4 = vpop.f32.mrb[106].mxu1 }
 0x22a   : > { %v2299_v50 = vpop.f32.mrb[107].mxu1 }
 0x22b   : > { %v3315_v43 = vpop.f32.mrb[92].mxu0 }
 0x22c   : > { %v5533_v62 = vadd.f32 %v3315_v43, %v1919_v48  ;;  %v2138_v17 = vpop.f32.mrb[93].mxu0  ;;  %v5544_v48 = vld [vmem:[%s5706_s2] ss:$0 sm:$0xff] }
 0x22d   : > { %v5535_v46 = vadd.f32 %v2138_v17, %v1914_v39  ;;  %v2302_v10 = vpop.f32.mrb[108].mxu1 }
 0x22e   : > { %v2304_v27 = vpop.f32.mrb[109].mxu1 }
 0x22f   : > { %v3318_v61 = vpop.f32.mrb[94].mxu0 }
 0x230   : > { %v5537_v52 = vadd.f32 %v3318_v61, %v1929_v12  ;;  %v2148_v58 = vpop.f32.mrb[95].mxu0 }
 0x231   : > { %v5539_v21 = vadd.f32 %v2148_v58, %v1924_v26  ;;  %v2307_v30 = vpop.f32.mrb[110].mxu1 }
 0x232   : > { %v2309_v29 = vpop.f32.mrb[111].mxu1 }
 0x233   : > { %v3353_v8 = vpop.f32.mrb[96].mxu0 }
 0x234   : > { %v2503_v23 = vadd.f32 %v3353_v8, %v2277_v3  ;;  %v2497_v49 = vpop.f32.mrb[97].mxu0 }
 0x235   : > { %v2312_v39 = vpop.f32.mrb[112].mxu1  ;;  %v2498_v1 = vadd.f32 %v2497_v49, %v2272_v2 }
 0x236   : > { %v2657_v31 = vadd.f32 %v2503_v23, %v5445_v16  ;;  %v2314_v12 = vpop.f32.mrb[113].mxu1 }
 0x237   : > { %v2656_v14 = vadd.f32 %v2498_v1, %v5448_v25  ;;  %v3356_v26 = vpop.f32.mrb[98].mxu0 }
 0x238   : > { %v2696_v15 = vadd.f32 %v5544_v48, %v2657_v31  ;;  %v2513_v51 = vadd.f32 %v3356_v26, %v2287_v38  ;;  %v2507_v9 = vpop.f32.mrb[99].mxu0 }
 0x239   : > { %v2695_v3 = vadd.f32 %v5544_v48, %v2656_v14  ;;  %v2317_v6 = vpop.f32.mrb[114].mxu1  ;;  %v2508_v7 = vadd.f32 %v2507_v9, %v2282_v35 }
 0x23a   : > { %v2728_v32 = vmax.f32 %v2696_v15, 0.0  ;;  %v2659_v37 = vadd.f32 %v2513_v51, %v5453_v60  ;;  %v2319_v50 = vpop.f32.mrb[115].mxu1 }
 0x23b   : > { %v2727_v2 = vmax.f32 %v2695_v3, 0.0  ;;  %v2658_v43 = vadd.f32 %v2508_v7, %v5456_v45  ;;  %v3359_v16 = vpop.f32.mrb[100].mxu0 }
 0x23c   : > { %2760 = vst [vmem:[%s5553_s10 + $0x8] sm:$0xff] %v2728_v32  ;;  %v2698_v25 = vadd.f32 %v5544_v48, %v2659_v37  ;;  %v2523_v38 = vadd.f32 %v3359_v16, %v2297_v4  ;;  %v2517_v17 = vpop.f32.mrb[101].mxu0 }
 0x23d   : > { %2759 = vst [vmem:[%s5553_s10] sm:$0xff] %v2727_v2  ;;  %v2697_v35 = vadd.f32 %v5544_v48, %v2658_v43  ;;  %v2322_v60 = vpop.f32.mrb[116].mxu1  ;;  %v2518_v27 = vadd.f32 %v2517_v17, %v2292_v28 }
 0x23e   : > { %v2730_v61 = vmax.f32 %v2698_v25, 0.0  ;;  %v2661_v45 = vadd.f32 %v2523_v38, %v5461_v5  ;;  %v2324_v58 = vpop.f32.mrb[117].mxu1 }
 0x23f   : > { %v2729_v29 = vmax.f32 %v2697_v35, 0.0  ;;  %v2660_v8 = vadd.f32 %v2518_v27, %v5464_v42  ;;  %v3362_v23 = vpop.f32.mrb[102].mxu0 }
 0x240   : > { %2762 = vst [vmem:[%s5553_s10 + $0x18] sm:$0xff] %v2730_v61  ;;  %v2700_v49 = vadd.f32 %v5544_v48, %v2661_v45  ;;  %v2533_v4 = vadd.f32 %v3362_v23, %v2307_v30  ;;  %v2527_v1 = vpop.f32.mrb[103].mxu0 }
 0x241   : > { %2761 = vst [vmem:[%s5553_s10 + $0x10] sm:$0xff] %v2729_v29  ;;  %v2699_v31 = vadd.f32 %v5544_v48, %v2660_v8  ;;  %v2327_v12 = vpop.f32.mrb[118].mxu1  ;;  %v2528_v28 = vadd.f32 %v2527_v1, %v2302_v10 }
 0x242   : > { %v2732_v14 = vmax.f32 %v2700_v49, 0.0  ;;  %v2663_v5 = vadd.f32 %v2533_v4, %v5469_v44  ;;  %v2329_v26 = vpop.f32.mrb[119].mxu1 }
 0x243   : > { %v2731_v15 = vmax.f32 %v2699_v31, 0.0  ;;  %v2662_v42 = vadd.f32 %v2528_v28, %v5472_v19  ;;  %v3365_v51 = vpop.f32.mrb[104].mxu0 }
 0x244   : > { %2764 = vst [vmem:[%s5553_s10 + $0x28] sm:$0xff] %v2732_v14  ;;  %v2702_v9 = vadd.f32 %v5544_v48, %v2663_v5  ;;  %v2543_v30 = vadd.f32 %v3365_v51, %v2317_v6  ;;  %v2537_v3 = vpop.f32.mrb[105].mxu0 }
 0x245   : > { %2763 = vst [vmem:[%s5553_s10 + $0x20] sm:$0xff] %v2731_v15  ;;  %v2701_v7 = vadd.f32 %v5544_v48, %v2662_v42  ;;  %v2332_v32 = vpop.f32.mrb[120].mxu1  ;;  %v2538_v10 = vadd.f32 %v2537_v3, %v2312_v39 }
 0x246   : > { %v2734_v37 = vmax.f32 %v2702_v9, 0.0  ;;  %v2665_v44 = vadd.f32 %v2543_v30, %v5475_v13  ;;  %v2334_v50 = vpop.f32.mrb[121].mxu1 }
 0x247   : > { %v2733_v2 = vmax.f32 %v2701_v7, 0.0  ;;  %v2664_v19 = vadd.f32 %v2538_v10, %v5478_v40  ;;  %v3368_v43 = vpop.f32.mrb[106].mxu0 }
 0x248   : > { %2766 = vst [vmem:[%s5553_s10 + $0x38] sm:$0xff] %v2734_v37  ;;  %v2704_v16 = vadd.f32 %v5544_v48, %v2665_v44  ;;  %v2553_v6 = vadd.f32 %v3368_v43, %v2327_v12  ;;  %v2547_v25 = vpop.f32.mrb[107].mxu0 }
 0x249   : > { %2765 = vst [vmem:[%s5553_s10 + $0x30] sm:$0xff] %v2733_v2  ;;  %v2703_v38 = vadd.f32 %v5544_v48, %v2664_v19  ;;  %v2337_v17 = vpop.f32.mrb[122].mxu1  ;;  %v2548_v39 = vadd.f32 %v2547_v25, %v2322_v60 }
 0x24a   : > { %v2736_v35 = vmax.f32 %v2704_v16, 0.0  ;;  %v2667_v13 = vadd.f32 %v2553_v6, %v5481_v11  ;;  %v2339_v27 = vpop.f32.mrb[123].mxu1 }
 0x24b   : > { %v2735_v61 = vmax.f32 %v2703_v38, 0.0  ;;  %v2666_v40 = vadd.f32 %v2548_v39, %v5484_v55  ;;  %v3371_v45 = vpop.f32.mrb[108].mxu0 }
 0x24c   : > { %2768 = vst [vmem:[%s5553_s10 + $0x48] sm:$0xff] %v2736_v35  ;;  %v2706_v58 = vadd.f32 %v5544_v48, %v2667_v13  ;;  %v2563_v29 = vadd.f32 %v3371_v45, %v2337_v17  ;;  %v2557_v8 = vpop.f32.mrb[109].mxu0 }
 0x24d   : > { %2767 = vst [vmem:[%s5553_s10 + $0x40] sm:$0xff] %v2735_v61  ;;  %v2705_v23 = vadd.f32 %v5544_v48, %v2666_v40  ;;  %v2342_v49 = vpop.f32.mrb[124].mxu1  ;;  %v2558_v60 = vadd.f32 %v2557_v8, %v2332_v32 }
 0x24e   : > { %v2738_v4 = vmax.f32 %v2706_v58, 0.0  ;;  %v2669_v11 = vadd.f32 %v2563_v29, %v5487_v63  ;;  %v2344_v1 = vpop.f32.mrb[125].mxu1 }
 0x24f   : > { %v2737_v31 = vmax.f32 %v2705_v23, 0.0  ;;  %v2668_v55 = vadd.f32 %v2558_v60, %v5490_v34  ;;  %v3374_v12 = vpop.f32.mrb[110].mxu0 }
 0x250   : > { %2770 = vst [vmem:[%s5553_s10 + $0x58] sm:$0xff] %v2738_v4  ;;  %v2708_v28 = vadd.f32 %v5544_v48, %v2669_v11  ;;  %v2567_v14 = vpop.f32.mrb[111].mxu0 }
 0x251   : > { %2769 = vst [vmem:[%s5553_s10 + $0x50] sm:$0xff] %v2737_v31  ;;  %v2707_v5 = vadd.f32 %v5544_v48, %v2668_v55  ;;  %v2347_v26 = vpop.f32.mrb[126].mxu1  ;;  %v2568_v15 = vadd.f32 %v2567_v14, %v2342_v49 }
 0x252   : > { %v2740_v42 = vmax.f32 %v2708_v28, 0.0  ;;  %v2573_v51 = vadd.f32 %v3374_v12, %v2347_v26  ;;  %v2349_v9 = vpop.f32.mrb[127].mxu1 }
 0x253   : > { %v2739_v63 = vmax.f32 %v2707_v5, 0.0  ;;  %v2670_v30 = vadd.f32 %v2568_v15, %v5496_v47  ;;  %v3377_v3 = vpop.f32.mrb[112].mxu0 }
 0x254   : > { %2772 = vst [vmem:[%s5553_s10 + $0x68] sm:$0xff] %v2740_v42  ;;  %v2671_v34 = vadd.f32 %v2573_v51, %v5493_v59  ;;  %v2577_v7 = vpop.f32.mrb[113].mxu0 }
 0x255   : > { %2771 = vst [vmem:[%s5553_s10 + $0x60] sm:$0xff] %v2739_v63  ;;  %v2709_v32 = vadd.f32 %v5544_v48, %v2670_v30  ;;  %v2352_v10 = vpop.f32.mrb[128].mxu1 }
 0x256   : > { %v2710_v37 = vadd.f32 %v5544_v48, %v2671_v34  ;;  %v2578_v44 = vadd.f32 %v2577_v7, %v2352_v10  ;;  %v2354_v50 = vpop.f32.mrb[129].mxu1 }
 0x257   : > { %v2741_v2 = vmax.f32 %v2709_v32, 0.0  ;;  %v3380_v19 = vpop.f32.mrb[114].mxu0 }
 0x258   : > { %v2742_v43 = vmax.f32 %v2710_v37, 0.0  ;;  %v2672_v47 = vadd.f32 %v2578_v44, %v5502_v22  ;;  %v2587_v16 = vpop.f32.mrb[115].mxu0 }
 0x259   : > { %2773 = vst [vmem:[%s5553_s10 + $0x70] sm:$0xff] %v2741_v2  ;;  %v2357_v6 = vpop.f32.mrb[130].mxu1 }
 0x25a   : > { %2774 = vst [vmem:[%s5553_s10 + $0x78] sm:$0xff] %v2742_v43  ;;  %v2711_v59 = vadd.f32 %v5544_v48, %v2672_v47  ;;  %v2583_v25 = vadd.f32 %v3377_v3, %v2357_v6  ;;  %v2359_v38 = vpop.f32.mrb[131].mxu1 }
 0x25b   : > { %v3383_v17 = vpop.f32.mrb[116].mxu0 }
 0x25c   : > { %v2743_v39 = vmax.f32 %v2711_v59, 0.0  ;;  %v2673_v35 = vadd.f32 %v2583_v25, %v5499_v56  ;;  %v2597_v13 = vpop.f32.mrb[117].mxu0 }
 0x25d   : > { %v2362_v27 = vpop.f32.mrb[132].mxu1 }
 0x25e   : > { %2775 = vst [vmem:[%s5553_s10 + $0x80] sm:$0xff] %v2743_v39  ;;  %v2712_v61 = vadd.f32 %v5544_v48, %v2673_v35  ;;  %v2588_v40 = vadd.f32 %v2587_v16, %v2362_v27  ;;  %v2364_v22 = vpop.f32.mrb[133].mxu1 }
 0x25f   : > { %v3386_v45 = vpop.f32.mrb[118].mxu0 }
 0x260   : > { %v2744_v58 = vmax.f32 %v2712_v61, 0.0  ;;  %v2674_v29 = vadd.f32 %v2588_v40, %v5508_v53  ;;  %v2607_v8 = vpop.f32.mrb[119].mxu0 }
 0x261   : > { %v2367_v23 = vpop.f32.mrb[134].mxu1 }
 0x262   : > { %2776 = vst [vmem:[%s5553_s10 + $0x88] sm:$0xff] %v2744_v58  ;;  %v2713_v49 = vadd.f32 %v5544_v48, %v2674_v29  ;;  %v2593_v60 = vadd.f32 %v3380_v19, %v2367_v23  ;;  %v2369_v56 = vpop.f32.mrb[135].mxu1 }
 0x263   : > { %v3389_v4 = vpop.f32.mrb[120].mxu0 }
 0x264   : > { %v2745_v11 = vmax.f32 %v2713_v49, 0.0  ;;  %v2675_v1 = vadd.f32 %v2593_v60, %v5505_v36  ;;  %v2617_v31 = vpop.f32.mrb[121].mxu0 }
 0x265   : > { %v2372_v55 = vpop.f32.mrb[136].mxu1 }
 0x266   : > { %2777 = vst [vmem:[%s5553_s10 + $0x90] sm:$0xff] %v2745_v11  ;;  %v2714_v12 = vadd.f32 %v5544_v48, %v2675_v1  ;;  %v2598_v28 = vadd.f32 %v2597_v13, %v2372_v55  ;;  %v2374_v53 = vpop.f32.mrb[137].mxu1 }
 0x267   : > { %v3392_v14 = vpop.f32.mrb[122].mxu0 }
 0x268   : > { %v2746_v5 = vmax.f32 %v2714_v12, 0.0  ;;  %v2676_v26 = vadd.f32 %v2598_v28, %v5514_v24  ;;  %v2627_v15 = vpop.f32.mrb[123].mxu0 }
 0x269   : > { %v2377_v42 = vpop.f32.mrb[138].mxu1 }
 0x26a   : > { %2778 = vst [vmem:[%s5553_s10 + $0x98] sm:$0xff] %v2746_v5  ;;  %v2715_v51 = vadd.f32 %v5544_v48, %v2676_v26  ;;  %v2603_v9 = vadd.f32 %v3383_v17, %v2377_v42  ;;  %v2379_v36 = vpop.f32.mrb[139].mxu1 }
 0x26b   : > { %v3395_v63 = vpop.f32.mrb[124].mxu0 }
 0x26c   : > { %v2747_v30 = vmax.f32 %v2715_v51, 0.0  ;;  %v2677_v3 = vadd.f32 %v2603_v9, %v5511_v41  ;;  %v2637_v34 = vpop.f32.mrb[125].mxu0 }
 0x26d   : > { %v2382_v7 = vpop.f32.mrb[140].mxu1 }
 0x26e   : > { %2779 = vst [vmem:[%s5553_s10 + $0xa0] sm:$0xff] %v2747_v30  ;;  %v2716_v32 = vadd.f32 %v5544_v48, %v2677_v3  ;;  %v2608_v10 = vadd.f32 %v2607_v8, %v2382_v7  ;;  %v2384_v24 = vpop.f32.mrb[141].mxu1 }
 0x26f   : > { %v5614_v37 = vpop.f32.mrb[126].mxu0 }
 0x270   : > { %v2748_v44 = vmax.f32 %v2716_v32, 0.0  ;;  %v2678_v50 = vadd.f32 %v2608_v10, %v5520_v20  ;;  %v2647_v2 = vpop.f32.mrb[127].mxu0 }
 0x271   : > { %v2387_v19 = vpop.f32.mrb[142].mxu1 }
 0x272   : > { %2780 = vst [vmem:[%s5553_s10 + $0xa8] sm:$0xff] %v2748_v44  ;;  %v2717_v43 = vadd.f32 %v5544_v48, %v2678_v50  ;;  %v2613_v41 = vadd.f32 %v3386_v45, %v2387_v19  ;;  %v2389_v47 = vpop.f32.mrb[143].mxu1 }
 0x274   : > { %v2749_v16 = vmax.f32 %v2717_v43, 0.0  ;;  %v2679_v6 = vadd.f32 %v2613_v41, %v5517_v0 }
 0x275   : > { %v2392_v59 = vpop.f32.mrb[144].mxu1 }
 0x276   : > { %2781 = vst [vmem:[%s5553_s10 + $0xb0] sm:$0xff] %v2749_v16  ;;  %v2718_v25 = vadd.f32 %v5544_v48, %v2679_v6  ;;  %v2618_v38 = vadd.f32 %v2617_v31, %v2392_v59  ;;  %v2394_v17 = vpop.f32.mrb[145].mxu1 }
 0x278   : > { %v2750_v39 = vmax.f32 %v2718_v25, 0.0  ;;  %v2680_v20 = vadd.f32 %v2618_v38, %v5526_v18 }
 0x279   : > { %v2397_v35 = vpop.f32.mrb[146].mxu1 }
 0x27a   : > { %2782 = vst [vmem:[%s5553_s10 + $0xb8] sm:$0xff] %v2750_v39  ;;  %v2719_v13 = vadd.f32 %v5544_v48, %v2680_v20  ;;  %v2623_v27 = vadd.f32 %v3389_v4, %v2397_v35  ;;  %v2399_v61 = vpop.f32.mrb[147].mxu1 }
 0x27c   : > { %v2751_v40 = vmax.f32 %v2719_v13, 0.0  ;;  %v2681_v0 = vadd.f32 %v2623_v27, %v5523_v33 }
 0x27d   : > { %v2402_v22 = vpop.f32.mrb[148].mxu1 }
 0x27e   : > { %2783 = vst [vmem:[%s5553_s10 + $0xc0] sm:$0xff] %v2751_v40  ;;  %v2720_v45 = vadd.f32 %v5544_v48, %v2681_v0  ;;  %v2628_v58 = vadd.f32 %v2627_v15, %v2402_v22  ;;  %v2404_v29 = vpop.f32.mrb[149].mxu1 }
 0x280   : > { %v2752_v8 = vmax.f32 %v2720_v45, 0.0  ;;  %v2682_v18 = vadd.f32 %v2628_v58, %v5531_v57 }
 0x281   : > { %v2407_v23 = vpop.f32.mrb[150].mxu1 }
 0x282   : > { %2784 = vst [vmem:[%s5553_s10 + $0xc8] sm:$0xff] %v2752_v8  ;;  %v2721_v49 = vadd.f32 %v5544_v48, %v2682_v18  ;;  %v2633_v60 = vadd.f32 %v3392_v14, %v2407_v23  ;;  %v2409_v56 = vpop.f32.mrb[151].mxu1 }
 0x284   : > { %v2753_v4 = vmax.f32 %v2721_v49, 0.0  ;;  %v2683_v33 = vadd.f32 %v2633_v60, %v5528_v54 }
 0x285   : > { %v2412_v11 = vpop.f32.mrb[152].mxu1 }
 0x286   : > { %2785 = vst [vmem:[%s5553_s10 + $0xd0] sm:$0xff] %v2753_v4  ;;  %v2722_v1 = vadd.f32 %v5544_v48, %v2683_v33  ;;  %v2638_v31 = vadd.f32 %v2637_v34, %v2412_v11  ;;  %v2414_v55 = vpop.f32.mrb[153].mxu1 }
 0x288   : > { %v2754_v12 = vmax.f32 %v2722_v1, 0.0  ;;  %v2684_v57 = vadd.f32 %v2638_v31, %v5535_v46 }
 0x289   : > { %v2417_v28 = vpop.f32.mrb[154].mxu1 }
 0x28a   : > { %2786 = vst [vmem:[%s5553_s10 + $0xd8] sm:$0xff] %v2754_v12  ;;  %v2723_v53 = vadd.f32 %v5544_v48, %v2684_v57  ;;  %v2643_v14 = vadd.f32 %v3395_v63, %v2417_v28  ;;  %v2419_v5 = vpop.f32.mrb[155].mxu1 }
 0x28c   : > { %v2755_v26 = vmax.f32 %v2723_v53, 0.0  ;;  %v2685_v54 = vadd.f32 %v2643_v14, %v5533_v62 }
 0x28d   : > { %v2422_v15 = vpop.f32.mrb[156].mxu1 }
 0x28e   : > { %2787 = vst [vmem:[%s5553_s10 + $0xe0] sm:$0xff] %v2755_v26  ;;  %v2724_v42 = vadd.f32 %v5544_v48, %v2685_v54  ;;  %v2648_v51 = vadd.f32 %v2647_v2, %v2422_v15  ;;  %v2424_v9 = vpop.f32.mrb[157].mxu1 }
 0x290   : > { %v2756_v46 = vmax.f32 %v2724_v42, 0.0  ;;  %v2686_v36 = vadd.f32 %v2648_v51, %v5539_v21 }
 0x291   : > { %v2427_v30 = vpop.f32.mrb[158].mxu1 }
 0x292   : > { %2788 = vst [vmem:[%s5553_s10 + $0xe8] sm:$0xff] %v2756_v46  ;;  %v2725_v63 = vadd.f32 %v5544_v48, %v2686_v36  ;;  %v2653_v62 = vadd.f32 %v5614_v37, %v2427_v30  ;;  %v2429_v3 = vpop.f32.mrb[159].mxu1 }
 0x294   : > { %v2757_v34 = vmax.f32 %v2725_v63, 0.0  ;;  %v2687_v7 = vadd.f32 %v2653_v62, %v5537_v52 }
 0x296   : > { %2789 = vst [vmem:[%s5553_s10 + $0xf0] sm:$0xff] %v2757_v34  ;;  %v2726_v32 = vadd.f32 %v5544_v48, %v2687_v7 }
 0x298   : > { %v2758_v21 = vmax.f32 %v2726_v32, 0.0 }
 0x29a   : > { %2790 = vst [vmem:[%s5553_s10 + $0xf8] sm:$0xff] %v2758_v21 }
 0x29b   : > { %3823 = shalt.err (!%p3820_p5)
}
 0x29c   : > { %s3824_s26 = scalar_lea.hbm %s5652_s19, 4096  ;;  %s3828_s20 = scalar_lea.hbm %s5707_s3, 8192 }
 0x29d   : > { %p3825_p9 = scmp.ne.s32.totalorder %s5652_s19, %s3824_s26  ;;  %p3829_p3 = scmp.lt.u32.totalorder %s5652_s19, %s5707_s3 }
 0x29e   : > { %p3830_p7 = scmp.lt.u32.totalorder %s3828_s20, %s3824_s26  ;;  %p3832_p4 = scmp.lt.u32.totalorder %s3824_s26, %s5652_s19 }
 0x29f   : > { %p3826_p1 = pnand %p3825_p9, %p4021_p10 }
 0x2a0   : > { %p3831_p11 = por %p3830_p7, %p3829_p3 }
 0x2a1   : > { %p3827_p2 = pneg %p3826_p1 }
 0x2a2   : > { %p3833_p6 = por %p3832_p4, %p3831_p11 }
 0x2a4   : > { %p3834_p8 = pnand %p3833_p6, %p3827_p2 }
 0x2a6   : > { %3837 = shalt.err (!%p3834_p8)
}
 0x2a7   : > { %s3904_s10 = smov 128   ;;  %s3905_s11 = smov 8  }
 0x2a8   : > { %3648 = dma.vmem_to_hbm [thread:$0]  (%p4021_p10), %s5654_s7, 4096, %s5652_s19, %s2792_s30, %s3904_s10, %s3904_s10, %s3905_s11  }
 0x2a9 PF: > { %s2822_s8 = sand.u32 1, %s3876_s12   ;;  %p6165_p12 = scmp.ne.s32.totalorder %s5880_s23, 0 }
 0x2aa   : > { %p6166_p13 = scmp.ge.s32.totalorder %s3896_s17, 2  ;;  %s2823_s18 = scalar_lea.sflag [#allocation4], %s2822_s8 }
 0x2ac   : > { %p3659_p0 = pnand %p6166_p13, %p6165_p12 }
 0x2ae   : > { %3871 = dma.done.wait (!%p3659_p0), %s2823_s18, 4096  }
 0x2af   : > { %3873 = vsyncadd (!%p3659_p0), %s2823_s18, 4294963200  ;;  %s20_s17 = sadd.s32 1, %s3896_s17   ;;  %s6167_s12 = smov %s3880_s13 }
 0x2b0   : > { %p17_p5 = scmp.ge.s32.totalorder %s20_s17, 4   ;;  %s6168_s13 = smov %s3884_s14 }
 0x2b1   : > { %s6169_s14 = smov %s4030_s5  ;;  %s6170_s15 = smov %s3892_s16 }
 0x2b2   : > { %s6171_s16 = smov %s6173_s28  ;;  %19 = sbr.rel (!%p17_p5) target bundleno = 7 (0x7), region = 84 }
 0x2b9   :  { %2828 = vsyncpa [#allocation3], 1 }
 0x2ba   :  { %2830 = vsyncpa [#allocation3 + $0x1], 1 }
 0x2bb   :  { %2831 = vsyncpa [#allocation6], 1 }
 0x2bc   :  { %2832 = vsyncpa [#allocation4], 1 }
 0x2bd   :  { %2834 = vsyncpa [#allocation4 + $0x1], 1 }

</bundles_post_ra>
